<compile_context>
chip_gen: v6e
topology: v6e:2x2x1
jax: 0.10.0
libtpu: 0.0.40
codegen_flags: <defaults>
</compile_context>

<pallas_src>
import numpy as np

import jax
import jax.numpy as jnp
from jax.experimental import pallas as pl
from jax.experimental.pallas import tpu as pltpu


# Architecture constants implied by the PyTorch module
# (mlp1 in_features = 1024 = 64*4*4 forces a 60x60 input for this conv stack).
IN_H = IN_W = 60
OH1 = OW1 = 14          # conv1: k8 s4
OH2 = OW2 = 6           # conv2: k4 s2
OH3 = OW3 = 4           # conv3: k3 s1
ROWS1 = OH1 * OW1       # 196 conv1 output positions per sample
ROWS2 = OH2 * OW2       # 36
ROWS2_PAD = 48          # padded to a multiple of the bf16 sublane tile (16)
ROWS3 = OH3 * OW3       # 16
TAPS2 = 16              # 4x4 conv2 taps
TAPS3 = 9               # 3x3 conv3 taps
C1, C2, C3 = 32, 64, 64
HIDDEN = 512


def _round_up(x, m):
    return (x + m - 1) // m * m


# ----------------------------------------------------------------------------
# Fused kernel: conv1 -> conv2 -> conv3 -> mlp1 -> mlp2 for ONE sample
# ----------------------------------------------------------------------------
def _qnet_kernel(p1_ref, w1_ref, b1_ref,
                 s2_ref, w2_ref, b2_ref,
                 s3_ref, w3_ref, b3_ref,
                 wm1_ref, bm1_ref, wm2_ref, bm2_ref,
                 out_ref):
    f32, bf16 = jnp.float32, jnp.bfloat16

    # ---- conv1: one matmul over the pre-packed (2x2 x 64ch) patches --------
    a1 = jnp.dot(p1_ref[0], w1_ref[...], preferred_element_type=f32)
    a1 = jnp.maximum(a1 + b1_ref[...], 0.0).astype(bf16)              # (196, 32)

    # ---- conv2: spatial gather as one MXU matmul, then 16 tap matmuls ------
    g2 = jnp.dot(s2_ref[...], a1, preferred_element_type=f32).astype(bf16)   # (768, 32)
    acc2 = jnp.zeros((ROWS2_PAD, C2), f32)
    for t in range(TAPS2):
        acc2 = acc2 + jnp.dot(g2[t * ROWS2_PAD:(t + 1) * ROWS2_PAD, :],
                              w2_ref[t * C1:(t + 1) * C1, :],
                              preferred_element_type=f32)
    a2 = jnp.maximum(acc2 + b2_ref[...], 0.0).astype(bf16)            # (48, 64)

    # ---- conv3 -------------------------------------------------------------
    g3 = jnp.dot(s3_ref[...], a2, preferred_element_type=f32).astype(bf16)   # (144, 64)
    acc3 = jnp.zeros((ROWS3, C3), f32)
    for t in range(TAPS3):
        acc3 = acc3 + jnp.dot(g3[t * ROWS3:(t + 1) * ROWS3, :],
                              w3_ref[t * C2:(t + 1) * C2, :],
                              preferred_element_type=f32)
    a3 = jnp.maximum(acc3 + b3_ref[...], 0.0).astype(bf16)            # (16, 64)

    # ---- mlp1: sum over the 16 spatial positions (torch.flatten's NCHW
    #            ordering is folded into the pre-permuted weight rows) -------
    acc4 = jnp.zeros((1, HIDDEN), f32)
    for hw in range(ROWS3):
        acc4 = acc4 + jnp.dot(a3[hw:hw + 1, :],
                              wm1_ref[hw * C3:(hw + 1) * C3, :],
                              preferred_element_type=f32)
    y1 = jnp.maximum(acc4 + bm1_ref[...], 0.0).astype(bf16)           # (1, 512)

    # ---- mlp2 (no activation) ----------------------------------------------
    y2 = jnp.dot(y1, wm2_ref[...], preferred_element_type=f32) + bm2_ref[...]
    out_ref[0] = y2.astype(jnp.float32)


# ----------------------------------------------------------------------------
# One-time parameter preparation (PyTorch layout -> kernel operands)
# ----------------------------------------------------------------------------
def _selection_matrix(oh, ow, k, stride, in_h, in_w, rows_per_tap, src_rows):
    """0/1 gather matrix: row (tap*rows_per_tap + i*ow + j) selects input row
    (stride*i+ki)*in_w + (stride*j+kj) of an [in_h*in_w, C] activation."""
    s = np.zeros((k * k * rows_per_tap, src_rows), np.float32)
    for ki in range(k):
        for kj in range(k):
            t = ki * k + kj
            for i in range(oh):
                for j in range(ow):
                    src = (stride * i + ki) * in_w + (stride * j + kj)
                    s[t * rows_per_tap + i * ow + j, src] = 1.0
    return s


def init_params(key, n_input_channels, n_actions):
    """Deterministic PyTorch-shaped parameters (same layout as the nn.Module)."""
    ks = jax.random.split(key, 10)
    scale = 0.05

    def w(k, shape):
        return jax.random.normal(k, shape, dtype=jnp.float32) * scale

    return {
        "conv1_w": w(ks[0], (32, n_input_channels, 8, 8)),
        "conv1_b": w(ks[1], (32,)),
        "conv2_w": w(ks[2], (64, 32, 4, 4)),
        "conv2_b": w(ks[3], (64,)),
        "conv3_w": w(ks[4], (64, 64, 3, 3)),
        "conv3_b": w(ks[5], (64,)),
        "mlp1_w": w(ks[6], (512, 1024)),   # torch.nn.Linear: (out, in)
        "mlp1_b": w(ks[7], (512,)),
        "mlp2_w": w(ks[8], (n_actions, 512)),
        "mlp2_b": w(ks[9], (n_actions,)),
    }


def prepare_params(params):
    """Convert PyTorch-layout params into fused-kernel operands: bf16 matmul
    layouts, flatten permutation folded in, K dims padded. Done once."""
    c_in = params["conv1_w"].shape[1]
    cs2d = 16 * c_in                     # space-to-depth channels (4*4*C)
    cs2d_pad = _round_up(cs2d, 64)       # lane-friendly pad (48 -> 64 for C=3)

    # conv1 -> (4*cs2d_pad, 32), rows ordered (qi, qj, r, s, c) to match the
    # wrapper's space-to-depth + 2x2 patch packing (ki = 4*qi + r, etc).
    w1 = jnp.transpose(params["conv1_w"], (2, 3, 1, 0))          # (ki,kj,c,co)
    w1 = w1.reshape(2, 4, 2, 4, c_in, C1)                        # (qi,r,qj,s,c,co)
    w1 = jnp.transpose(w1, (0, 2, 1, 3, 4, 5)).reshape(4, cs2d, C1)
    w1 = jnp.pad(w1, ((0, 0), (0, cs2d_pad - cs2d), (0, 0)))
    w1 = w1.reshape(4 * cs2d_pad, C1)

    # conv2 / conv3 -> (taps*cin, cout), taps ordered (ki, kj) row-major.
    w2 = jnp.transpose(params["conv2_w"], (2, 3, 1, 0)).reshape(TAPS2 * C1, C2)
    w3 = jnp.transpose(params["conv3_w"], (2, 3, 1, 0)).reshape(TAPS3 * C2, C3)

    # mlp1: fold torch.flatten's (c*16 + hw) NCHW ordering into a row permute
    # so the kernel consumes the NHWC conv3 activation directly.
    wm1 = params["mlp1_w"].reshape(HIDDEN, C3, ROWS3)            # [o, c, hw]
    wm1 = jnp.transpose(wm1, (2, 1, 0)).reshape(ROWS3 * C3, HIDDEN)
    wm2 = jnp.transpose(params["mlp2_w"], (1, 0))                # (512, A)

    bf16 = jnp.bfloat16
    return {
        "w1": w1.astype(bf16), "b1": params["conv1_b"].reshape(1, C1),
        "s2": jnp.asarray(_selection_matrix(OH2, OW2, 4, 2, OH1, OW1,
                                            ROWS2_PAD, ROWS1), bf16),
        "w2": w2.astype(bf16), "b2": params["conv2_b"].reshape(1, C2),
        "s3": jnp.asarray(_selection_matrix(OH3, OW3, 3, 1, OH2, OW2,
                                            ROWS3, ROWS2_PAD), bf16),
        "w3": w3.astype(bf16), "b3": params["conv3_b"].reshape(1, C3),
        "wm1": wm1.astype(bf16), "bm1": params["mlp1_b"].reshape(1, HIDDEN),
        "wm2": wm2.astype(bf16), "bm2": params["mlp2_b"].reshape(1, -1),
    }


# ----------------------------------------------------------------------------
# Forward pass
# ----------------------------------------------------------------------------
def _extract_patches(x_nchw):
    """NCHW input -> (N, 196, 4*cs2d_pad) bf16 conv1 patches via one
    space-to-depth (factor 4) plus a 2x2 stride-1 patch concat. This is the
    only XLA glue; every intermediate layer stays inside the kernel."""
    n, c, h, w = x_nchw.shape
    assert h == IN_H and w == IN_W, (h, w)
    cs2d = 16 * c
    cs2d_pad = _round_up(cs2d, 64)
    x = jnp.transpose(x_nchw, (0, 2, 3, 1))                       # NHWC
    x = x.reshape(n, h // 4, 4, w // 4, 4, c)
    x = jnp.transpose(x, (0, 1, 3, 2, 4, 5)).reshape(n, h // 4, w // 4, cs2d)
    x = jnp.pad(x, ((0, 0), (0, 0), (0, 0), (0, cs2d_pad - cs2d)))
    taps = [x[:, qi:qi + OH1, qj:qj + OW1, :] for qi in (0, 1) for qj in (0, 1)]
    p = jnp.concatenate(taps, axis=-1)                            # (N,14,14,4*pad)
    return p.reshape(n, ROWS1, 4 * cs2d_pad).astype(jnp.bfloat16)


@jax.jit
def qnet_forward(prepped, x):
    """x: (N, C, 60, 60) float32 NCHW (PyTorch layout) -> (N, n_actions) f32."""
    n = x.shape[0]
    patches = _extract_patches(x)
    k1 = patches.shape[-1]
    n_actions = prepped["wm2"].shape[1]

    def full(a):
        return pl.BlockSpec(a.shape, lambda b: (0,) * a.ndim)

    out = pl.pallas_call(
        _qnet_kernel,
        out_shape=jax.ShapeDtypeStruct((n, 1, n_actions), jnp.float32),
        grid=(n,),
        in_specs=[
            pl.BlockSpec((1, ROWS1, k1), lambda b: (b, 0, 0)),
            full(prepped["w1"]), full(prepped["b1"]),
            full(prepped["s2"]), full(prepped["w2"]), full(prepped["b2"]),
            full(prepped["s3"]), full(prepped["w3"]), full(prepped["b3"]),
            full(prepped["wm1"]), full(prepped["bm1"]),
            full(prepped["wm2"]), full(prepped["bm2"]),
        ],
        out_specs=pl.BlockSpec((1, 1, n_actions), lambda b: (b, 0, 0)),
        compiler_params=pltpu.CompilerParams(
            dimension_semantics=("parallel",)),
    )(patches, prepped["w1"], prepped["b1"],
      prepped["s2"], prepped["w2"], prepped["b2"],
      prepped["s3"], prepped["w3"], prepped["b3"],
      prepped["wm1"], prepped["bm1"], prepped["wm2"], prepped["bm2"])
    return out.reshape(n, n_actions)


# ----------------------------------------------------------------------------
# Plain-JAX f32 reference (for a loose correctness check only)
# ----------------------------------------------------------------------------
def qnet_reference(params, x):
    def conv(z, w, b, stride):
        z = jax.lax.conv_general_dilated(
            z, w, window_strides=(stride, stride), padding="VALID",
            dimension_numbers=("NCHW", "OIHW", "NCHW"))
        return jax.nn.relu(z + b[None, :, None, None])

    x = conv(x, params["conv1_w"], params["conv1_b"], 4)
    x = conv(x, params["conv2_w"], params["conv2_b"], 2)
    x = conv(x, params["conv3_w"], params["conv3_b"], 1)
    x = x.reshape(x.shape[0], -1)                      # torch.flatten(x, 1)
    x = jax.nn.relu(x @ params["mlp1_w"].T + params["mlp1_b"])
    return x @ params["mlp2_w"].T + params["mlp2_b"]


if __name__ == "__main__":
    key = jax.random.PRNGKey(0)
    n_input_channels = 3
    n_actions = 3
    params = init_params(key, n_input_channels, n_actions)
    prepped = prepare_params(params)

    # 60x60 input is what the module's mlp1 (1024 = 64*4*4) implies.
    x = jax.random.uniform(
        jax.random.fold_in(key, 123),
        (2, n_input_channels, IN_H, IN_W), dtype=jnp.float32)

    out = qnet_forward(prepped, x)
    jax.block_until_ready(out)
    assert out.shape == (2, n_actions), out.shape
    assert out.dtype == jnp.float32

    ref = qnet_reference(params, x)
    err = float(jnp.max(jnp.abs(out - ref)))
    # bf16 MXU operands (f32 accumulation) -> expect ~1e-2-scale deviation.
    assert err < 8e-2, f"max abs err vs f32 reference: {err}"
    print("KERNEL_OK")
</pallas_src>

<mosaic_0001>
module attributes {stable_mosaic.version = 11 : i64} {
  func.func @_qnet_kernel(%arg0: i32, %arg1: memref<1x196x256xbf16, #tpu.memory_space<vmem>>, %arg2: memref<256x32xbf16, #tpu.memory_space<vmem>>, %arg3: memref<1x32xf32, #tpu.memory_space<vmem>>, %arg4: memref<768x196xbf16, #tpu.memory_space<vmem>>, %arg5: memref<512x64xbf16, #tpu.memory_space<vmem>>, %arg6: memref<1x64xf32, #tpu.memory_space<vmem>>, %arg7: memref<144x48xbf16, #tpu.memory_space<vmem>>, %arg8: memref<576x64xbf16, #tpu.memory_space<vmem>>, %arg9: memref<1x64xf32, #tpu.memory_space<vmem>>, %arg10: memref<1024x512xbf16, #tpu.memory_space<vmem>>, %arg11: memref<1x512xf32, #tpu.memory_space<vmem>>, %arg12: memref<512x3xbf16, #tpu.memory_space<vmem>>, %arg13: memref<1x3xf32, #tpu.memory_space<vmem>>, %arg14: memref<1x1x3xf32, #tpu.memory_space<vmem>>) attributes {dimension_semantics = [#tpu.dimension_semantics<parallel>], iteration_bounds = array<i64: 2>, scalar_prefetch = 0 : i64, scratch_operands = 0 : i64, tpu.core_type = #tpu.core_type<tc>, window_params = [{transform_indices = @transform_0, window_bounds = array<i64: 1, 196, 256>}, {pipeline_mode = #tpu.pipeline_mode<synchronous>, transform_indices = @transform_1, window_bounds = array<i64: 256, 32>}, {pipeline_mode = #tpu.pipeline_mode<synchronous>, transform_indices = @transform_2, window_bounds = array<i64: 1, 32>}, {pipeline_mode = #tpu.pipeline_mode<synchronous>, transform_indices = @transform_3, window_bounds = array<i64: 768, 196>}, {pipeline_mode = #tpu.pipeline_mode<synchronous>, transform_indices = @transform_4, window_bounds = array<i64: 512, 64>}, {pipeline_mode = #tpu.pipeline_mode<synchronous>, transform_indices = @transform_5, window_bounds = array<i64: 1, 64>}, {pipeline_mode = #tpu.pipeline_mode<synchronous>, transform_indices = @transform_6, window_bounds = array<i64: 144, 48>}, {pipeline_mode = #tpu.pipeline_mode<synchronous>, transform_indices = @transform_7, window_bounds = array<i64: 576, 64>}, {pipeline_mode = #tpu.pipeline_mode<synchronous>, transform_indices = @transform_8, window_bounds = array<i64: 1, 64>}, {pipeline_mode = #tpu.pipeline_mode<synchronous>, transform_indices = @transform_9, window_bounds = array<i64: 1024, 512>}, {pipeline_mode = #tpu.pipeline_mode<synchronous>, transform_indices = @transform_10, window_bounds = array<i64: 1, 512>}, {pipeline_mode = #tpu.pipeline_mode<synchronous>, transform_indices = @transform_11, window_bounds = array<i64: 512, 3>}, {pipeline_mode = #tpu.pipeline_mode<synchronous>, transform_indices = @transform_12, window_bounds = array<i64: 1, 3>}, {transform_indices = @transform_13, window_bounds = array<i64: 1, 1, 3>}]} {
    %c0 = arith.constant 0 : index
    %c0_0 = arith.constant 0 : index
    %c0_1 = arith.constant 0 : index
    %0 = vector.load %arg1[%c0, %c0_0, %c0_1] : memref<1x196x256xbf16, #tpu.memory_space<vmem>>, vector<1x196x256xbf16>
    %1 = vector.shape_cast %0 : vector<1x196x256xbf16> to vector<196x256xbf16>
    %c0_2 = arith.constant 0 : index
    %c0_3 = arith.constant 0 : index
    %2 = vector.load %arg2[%c0_2, %c0_3] : memref<256x32xbf16, #tpu.memory_space<vmem>>, vector<256x32xbf16>
    %cst = arith.constant dense<0.000000e+00> : vector<196x32xf32>
    %3 = tpu.matmul %1, %2, %cst {dimension_numbers = #tpu.dot_dimension_numbers<[1], [0], [0], [1], [0, 0, 1, 1], [], []>} : vector<196x256xbf16>, vector<256x32xbf16>, vector<196x32xf32> -> vector<196x32xf32>
    %c0_4 = arith.constant 0 : index
    %c0_5 = arith.constant 0 : index
    %4 = vector.load %arg3[%c0_4, %c0_5] : memref<1x32xf32, #tpu.memory_space<vmem>>, vector<1x32xf32>
    %5 = vector.broadcast %4 : vector<1x32xf32> to vector<196x32xf32>
    %6 = arith.addf %3, %5 : vector<196x32xf32>
    %cst_6 = arith.constant 0.000000e+00 : f32
    %7 = vector.broadcast %cst_6 : f32 to vector<196x32xf32>
    %8 = arith.maximumf %6, %7 : vector<196x32xf32>
    %9 = arith.truncf %8 : vector<196x32xf32> to vector<196x32xbf16>
    %c0_7 = arith.constant 0 : index
    %c0_8 = arith.constant 0 : index
    %10 = vector.load %arg4[%c0_7, %c0_8] : memref<768x196xbf16, #tpu.memory_space<vmem>>, vector<768x196xbf16>
    %cst_9 = arith.constant dense<0.000000e+00> : vector<768x32xf32>
    %11 = tpu.matmul %10, %9, %cst_9 {dimension_numbers = #tpu.dot_dimension_numbers<[1], [0], [0], [1], [0, 0, 1, 1], [], []>} : vector<768x196xbf16>, vector<196x32xbf16>, vector<768x32xf32> -> vector<768x32xf32>
    %12 = arith.truncf %11 : vector<768x32xf32> to vector<768x32xbf16>
    %cst_10 = arith.constant 0.000000e+00 : f32
    %13 = vector.broadcast %cst_10 : f32 to vector<48x64xf32>
    %14 = vector.extract_strided_slice %12 {offsets = [0, 0], sizes = [48, 32], strides = [1, 1]} : vector<768x32xbf16> to vector<48x32xbf16>
    %c0_11 = arith.constant 0 : index
    %c0_12 = arith.constant 0 : index
    %15 = vector.load %arg5[%c0_11, %c0_12] : memref<512x64xbf16, #tpu.memory_space<vmem>>, vector<32x64xbf16>
    %cst_13 = arith.constant dense<0.000000e+00> : vector<48x64xf32>
    %16 = tpu.matmul %14, %15, %cst_13 {dimension_numbers = #tpu.dot_dimension_numbers<[1], [0], [0], [1], [0, 0, 1, 1], [], []>} : vector<48x32xbf16>, vector<32x64xbf16>, vector<48x64xf32> -> vector<48x64xf32>
    %17 = arith.addf %13, %16 : vector<48x64xf32>
    %18 = vector.extract_strided_slice %12 {offsets = [48, 0], sizes = [48, 32], strides = [1, 1]} : vector<768x32xbf16> to vector<48x32xbf16>
    %c32 = arith.constant 32 : index
    %c0_14 = arith.constant 0 : index
    %19 = vector.load %arg5[%c32, %c0_14] : memref<512x64xbf16, #tpu.memory_space<vmem>>, vector<32x64xbf16>
    %cst_15 = arith.constant dense<0.000000e+00> : vector<48x64xf32>
    %20 = tpu.matmul %18, %19, %cst_15 {dimension_numbers = #tpu.dot_dimension_numbers<[1], [0], [0], [1], [0, 0, 1, 1], [], []>} : vector<48x32xbf16>, vector<32x64xbf16>, vector<48x64xf32> -> vector<48x64xf32>
    %21 = arith.addf %17, %20 : vector<48x64xf32>
    %22 = vector.extract_strided_slice %12 {offsets = [96, 0], sizes = [48, 32], strides = [1, 1]} : vector<768x32xbf16> to vector<48x32xbf16>
    %c64 = arith.constant 64 : index
    %c0_16 = arith.constant 0 : index
    %23 = vector.load %arg5[%c64, %c0_16] : memref<512x64xbf16, #tpu.memory_space<vmem>>, vector<32x64xbf16>
    %cst_17 = arith.constant dense<0.000000e+00> : vector<48x64xf32>
    %24 = tpu.matmul %22, %23, %cst_17 {dimension_numbers = #tpu.dot_dimension_numbers<[1], [0], [0], [1], [0, 0, 1, 1], [], []>} : vector<48x32xbf16>, vector<32x64xbf16>, vector<48x64xf32> -> vector<48x64xf32>
    %25 = arith.addf %21, %24 : vector<48x64xf32>
    %26 = vector.extract_strided_slice %12 {offsets = [144, 0], sizes = [48, 32], strides = [1, 1]} : vector<768x32xbf16> to vector<48x32xbf16>
    %c96 = arith.constant 96 : index
    %c0_18 = arith.constant 0 : index
    %27 = vector.load %arg5[%c96, %c0_18] : memref<512x64xbf16, #tpu.memory_space<vmem>>, vector<32x64xbf16>
    %cst_19 = arith.constant dense<0.000000e+00> : vector<48x64xf32>
    %28 = tpu.matmul %26, %27, %cst_19 {dimension_numbers = #tpu.dot_dimension_numbers<[1], [0], [0], [1], [0, 0, 1, 1], [], []>} : vector<48x32xbf16>, vector<32x64xbf16>, vector<48x64xf32> -> vector<48x64xf32>
    %29 = arith.addf %25, %28 : vector<48x64xf32>
    %30 = vector.extract_strided_slice %12 {offsets = [192, 0], sizes = [48, 32], strides = [1, 1]} : vector<768x32xbf16> to vector<48x32xbf16>
    %c128 = arith.constant 128 : index
    %c0_20 = arith.constant 0 : index
    %31 = vector.load %arg5[%c128, %c0_20] : memref<512x64xbf16, #tpu.memory_space<vmem>>, vector<32x64xbf16>
    %cst_21 = arith.constant dense<0.000000e+00> : vector<48x64xf32>
    %32 = tpu.matmul %30, %31, %cst_21 {dimension_numbers = #tpu.dot_dimension_numbers<[1], [0], [0], [1], [0, 0, 1, 1], [], []>} : vector<48x32xbf16>, vector<32x64xbf16>, vector<48x64xf32> -> vector<48x64xf32>
    %33 = arith.addf %29, %32 : vector<48x64xf32>
    %34 = vector.extract_strided_slice %12 {offsets = [240, 0], sizes = [48, 32], strides = [1, 1]} : vector<768x32xbf16> to vector<48x32xbf16>
    %c160 = arith.constant 160 : index
    %c0_22 = arith.constant 0 : index
    %35 = vector.load %arg5[%c160, %c0_22] : memref<512x64xbf16, #tpu.memory_space<vmem>>, vector<32x64xbf16>
    %cst_23 = arith.constant dense<0.000000e+00> : vector<48x64xf32>
    %36 = tpu.matmul %34, %35, %cst_23 {dimension_numbers = #tpu.dot_dimension_numbers<[1], [0], [0], [1], [0, 0, 1, 1], [], []>} : vector<48x32xbf16>, vector<32x64xbf16>, vector<48x64xf32> -> vector<48x64xf32>
    %37 = arith.addf %33, %36 : vector<48x64xf32>
    %38 = vector.extract_strided_slice %12 {offsets = [288, 0], sizes = [48, 32], strides = [1, 1]} : vector<768x32xbf16> to vector<48x32xbf16>
    %c192 = arith.constant 192 : index
    %c0_24 = arith.constant 0 : index
    %39 = vector.load %arg5[%c192, %c0_24] : memref<512x64xbf16, #tpu.memory_space<vmem>>, vector<32x64xbf16>
    %cst_25 = arith.constant dense<0.000000e+00> : vector<48x64xf32>
    %40 = tpu.matmul %38, %39, %cst_25 {dimension_numbers = #tpu.dot_dimension_numbers<[1], [0], [0], [1], [0, 0, 1, 1], [], []>} : vector<48x32xbf16>, vector<32x64xbf16>, vector<48x64xf32> -> vector<48x64xf32>
    %41 = arith.addf %37, %40 : vector<48x64xf32>
    %42 = vector.extract_strided_slice %12 {offsets = [336, 0], sizes = [48, 32], strides = [1, 1]} : vector<768x32xbf16> to vector<48x32xbf16>
    %c224 = arith.constant 224 : index
    %c0_26 = arith.constant 0 : index
    %43 = vector.load %arg5[%c224, %c0_26] : memref<512x64xbf16, #tpu.memory_space<vmem>>, vector<32x64xbf16>
    %cst_27 = arith.constant dense<0.000000e+00> : vector<48x64xf32>
    %44 = tpu.matmul %42, %43, %cst_27 {dimension_numbers = #tpu.dot_dimension_numbers<[1], [0], [0], [1], [0, 0, 1, 1], [], []>} : vector<48x32xbf16>, vector<32x64xbf16>, vector<48x64xf32> -> vector<48x64xf32>
    %45 = arith.addf %41, %44 : vector<48x64xf32>
    %46 = vector.extract_strided_slice %12 {offsets = [384, 0], sizes = [48, 32], strides = [1, 1]} : vector<768x32xbf16> to vector<48x32xbf16>
    %c256 = arith.constant 256 : index
    %c0_28 = arith.constant 0 : index
    %47 = vector.load %arg5[%c256, %c0_28] : memref<512x64xbf16, #tpu.memory_space<vmem>>, vector<32x64xbf16>
    %cst_29 = arith.constant dense<0.000000e+00> : vector<48x64xf32>
    %48 = tpu.matmul %46, %47, %cst_29 {dimension_numbers = #tpu.dot_dimension_numbers<[1], [0], [0], [1], [0, 0, 1, 1], [], []>} : vector<48x32xbf16>, vector<32x64xbf16>, vector<48x64xf32> -> vector<48x64xf32>
    %49 = arith.addf %45, %48 : vector<48x64xf32>
    %50 = vector.extract_strided_slice %12 {offsets = [432, 0], sizes = [48, 32], strides = [1, 1]} : vector<768x32xbf16> to vector<48x32xbf16>
    %c288 = arith.constant 288 : index
    %c0_30 = arith.constant 0 : index
    %51 = vector.load %arg5[%c288, %c0_30] : memref<512x64xbf16, #tpu.memory_space<vmem>>, vector<32x64xbf16>
    %cst_31 = arith.constant dense<0.000000e+00> : vector<48x64xf32>
    %52 = tpu.matmul %50, %51, %cst_31 {dimension_numbers = #tpu.dot_dimension_numbers<[1], [0], [0], [1], [0, 0, 1, 1], [], []>} : vector<48x32xbf16>, vector<32x64xbf16>, vector<48x64xf32> -> vector<48x64xf32>
    %53 = arith.addf %49, %52 : vector<48x64xf32>
    %54 = vector.extract_strided_slice %12 {offsets = [480, 0], sizes = [48, 32], strides = [1, 1]} : vector<768x32xbf16> to vector<48x32xbf16>
    %c320 = arith.constant 320 : index
    %c0_32 = arith.constant 0 : index
    %55 = vector.load %arg5[%c320, %c0_32] : memref<512x64xbf16, #tpu.memory_space<vmem>>, vector<32x64xbf16>
    %cst_33 = arith.constant dense<0.000000e+00> : vector<48x64xf32>
    %56 = tpu.matmul %54, %55, %cst_33 {dimension_numbers = #tpu.dot_dimension_numbers<[1], [0], [0], [1], [0, 0, 1, 1], [], []>} : vector<48x32xbf16>, vector<32x64xbf16>, vector<48x64xf32> -> vector<48x64xf32>
    %57 = arith.addf %53, %56 : vector<48x64xf32>
    %58 = vector.extract_strided_slice %12 {offsets = [528, 0], sizes = [48, 32], strides = [1, 1]} : vector<768x32xbf16> to vector<48x32xbf16>
    %c352 = arith.constant 352 : index
    %c0_34 = arith.constant 0 : index
    %59 = vector.load %arg5[%c352, %c0_34] : memref<512x64xbf16, #tpu.memory_space<vmem>>, vector<32x64xbf16>
    %cst_35 = arith.constant dense<0.000000e+00> : vector<48x64xf32>
    %60 = tpu.matmul %58, %59, %cst_35 {dimension_numbers = #tpu.dot_dimension_numbers<[1], [0], [0], [1], [0, 0, 1, 1], [], []>} : vector<48x32xbf16>, vector<32x64xbf16>, vector<48x64xf32> -> vector<48x64xf32>
    %61 = arith.addf %57, %60 : vector<48x64xf32>
    %62 = vector.extract_strided_slice %12 {offsets = [576, 0], sizes = [48, 32], strides = [1, 1]} : vector<768x32xbf16> to vector<48x32xbf16>
    %c384 = arith.constant 384 : index
    %c0_36 = arith.constant 0 : index
    %63 = vector.load %arg5[%c384, %c0_36] : memref<512x64xbf16, #tpu.memory_space<vmem>>, vector<32x64xbf16>
    %cst_37 = arith.constant dense<0.000000e+00> : vector<48x64xf32>
    %64 = tpu.matmul %62, %63, %cst_37 {dimension_numbers = #tpu.dot_dimension_numbers<[1], [0], [0], [1], [0, 0, 1, 1], [], []>} : vector<48x32xbf16>, vector<32x64xbf16>, vector<48x64xf32> -> vector<48x64xf32>
    %65 = arith.addf %61, %64 : vector<48x64xf32>
    %66 = vector.extract_strided_slice %12 {offsets = [624, 0], sizes = [48, 32], strides = [1, 1]} : vector<768x32xbf16> to vector<48x32xbf16>
    %c416 = arith.constant 416 : index
    %c0_38 = arith.constant 0 : index
    %67 = vector.load %arg5[%c416, %c0_38] : memref<512x64xbf16, #tpu.memory_space<vmem>>, vector<32x64xbf16>
    %cst_39 = arith.constant dense<0.000000e+00> : vector<48x64xf32>
    %68 = tpu.matmul %66, %67, %cst_39 {dimension_numbers = #tpu.dot_dimension_numbers<[1], [0], [0], [1], [0, 0, 1, 1], [], []>} : vector<48x32xbf16>, vector<32x64xbf16>, vector<48x64xf32> -> vector<48x64xf32>
    %69 = arith.addf %65, %68 : vector<48x64xf32>
    %70 = vector.extract_strided_slice %12 {offsets = [672, 0], sizes = [48, 32], strides = [1, 1]} : vector<768x32xbf16> to vector<48x32xbf16>
    %c448 = arith.constant 448 : index
    %c0_40 = arith.constant 0 : index
    %71 = vector.load %arg5[%c448, %c0_40] : memref<512x64xbf16, #tpu.memory_space<vmem>>, vector<32x64xbf16>
    %cst_41 = arith.constant dense<0.000000e+00> : vector<48x64xf32>
    %72 = tpu.matmul %70, %71, %cst_41 {dimension_numbers = #tpu.dot_dimension_numbers<[1], [0], [0], [1], [0, 0, 1, 1], [], []>} : vector<48x32xbf16>, vector<32x64xbf16>, vector<48x64xf32> -> vector<48x64xf32>
    %73 = arith.addf %69, %72 : vector<48x64xf32>
    %74 = vector.extract_strided_slice %12 {offsets = [720, 0], sizes = [48, 32], strides = [1, 1]} : vector<768x32xbf16> to vector<48x32xbf16>
    %c480 = arith.constant 480 : index
    %c0_42 = arith.constant 0 : index
    %75 = vector.load %arg5[%c480, %c0_42] : memref<512x64xbf16, #tpu.memory_space<vmem>>, vector<32x64xbf16>
    %cst_43 = arith.constant dense<0.000000e+00> : vector<48x64xf32>
    %76 = tpu.matmul %74, %75, %cst_43 {dimension_numbers = #tpu.dot_dimension_numbers<[1], [0], [0], [1], [0, 0, 1, 1], [], []>} : vector<48x32xbf16>, vector<32x64xbf16>, vector<48x64xf32> -> vector<48x64xf32>
    %77 = arith.addf %73, %76 : vector<48x64xf32>
    %c0_44 = arith.constant 0 : index
    %c0_45 = arith.constant 0 : index
    %78 = vector.load %arg6[%c0_44, %c0_45] : memref<1x64xf32, #tpu.memory_space<vmem>>, vector<1x64xf32>
    %79 = vector.broadcast %78 : vector<1x64xf32> to vector<48x64xf32>
    %80 = arith.addf %77, %79 : vector<48x64xf32>
    %cst_46 = arith.constant 0.000000e+00 : f32
    %81 = vector.broadcast %cst_46 : f32 to vector<48x64xf32>
    %82 = arith.maximumf %80, %81 : vector<48x64xf32>
    %83 = arith.truncf %82 : vector<48x64xf32> to vector<48x64xbf16>
    %c0_47 = arith.constant 0 : index
    %c0_48 = arith.constant 0 : index
    %84 = vector.load %arg7[%c0_47, %c0_48] : memref<144x48xbf16, #tpu.memory_space<vmem>>, vector<144x48xbf16>
    %cst_49 = arith.constant dense<0.000000e+00> : vector<144x64xf32>
    %85 = tpu.matmul %84, %83, %cst_49 {dimension_numbers = #tpu.dot_dimension_numbers<[1], [0], [0], [1], [0, 0, 1, 1], [], []>} : vector<144x48xbf16>, vector<48x64xbf16>, vector<144x64xf32> -> vector<144x64xf32>
    %86 = arith.truncf %85 : vector<144x64xf32> to vector<144x64xbf16>
    %cst_50 = arith.constant 0.000000e+00 : f32
    %87 = vector.broadcast %cst_50 : f32 to vector<16x64xf32>
    %88 = vector.extract_strided_slice %86 {offsets = [0, 0], sizes = [16, 64], strides = [1, 1]} : vector<144x64xbf16> to vector<16x64xbf16>
    %c0_51 = arith.constant 0 : index
    %c0_52 = arith.constant 0 : index
    %89 = vector.load %arg8[%c0_51, %c0_52] : memref<576x64xbf16, #tpu.memory_space<vmem>>, vector<64x64xbf16>
    %cst_53 = arith.constant dense<0.000000e+00> : vector<16x64xf32>
    %90 = tpu.matmul %88, %89, %cst_53 {dimension_numbers = #tpu.dot_dimension_numbers<[1], [0], [0], [1], [0, 0, 1, 1], [], []>} : vector<16x64xbf16>, vector<64x64xbf16>, vector<16x64xf32> -> vector<16x64xf32>
    %91 = arith.addf %87, %90 : vector<16x64xf32>
    %92 = vector.extract_strided_slice %86 {offsets = [16, 0], sizes = [16, 64], strides = [1, 1]} : vector<144x64xbf16> to vector<16x64xbf16>
    %c64_54 = arith.constant 64 : index
    %c0_55 = arith.constant 0 : index
    %93 = vector.load %arg8[%c64_54, %c0_55] : memref<576x64xbf16, #tpu.memory_space<vmem>>, vector<64x64xbf16>
    %cst_56 = arith.constant dense<0.000000e+00> : vector<16x64xf32>
    %94 = tpu.matmul %92, %93, %cst_56 {dimension_numbers = #tpu.dot_dimension_numbers<[1], [0], [0], [1], [0, 0, 1, 1], [], []>} : vector<16x64xbf16>, vector<64x64xbf16>, vector<16x64xf32> -> vector<16x64xf32>
    %95 = arith.addf %91, %94 : vector<16x64xf32>
    %96 = vector.extract_strided_slice %86 {offsets = [32, 0], sizes = [16, 64], strides = [1, 1]} : vector<144x64xbf16> to vector<16x64xbf16>
    %c128_57 = arith.constant 128 : index
    %c0_58 = arith.constant 0 : index
    %97 = vector.load %arg8[%c128_57, %c0_58] : memref<576x64xbf16, #tpu.memory_space<vmem>>, vector<64x64xbf16>
    %cst_59 = arith.constant dense<0.000000e+00> : vector<16x64xf32>
    %98 = tpu.matmul %96, %97, %cst_59 {dimension_numbers = #tpu.dot_dimension_numbers<[1], [0], [0], [1], [0, 0, 1, 1], [], []>} : vector<16x64xbf16>, vector<64x64xbf16>, vector<16x64xf32> -> vector<16x64xf32>
    %99 = arith.addf %95, %98 : vector<16x64xf32>
    %100 = vector.extract_strided_slice %86 {offsets = [48, 0], sizes = [16, 64], strides = [1, 1]} : vector<144x64xbf16> to vector<16x64xbf16>
    %c192_60 = arith.constant 192 : index
    %c0_61 = arith.constant 0 : index
    %101 = vector.load %arg8[%c192_60, %c0_61] : memref<576x64xbf16, #tpu.memory_space<vmem>>, vector<64x64xbf16>
    %cst_62 = arith.constant dense<0.000000e+00> : vector<16x64xf32>
    %102 = tpu.matmul %100, %101, %cst_62 {dimension_numbers = #tpu.dot_dimension_numbers<[1], [0], [0], [1], [0, 0, 1, 1], [], []>} : vector<16x64xbf16>, vector<64x64xbf16>, vector<16x64xf32> -> vector<16x64xf32>
    %103 = arith.addf %99, %102 : vector<16x64xf32>
    %104 = vector.extract_strided_slice %86 {offsets = [64, 0], sizes = [16, 64], strides = [1, 1]} : vector<144x64xbf16> to vector<16x64xbf16>
    %c256_63 = arith.constant 256 : index
    %c0_64 = arith.constant 0 : index
    %105 = vector.load %arg8[%c256_63, %c0_64] : memref<576x64xbf16, #tpu.memory_space<vmem>>, vector<64x64xbf16>
    %cst_65 = arith.constant dense<0.000000e+00> : vector<16x64xf32>
    %106 = tpu.matmul %104, %105, %cst_65 {dimension_numbers = #tpu.dot_dimension_numbers<[1], [0], [0], [1], [0, 0, 1, 1], [], []>} : vector<16x64xbf16>, vector<64x64xbf16>, vector<16x64xf32> -> vector<16x64xf32>
    %107 = arith.addf %103, %106 : vector<16x64xf32>
    %108 = vector.extract_strided_slice %86 {offsets = [80, 0], sizes = [16, 64], strides = [1, 1]} : vector<144x64xbf16> to vector<16x64xbf16>
    %c320_66 = arith.constant 320 : index
    %c0_67 = arith.constant 0 : index
    %109 = vector.load %arg8[%c320_66, %c0_67] : memref<576x64xbf16, #tpu.memory_space<vmem>>, vector<64x64xbf16>
    %cst_68 = arith.constant dense<0.000000e+00> : vector<16x64xf32>
    %110 = tpu.matmul %108, %109, %cst_68 {dimension_numbers = #tpu.dot_dimension_numbers<[1], [0], [0], [1], [0, 0, 1, 1], [], []>} : vector<16x64xbf16>, vector<64x64xbf16>, vector<16x64xf32> -> vector<16x64xf32>
    %111 = arith.addf %107, %110 : vector<16x64xf32>
    %112 = vector.extract_strided_slice %86 {offsets = [96, 0], sizes = [16, 64], strides = [1, 1]} : vector<144x64xbf16> to vector<16x64xbf16>
    %c384_69 = arith.constant 384 : index
    %c0_70 = arith.constant 0 : index
    %113 = vector.load %arg8[%c384_69, %c0_70] : memref<576x64xbf16, #tpu.memory_space<vmem>>, vector<64x64xbf16>
    %cst_71 = arith.constant dense<0.000000e+00> : vector<16x64xf32>
    %114 = tpu.matmul %112, %113, %cst_71 {dimension_numbers = #tpu.dot_dimension_numbers<[1], [0], [0], [1], [0, 0, 1, 1], [], []>} : vector<16x64xbf16>, vector<64x64xbf16>, vector<16x64xf32> -> vector<16x64xf32>
    %115 = arith.addf %111, %114 : vector<16x64xf32>
    %116 = vector.extract_strided_slice %86 {offsets = [112, 0], sizes = [16, 64], strides = [1, 1]} : vector<144x64xbf16> to vector<16x64xbf16>
    %c448_72 = arith.constant 448 : index
    %c0_73 = arith.constant 0 : index
    %117 = vector.load %arg8[%c448_72, %c0_73] : memref<576x64xbf16, #tpu.memory_space<vmem>>, vector<64x64xbf16>
    %cst_74 = arith.constant dense<0.000000e+00> : vector<16x64xf32>
    %118 = tpu.matmul %116, %117, %cst_74 {dimension_numbers = #tpu.dot_dimension_numbers<[1], [0], [0], [1], [0, 0, 1, 1], [], []>} : vector<16x64xbf16>, vector<64x64xbf16>, vector<16x64xf32> -> vector<16x64xf32>
    %119 = arith.addf %115, %118 : vector<16x64xf32>
    %120 = vector.extract_strided_slice %86 {offsets = [128, 0], sizes = [16, 64], strides = [1, 1]} : vector<144x64xbf16> to vector<16x64xbf16>
    %c512 = arith.constant 512 : index
    %c0_75 = arith.constant 0 : index
    %121 = vector.load %arg8[%c512, %c0_75] : memref<576x64xbf16, #tpu.memory_space<vmem>>, vector<64x64xbf16>
    %cst_76 = arith.constant dense<0.000000e+00> : vector<16x64xf32>
    %122 = tpu.matmul %120, %121, %cst_76 {dimension_numbers = #tpu.dot_dimension_numbers<[1], [0], [0], [1], [0, 0, 1, 1], [], []>} : vector<16x64xbf16>, vector<64x64xbf16>, vector<16x64xf32> -> vector<16x64xf32>
    %123 = arith.addf %119, %122 : vector<16x64xf32>
    %c0_77 = arith.constant 0 : index
    %c0_78 = arith.constant 0 : index
    %124 = vector.load %arg9[%c0_77, %c0_78] : memref<1x64xf32, #tpu.memory_space<vmem>>, vector<1x64xf32>
    %125 = vector.broadcast %124 : vector<1x64xf32> to vector<16x64xf32>
    %126 = arith.addf %123, %125 : vector<16x64xf32>
    %cst_79 = arith.constant 0.000000e+00 : f32
    %127 = vector.broadcast %cst_79 : f32 to vector<16x64xf32>
    %128 = arith.maximumf %126, %127 : vector<16x64xf32>
    %129 = arith.truncf %128 : vector<16x64xf32> to vector<16x64xbf16>
    %cst_80 = arith.constant 0.000000e+00 : f32
    %130 = vector.broadcast %cst_80 : f32 to vector<1x512xf32>
    %131 = vector.extract_strided_slice %129 {offsets = [0, 0], sizes = [1, 64], strides = [1, 1]} : vector<16x64xbf16> to vector<1x64xbf16>
    %c0_81 = arith.constant 0 : index
    %c0_82 = arith.constant 0 : index
    %132 = vector.load %arg10[%c0_81, %c0_82] : memref<1024x512xbf16, #tpu.memory_space<vmem>>, vector<64x512xbf16>
    %cst_83 = arith.constant dense<0.000000e+00> : vector<1x512xf32>
    %133 = tpu.matmul %131, %132, %cst_83 {dimension_numbers = #tpu.dot_dimension_numbers<[1], [0], [0], [1], [0, 0, 1, 1], [], []>} : vector<1x64xbf16>, vector<64x512xbf16>, vector<1x512xf32> -> vector<1x512xf32>
    %134 = arith.addf %130, %133 : vector<1x512xf32>
    %135 = vector.extract_strided_slice %129 {offsets = [1, 0], sizes = [1, 64], strides = [1, 1]} : vector<16x64xbf16> to vector<1x64xbf16>
    %c64_84 = arith.constant 64 : index
    %c0_85 = arith.constant 0 : index
    %136 = vector.load %arg10[%c64_84, %c0_85] : memref<1024x512xbf16, #tpu.memory_space<vmem>>, vector<64x512xbf16>
    %cst_86 = arith.constant dense<0.000000e+00> : vector<1x512xf32>
    %137 = tpu.matmul %135, %136, %cst_86 {dimension_numbers = #tpu.dot_dimension_numbers<[1], [0], [0], [1], [0, 0, 1, 1], [], []>} : vector<1x64xbf16>, vector<64x512xbf16>, vector<1x512xf32> -> vector<1x512xf32>
    %138 = arith.addf %134, %137 : vector<1x512xf32>
    %139 = vector.extract_strided_slice %129 {offsets = [2, 0], sizes = [1, 64], strides = [1, 1]} : vector<16x64xbf16> to vector<1x64xbf16>
    %c128_87 = arith.constant 128 : index
    %c0_88 = arith.constant 0 : index
    %140 = vector.load %arg10[%c128_87, %c0_88] : memref<1024x512xbf16, #tpu.memory_space<vmem>>, vector<64x512xbf16>
    %cst_89 = arith.constant dense<0.000000e+00> : vector<1x512xf32>
    %141 = tpu.matmul %139, %140, %cst_89 {dimension_numbers = #tpu.dot_dimension_numbers<[1], [0], [0], [1], [0, 0, 1, 1], [], []>} : vector<1x64xbf16>, vector<64x512xbf16>, vector<1x512xf32> -> vector<1x512xf32>
    %142 = arith.addf %138, %141 : vector<1x512xf32>
    %143 = vector.extract_strided_slice %129 {offsets = [3, 0], sizes = [1, 64], strides = [1, 1]} : vector<16x64xbf16> to vector<1x64xbf16>
    %c192_90 = arith.constant 192 : index
    %c0_91 = arith.constant 0 : index
    %144 = vector.load %arg10[%c192_90, %c0_91] : memref<1024x512xbf16, #tpu.memory_space<vmem>>, vector<64x512xbf16>
    %cst_92 = arith.constant dense<0.000000e+00> : vector<1x512xf32>
    %145 = tpu.matmul %143, %144, %cst_92 {dimension_numbers = #tpu.dot_dimension_numbers<[1], [0], [0], [1], [0, 0, 1, 1], [], []>} : vector<1x64xbf16>, vector<64x512xbf16>, vector<1x512xf32> -> vector<1x512xf32>
    %146 = arith.addf %142, %145 : vector<1x512xf32>
    %147 = vector.extract_strided_slice %129 {offsets = [4, 0], sizes = [1, 64], strides = [1, 1]} : vector<16x64xbf16> to vector<1x64xbf16>
    %c256_93 = arith.constant 256 : index
    %c0_94 = arith.constant 0 : index
    %148 = vector.load %arg10[%c256_93, %c0_94] : memref<1024x512xbf16, #tpu.memory_space<vmem>>, vector<64x512xbf16>
    %cst_95 = arith.constant dense<0.000000e+00> : vector<1x512xf32>
    %149 = tpu.matmul %147, %148, %cst_95 {dimension_numbers = #tpu.dot_dimension_numbers<[1], [0], [0], [1], [0, 0, 1, 1], [], []>} : vector<1x64xbf16>, vector<64x512xbf16>, vector<1x512xf32> -> vector<1x512xf32>
    %150 = arith.addf %146, %149 : vector<1x512xf32>
    %151 = vector.extract_strided_slice %129 {offsets = [5, 0], sizes = [1, 64], strides = [1, 1]} : vector<16x64xbf16> to vector<1x64xbf16>
    %c320_96 = arith.constant 320 : index
    %c0_97 = arith.constant 0 : index
    %152 = vector.load %arg10[%c320_96, %c0_97] : memref<1024x512xbf16, #tpu.memory_space<vmem>>, vector<64x512xbf16>
    %cst_98 = arith.constant dense<0.000000e+00> : vector<1x512xf32>
    %153 = tpu.matmul %151, %152, %cst_98 {dimension_numbers = #tpu.dot_dimension_numbers<[1], [0], [0], [1], [0, 0, 1, 1], [], []>} : vector<1x64xbf16>, vector<64x512xbf16>, vector<1x512xf32> -> vector<1x512xf32>
    %154 = arith.addf %150, %153 : vector<1x512xf32>
    %155 = vector.extract_strided_slice %129 {offsets = [6, 0], sizes = [1, 64], strides = [1, 1]} : vector<16x64xbf16> to vector<1x64xbf16>
    %c384_99 = arith.constant 384 : index
    %c0_100 = arith.constant 0 : index
    %156 = vector.load %arg10[%c384_99, %c0_100] : memref<1024x512xbf16, #tpu.memory_space<vmem>>, vector<64x512xbf16>
    %cst_101 = arith.constant dense<0.000000e+00> : vector<1x512xf32>
    %157 = tpu.matmul %155, %156, %cst_101 {dimension_numbers = #tpu.dot_dimension_numbers<[1], [0], [0], [1], [0, 0, 1, 1], [], []>} : vector<1x64xbf16>, vector<64x512xbf16>, vector<1x512xf32> -> vector<1x512xf32>
    %158 = arith.addf %154, %157 : vector<1x512xf32>
    %159 = vector.extract_strided_slice %129 {offsets = [7, 0], sizes = [1, 64], strides = [1, 1]} : vector<16x64xbf16> to vector<1x64xbf16>
    %c448_102 = arith.constant 448 : index
    %c0_103 = arith.constant 0 : index
    %160 = vector.load %arg10[%c448_102, %c0_103] : memref<1024x512xbf16, #tpu.memory_space<vmem>>, vector<64x512xbf16>
    %cst_104 = arith.constant dense<0.000000e+00> : vector<1x512xf32>
    %161 = tpu.matmul %159, %160, %cst_104 {dimension_numbers = #tpu.dot_dimension_numbers<[1], [0], [0], [1], [0, 0, 1, 1], [], []>} : vector<1x64xbf16>, vector<64x512xbf16>, vector<1x512xf32> -> vector<1x512xf32>
    %162 = arith.addf %158, %161 : vector<1x512xf32>
    %163 = vector.extract_strided_slice %129 {offsets = [8, 0], sizes = [1, 64], strides = [1, 1]} : vector<16x64xbf16> to vector<1x64xbf16>
    %c512_105 = arith.constant 512 : index
    %c0_106 = arith.constant 0 : index
    %164 = vector.load %arg10[%c512_105, %c0_106] : memref<1024x512xbf16, #tpu.memory_space<vmem>>, vector<64x512xbf16>
    %cst_107 = arith.constant dense<0.000000e+00> : vector<1x512xf32>
    %165 = tpu.matmul %163, %164, %cst_107 {dimension_numbers = #tpu.dot_dimension_numbers<[1], [0], [0], [1], [0, 0, 1, 1], [], []>} : vector<1x64xbf16>, vector<64x512xbf16>, vector<1x512xf32> -> vector<1x512xf32>
    %166 = arith.addf %162, %165 : vector<1x512xf32>
    %167 = vector.extract_strided_slice %129 {offsets = [9, 0], sizes = [1, 64], strides = [1, 1]} : vector<16x64xbf16> to vector<1x64xbf16>
    %c576 = arith.constant 576 : index
    %c0_108 = arith.constant 0 : index
    %168 = vector.load %arg10[%c576, %c0_108] : memref<1024x512xbf16, #tpu.memory_space<vmem>>, vector<64x512xbf16>
    %cst_109 = arith.constant dense<0.000000e+00> : vector<1x512xf32>
    %169 = tpu.matmul %167, %168, %cst_109 {dimension_numbers = #tpu.dot_dimension_numbers<[1], [0], [0], [1], [0, 0, 1, 1], [], []>} : vector<1x64xbf16>, vector<64x512xbf16>, vector<1x512xf32> -> vector<1x512xf32>
    %170 = arith.addf %166, %169 : vector<1x512xf32>
    %171 = vector.extract_strided_slice %129 {offsets = [10, 0], sizes = [1, 64], strides = [1, 1]} : vector<16x64xbf16> to vector<1x64xbf16>
    %c640 = arith.constant 640 : index
    %c0_110 = arith.constant 0 : index
    %172 = vector.load %arg10[%c640, %c0_110] : memref<1024x512xbf16, #tpu.memory_space<vmem>>, vector<64x512xbf16>
    %cst_111 = arith.constant dense<0.000000e+00> : vector<1x512xf32>
    %173 = tpu.matmul %171, %172, %cst_111 {dimension_numbers = #tpu.dot_dimension_numbers<[1], [0], [0], [1], [0, 0, 1, 1], [], []>} : vector<1x64xbf16>, vector<64x512xbf16>, vector<1x512xf32> -> vector<1x512xf32>
    %174 = arith.addf %170, %173 : vector<1x512xf32>
    %175 = vector.extract_strided_slice %129 {offsets = [11, 0], sizes = [1, 64], strides = [1, 1]} : vector<16x64xbf16> to vector<1x64xbf16>
    %c704 = arith.constant 704 : index
    %c0_112 = arith.constant 0 : index
    %176 = vector.load %arg10[%c704, %c0_112] : memref<1024x512xbf16, #tpu.memory_space<vmem>>, vector<64x512xbf16>
    %cst_113 = arith.constant dense<0.000000e+00> : vector<1x512xf32>
    %177 = tpu.matmul %175, %176, %cst_113 {dimension_numbers = #tpu.dot_dimension_numbers<[1], [0], [0], [1], [0, 0, 1, 1], [], []>} : vector<1x64xbf16>, vector<64x512xbf16>, vector<1x512xf32> -> vector<1x512xf32>
    %178 = arith.addf %174, %177 : vector<1x512xf32>
    %179 = vector.extract_strided_slice %129 {offsets = [12, 0], sizes = [1, 64], strides = [1, 1]} : vector<16x64xbf16> to vector<1x64xbf16>
    %c768 = arith.constant 768 : index
    %c0_114 = arith.constant 0 : index
    %180 = vector.load %arg10[%c768, %c0_114] : memref<1024x512xbf16, #tpu.memory_space<vmem>>, vector<64x512xbf16>
    %cst_115 = arith.constant dense<0.000000e+00> : vector<1x512xf32>
    %181 = tpu.matmul %179, %180, %cst_115 {dimension_numbers = #tpu.dot_dimension_numbers<[1], [0], [0], [1], [0, 0, 1, 1], [], []>} : vector<1x64xbf16>, vector<64x512xbf16>, vector<1x512xf32> -> vector<1x512xf32>
    %182 = arith.addf %178, %181 : vector<1x512xf32>
    %183 = vector.extract_strided_slice %129 {offsets = [13, 0], sizes = [1, 64], strides = [1, 1]} : vector<16x64xbf16> to vector<1x64xbf16>
    %c832 = arith.constant 832 : index
    %c0_116 = arith.constant 0 : index
    %184 = vector.load %arg10[%c832, %c0_116] : memref<1024x512xbf16, #tpu.memory_space<vmem>>, vector<64x512xbf16>
    %cst_117 = arith.constant dense<0.000000e+00> : vector<1x512xf32>
    %185 = tpu.matmul %183, %184, %cst_117 {dimension_numbers = #tpu.dot_dimension_numbers<[1], [0], [0], [1], [0, 0, 1, 1], [], []>} : vector<1x64xbf16>, vector<64x512xbf16>, vector<1x512xf32> -> vector<1x512xf32>
    %186 = arith.addf %182, %185 : vector<1x512xf32>
    %187 = vector.extract_strided_slice %129 {offsets = [14, 0], sizes = [1, 64], strides = [1, 1]} : vector<16x64xbf16> to vector<1x64xbf16>
    %c896 = arith.constant 896 : index
    %c0_118 = arith.constant 0 : index
    %188 = vector.load %arg10[%c896, %c0_118] : memref<1024x512xbf16, #tpu.memory_space<vmem>>, vector<64x512xbf16>
    %cst_119 = arith.constant dense<0.000000e+00> : vector<1x512xf32>
    %189 = tpu.matmul %187, %188, %cst_119 {dimension_numbers = #tpu.dot_dimension_numbers<[1], [0], [0], [1], [0, 0, 1, 1], [], []>} : vector<1x64xbf16>, vector<64x512xbf16>, vector<1x512xf32> -> vector<1x512xf32>
    %190 = arith.addf %186, %189 : vector<1x512xf32>
    %191 = vector.extract_strided_slice %129 {offsets = [15, 0], sizes = [1, 64], strides = [1, 1]} : vector<16x64xbf16> to vector<1x64xbf16>
    %c960 = arith.constant 960 : index
    %c0_120 = arith.constant 0 : index
    %192 = vector.load %arg10[%c960, %c0_120] : memref<1024x512xbf16, #tpu.memory_space<vmem>>, vector<64x512xbf16>
    %cst_121 = arith.constant dense<0.000000e+00> : vector<1x512xf32>
    %193 = tpu.matmul %191, %192, %cst_121 {dimension_numbers = #tpu.dot_dimension_numbers<[1], [0], [0], [1], [0, 0, 1, 1], [], []>} : vector<1x64xbf16>, vector<64x512xbf16>, vector<1x512xf32> -> vector<1x512xf32>
    %194 = arith.addf %190, %193 : vector<1x512xf32>
    %c0_122 = arith.constant 0 : index
    %c0_123 = arith.constant 0 : index
    %195 = vector.load %arg11[%c0_122, %c0_123] : memref<1x512xf32, #tpu.memory_space<vmem>>, vector<1x512xf32>
    %196 = arith.addf %194, %195 : vector<1x512xf32>
    %cst_124 = arith.constant 0.000000e+00 : f32
    %197 = vector.broadcast %cst_124 : f32 to vector<1x512xf32>
    %198 = arith.maximumf %196, %197 : vector<1x512xf32>
    %199 = arith.truncf %198 : vector<1x512xf32> to vector<1x512xbf16>
    %c0_125 = arith.constant 0 : index
    %c0_126 = arith.constant 0 : index
    %200 = vector.load %arg12[%c0_125, %c0_126] : memref<512x3xbf16, #tpu.memory_space<vmem>>, vector<512x3xbf16>
    %cst_127 = arith.constant dense<0.000000e+00> : vector<1x3xf32>
    %201 = tpu.matmul %199, %200, %cst_127 {dimension_numbers = #tpu.dot_dimension_numbers<[1], [0], [0], [1], [0, 0, 1, 1], [], []>} : vector<1x512xbf16>, vector<512x3xbf16>, vector<1x3xf32> -> vector<1x3xf32>
    %c0_128 = arith.constant 0 : index
    %c0_129 = arith.constant 0 : index
    %202 = vector.load %arg13[%c0_128, %c0_129] : memref<1x3xf32, #tpu.memory_space<vmem>>, vector<1x3xf32>
    %203 = arith.addf %201, %202 : vector<1x3xf32>
    %c0_130 = arith.constant 0 : index
    %c0_131 = arith.constant 0 : index
    %c0_132 = arith.constant 0 : index
    %204 = vector.load %arg14[%c0_130, %c0_131, %c0_132] : memref<1x1x3xf32, #tpu.memory_space<vmem>>, vector<1x1x3xf32>
    %205 = vector.shape_cast %204 : vector<1x1x3xf32> to vector<1x3xf32>
    %206 = vector.shape_cast %203 : vector<1x3xf32> to vector<1x1x3xf32>
    tpu.vector_store %arg14[%c0_130, %c0_131, %c0_132], %206 {strides = array<i32>} : memref<1x1x3xf32, #tpu.memory_space<vmem>>, vector<1x1x3xf32>,
    return
  }
  func.func @transform_0(%arg0: i32) -> (i32, i32, i32) {
    %c0_i32 = arith.constant 0 : i32
    %c0_i32_0 = arith.constant 0 : i32
    %c0_i32_1 = arith.constant 0 : i32
    return %arg0, %c0_i32, %c0_i32_0 : i32, i32, i32
  }
  func.func @transform_1(%arg0: i32) -> (i32, i32) {
    %c0_i32 = arith.constant 0 : i32
    %c0_i32_0 = arith.constant 0 : i32
    %c0_i32_1 = arith.constant 0 : i32
    return %c0_i32, %c0_i32_0 : i32, i32
  }
  func.func @transform_2(%arg0: i32) -> (i32, i32) {
    %c0_i32 = arith.constant 0 : i32
    %c0_i32_0 = arith.constant 0 : i32
    %c0_i32_1 = arith.constant 0 : i32
    return %c0_i32, %c0_i32_0 : i32, i32
  }
  func.func @transform_3(%arg0: i32) -> (i32, i32) {
    %c0_i32 = arith.constant 0 : i32
    %c0_i32_0 = arith.constant 0 : i32
    %c0_i32_1 = arith.constant 0 : i32
    return %c0_i32, %c0_i32_0 : i32, i32
  }
  func.func @transform_4(%arg0: i32) -> (i32, i32) {
    %c0_i32 = arith.constant 0 : i32
    %c0_i32_0 = arith.constant 0 : i32
    %c0_i32_1 = arith.constant 0 : i32
    return %c0_i32, %c0_i32_0 : i32, i32
  }
  func.func @transform_5(%arg0: i32) -> (i32, i32) {
    %c0_i32 = arith.constant 0 : i32
    %c0_i32_0 = arith.constant 0 : i32
    %c0_i32_1 = arith.constant 0 : i32
    return %c0_i32, %c0_i32_0 : i32, i32
  }
  func.func @transform_6(%arg0: i32) -> (i32, i32) {
    %c0_i32 = arith.constant 0 : i32
    %c0_i32_0 = arith.constant 0 : i32
    %c0_i32_1 = arith.constant 0 : i32
    return %c0_i32, %c0_i32_0 : i32, i32
  }
  func.func @transform_7(%arg0: i32) -> (i32, i32) {
    %c0_i32 = arith.constant 0 : i32
    %c0_i32_0 = arith.constant 0 : i32
    %c0_i32_1 = arith.constant 0 : i32
    return %c0_i32, %c0_i32_0 : i32, i32
  }
  func.func @transform_8(%arg0: i32) -> (i32, i32) {
    %c0_i32 = arith.constant 0 : i32
    %c0_i32_0 = arith.constant 0 : i32
    %c0_i32_1 = arith.constant 0 : i32
    return %c0_i32, %c0_i32_0 : i32, i32
  }
  func.func @transform_9(%arg0: i32) -> (i32, i32) {
    %c0_i32 = arith.constant 0 : i32
    %c0_i32_0 = arith.constant 0 : i32
    %c0_i32_1 = arith.constant 0 : i32
    return %c0_i32, %c0_i32_0 : i32, i32
  }
  func.func @transform_10(%arg0: i32) -> (i32, i32) {
    %c0_i32 = arith.constant 0 : i32
    %c0_i32_0 = arith.constant 0 : i32
    %c0_i32_1 = arith.constant 0 : i32
    return %c0_i32, %c0_i32_0 : i32, i32
  }
  func.func @transform_11(%arg0: i32) -> (i32, i32) {
    %c0_i32 = arith.constant 0 : i32
    %c0_i32_0 = arith.constant 0 : i32
    %c0_i32_1 = arith.constant 0 : i32
    return %c0_i32, %c0_i32_0 : i32, i32
  }
  func.func @transform_12(%arg0: i32) -> (i32, i32) {
    %c0_i32 = arith.constant 0 : i32
    %c0_i32_0 = arith.constant 0 : i32
    %c0_i32_1 = arith.constant 0 : i32
    return %c0_i32, %c0_i32_0 : i32, i32
  }
  func.func @transform_13(%arg0: i32) -> (i32, i32, i32) {
    %c0_i32 = arith.constant 0 : i32
    %c0_i32_0 = arith.constant 0 : i32
    %c0_i32_1 = arith.constant 0 : i32
    return %arg0, %c0_i32, %c0_i32_0 : i32, i32, i32
  }
}

</mosaic_0001>

<bundles_post_ra>
// kernel: qnet_forward.1
= control target key start
LH: loop header
LB: loop body
LE: loop exit
PB: predicated region body
PF: predicated region fallthrough
CT: control target
= control target key end

     0   :  { %18 = vsyncpa [#allocation3], 0  ;;  %s12074_s0 = inlined_call_operand.vmem [shape: bf16[2,196,256], index: 0, kind: input, shape index: {}]   ;;  %s12075_s1 = inlined_call_operand.vmem [shape: bf16[256,32], index: 1, kind: input, shape index: {}]   ;;  %s12076_s2 = inlined_call_operand.vmem [shape: f32[1,32], index: 2, kind: input, shape index: {}]   ;;  %s12077_s3 = inlined_call_operand.vmem [shape: bf16[768,196], index: 3, kind: input, shape index: {}]   ;;  %s12078_s4 = inlined_call_operand.vmem [shape: bf16[512,64], index: 4, kind: input, shape index: {}]   ;;  %s12079_s5 = inlined_call_operand.vmem [shape: f32[1,64], index: 5, kind: input, shape index: {}]   ;;  %s12080_s6 = inlined_call_operand.vmem [shape: bf16[144,48], index: 6, kind: input, shape index: {}]   ;;  %s12081_s7 = inlined_call_operand.vmem [shape: bf16[576,64], index: 7, kind: input, shape index: {}]   ;;  %s12082_s8 = inlined_call_operand.vmem [shape: f32[1,64], index: 8, kind: input, shape index: {}]   ;;  %s12083_s9 = inlined_call_operand.vmem [shape: bf16[1024,512], index: 9, kind: input, shape index: {}]   ;;  %s12084_s10 = inlined_call_operand.vmem [shape: f32[1,512], index: 10, kind: input, shape index: {}]   ;;  %s12085_s11 = inlined_call_operand.vmem [shape: bf16[512,3], index: 11, kind: input, shape index: {}]   ;;  %s12086_s12 = inlined_call_operand.vmem [shape: f32[1,3], index: 12, kind: input, shape index: {}]   ;;  %s12087_s13 = inlined_call_operand.hbm [shape: f32[2,1,3], index: 13, kind: output, shape index: {}]  }
   0x1   :  { %20 = vsyncpa [#allocation3 + $0x1], 0  ;;  %s10002_s25 = smov 0   ;;  %s10004_s26 = smov 0  }
   0x2   :  { %s10006_s27 = smov 0   ;;  %s10008_s28 = smov 0  }
   0x3 LB: > { %12092 = sst [smem:[#allocation5_spill]] %s9922_s27  ;;  %s10023_s29 = sadd.s32 4294967295, %s9926_s28   ;;  %s9926_s28 = sphi %s10008_s28, %s12099_s28   ;;  %s9922_s27 = sphi %s10006_s27, %s12101_s27   ;;  %s9918_s26 = sphi %s10004_s26, %s12103_s26   ;;  %s9914_s25 = sphi %s10002_s25, %s12102_s25  }
   0x4   : > { %s7787_s30 = sadd.s32 4294967294, %s9926_s28   ;;  %s10027_s14 = sadd.s32 1, %s9926_s28  }
   0x5   : > { %12093 = sst [smem:[#allocation6_spill]] %s10027_s14  ;;  %s311_s15 = sadd.s32 1, %s9922_s27 }
   0x6   : > { %s308_s16 = ssub.s32 %s9926_s28, %s10027_s14  ;;  %p321_p0 = scmp.ne.s32.totalorder %s9922_s27, %s9918_s26 }
   0x7   : > { %p309_p1 = scmp.eq.s32.totalorder %s308_s16, 0  ;;  %p322_p2 = scmp.eq.s32.totalorder %s10023_s29, 1 }
   0x8   : > { %p327_p3 = scmp.ne.s32.totalorder %s9918_s26, %s9914_s25  ;;  %p328_p4 = scmp.eq.s32.totalorder %s7787_s30, 1 }
   0x9   : > { %s10038_s17 = scalar_select %p309_p1, %s9922_s27, %s311_s15  }
   0xa   : > { %p10040_p5 = por %p322_p2, %p321_p0  ;;  %p10044_p6 = por %p328_p4, %p327_p3 }
   0xb   : > { %12094 = sst [smem:[#allocation7_spill]] %s10038_s17  ;;  %p7790_p7 = scmp.ge.s32.totalorder %s9926_s28, 1 }
   0xc   : > { %s12096_s19 = scalar_select %p10044_p6, 1, 0 }
   0xd   : > { %p390_p8 = scmp.lt.s32.totalorder %s9926_s28, 3 }
   0xe   : > { %12097 = sst [smem:[#allocation8_spill]] %s12096_s19 }
   0xf   : > { %p391_p9 = pnand %p7790_p7, %p390_p8 }
  0x10   : > { %p433_p10 = scmp.lt.s32.totalorder (!%p391_p9), %s10023_s29, 1  ;;  %s431_s19 = sand.u32 (!%p391_p9), 1, %s9918_s26  }
  0x11   : > { %394 = sbr.rel (%p391_p9) target bundleno = 2319 (0x90f), region = 72  ;;  %s8444_s23 = sshll.u32 (!%p391_p9), %s10023_s29, 4 }
  0x12   : > { %s432_s24 = scalar_lea.vmem (!%p391_p9), [#allocation2], %s431_s19  ;;  %s7730_s16 = scalar_lea.hbm (!%p391_p9), %s12087_s13, %s8444_s23 }
  0x16   : > { %v9175_v0 = vld [vmem:[%s12075_s1 + $0x78] sm:$0xff]   ;;  %v9177_v2 = vld [vmem:[%s12075_s1 + $0x70] sm:$0xff]   ;;  %v9179_v4 = vld [vmem:[%s12075_s1 + $0x68] sm:$0xff]   ;;  %s434_s17 = scalar_select %p433_p10, %s10023_s29, 1  ;;  %v9928_v43 = vmov 0   ;;  %vm1428_vm0 = vcmask 556032  }
  0x17   : > { %v9176_v1 = vld [vmem:[%s12075_s1 + $0x38] sm:$0xff]   ;;  %8447 = vmatprep.subr.bf16.mxu0 %v9175_v0  ;;  %v9178_v3 = vld [vmem:[%s12075_s1 + $0x30] sm:$0xff]   ;;  %v9180_v5 = vld [vmem:[%s12075_s1 + $0x28] sm:$0xff]   ;;  %1577 = vmatprep.subr.bf16.mxu1 %v9928_v43  ;;  %vm1573_vm1 = vcmask 1041408   ;;  %vm9930_vm2 = vmmov 0   ;;  %vm2062_vm3 = vcmask 261120  }
  0x18   : > { %8448 = vmatpush3.bf16.msra.mxu0 %v9176_v1  ;;  %v9181_v6 = vld [vmem:[%s12075_s1 + $0x60] sm:$0xff]   ;;  %s9132_s27 = smul.u32 200, %s434_s17  ;;  %v9183_v8 = vld [vmem:[%s12075_s1 + $0x58] sm:$0xff]   ;;  %v9185_v10 = vld [vmem:[%s12075_s1 + $0x50] sm:$0xff]   ;;  %vm3524_vm4 = vcmask 392192   ;;  %vm3706_vm5 = vcmask 523264  }
  0x19   : > { %8449 = vmatprep.subr.bf16.mxu0 %v9177_v2  ;;  %v9182_v7 = vld [vmem:[%s12075_s1 + $0x20] sm:$0xff]   ;;  %v9184_v9 = vld [vmem:[%s12075_s1 + $0x18] sm:$0xff]   ;;  %v9186_v12 = vld [vmem:[%s12075_s1 + $0x10] sm:$0xff]   ;;  %s7732_s17 = sshll.u32 %s432_s24, 4  ;;  %vm7717_vm6 = vcmask 16384   ;;  %s9931_s29 = smov [#allocation2]   ;;  %s7733_s17 = int_to_ptr.vmem [resolvable:$true] %s7732_s17 }
  0x1a   : > { %s10082_s22 = scalar_lea.vmem %s12074_s0, %s9132_s27  ;;  %v9187_v13 = vld [vmem:[%s12075_s1 + $0x48] sm:$0xff]   ;;  %v9189_v15 = vld [vmem:[%s12075_s1 + $0x40] sm:$0xff]   ;;  %s9866_s27 = scalar_lea.vmem %s7733_s17, 16 }
  0x1b   : > { %v9193_v11 = vld [vmem:[%s10082_s22 + $0x4] ss:$8 sps:$4 sm:$0xff]   ;;  %v9191_v17 = vld [vmem:[%s10082_s22] ss:$8 sps:$4 sm:$0xff]   ;;  %v9194_v18 = vld [vmem:[%s10082_s22 + $0x14] ss:$8 sps:$4 sm:$0xff]   ;;  %p9867_p11 = scmp.ne.s32.totalorder %s7733_s17, %s9866_s27 }
  0x1c   : > { %8450 = vmatpush3.bf16.msra.mxu0 %v9178_v3  ;;  %758 = vmatprep.mubr.bf16.mxu0 %v9193_v11  ;;  %v9188_v14 = vld [vmem:[%s12075_s1 + $0x8] sm:$0xff]   ;;  %v9190_v16 = vld [vmem:[%s12075_s1] sm:$0xff]   ;;  %v9196_v19 = vld [vmem:[%s10082_s22 + $0x10] ss:$8 sps:$4 sm:$0xff]   ;;  %s9870_s14 = sshll.u32 %s9931_s29, 4  ;;  %s9871_s14 = int_to_ptr.vmem [resolvable:$false] %s9870_s14 }
  0x1d   : > { %8451 = vmatprep.subr.bf16.mxu0 %v9179_v4  ;;  %v9197_v20 = vld [vmem:[%s10082_s22 + $0x24] ss:$8 sps:$4 sm:$0xff]   ;;  %v9199_v21 = vld [vmem:[%s10082_s22 + $0x20] ss:$8 sps:$4 sm:$0xff]   ;;  %v9200_v22 = vld [vmem:[%s10082_s22 + $0x34] ss:$8 sps:$4 sm:$0xff]   ;;  %p9868_p12 = pnand %p9867_p11, %p10040_p5  ;;  %p9873_p0 = scmp.lt.s32.totalorder %s7733_s17, %s9871_s14 }
  0x1e   : > { %v9202_v23 = vld [vmem:[%s10082_s22 + $0x30] ss:$8 sps:$4 sm:$0xff]   ;;  %v9203_v24 = vld [vmem:[%s10082_s22 + $0x44] ss:$8 sps:$4 sm:$0xff]   ;;  %v9205_v25 = vld [vmem:[%s10082_s22 + $0x40] ss:$8 sps:$4 sm:$0xff]  }
  0x1f   : > { %v9206_v26 = vld [vmem:[%s10082_s22 + $0x54] ss:$8 sps:$4 sm:$0xff]   ;;  %v9208_v27 = vld [vmem:[%s10082_s22 + $0x50] ss:$8 sps:$4 sm:$0xff]   ;;  %v9209_v28 = vld [vmem:[%s10082_s22 + $0x64] ss:$8 sps:$4 sm:$0xff]   ;;  %p9869_p13 = pneg %p9868_p12 }
  0x20   : > { %8452 = vmatpush3.bf16.msra.mxu0 %v9180_v5  ;;  %v9211_v29 = vld [vmem:[%s10082_s22 + $0x60] ss:$8 sps:$4 sm:$0xff]   ;;  %v9212_v30 = vld [vmem:[%s10082_s22 + $0x74] ss:$8 sps:$4 sm:$0xff]   ;;  %v9214_v31 = vld [vmem:[%s10082_s22 + $0x70] ss:$8 sps:$4 sm:$0xff]  }
  0x21   : > { %8453 = vmatprep.subr.bf16.mxu0 %v9181_v6  ;;  %v9215_v32 = vld [vmem:[%s10082_s22 + $0x84] ss:$8 sps:$4 sm:$0xff]   ;;  %v9217_v33 = vld [vmem:[%s10082_s22 + $0x80] ss:$8 sps:$4 sm:$0xff]   ;;  %v9218_v34 = vld [vmem:[%s10082_s22 + $0x94] ss:$8 sps:$4 sm:$0xff]  }
  0x22   : > { %v9220_v35 = vld [vmem:[%s10082_s22 + $0x90] ss:$8 sps:$4 sm:$0xff]   ;;  %v9221_v36 = vld [vmem:[%s10082_s22 + $0xa4] ss:$8 sps:$4 sm:$0xff]   ;;  %v9223_v37 = vld [vmem:[%s10082_s22 + $0xa0] ss:$8 sps:$4 sm:$0xff]  }
  0x23   : > { %v9224_v38 = vld [vmem:[%s10082_s22 + $0xb4] ss:$8 sps:$4 sm:$0xff]   ;;  %v463_v39 = vld [vmem:[%s10082_s22 + $0xc0] sm:$0x33]  ;;  %v9226_v40 = vld [vmem:[%s10082_s22 + $0xb0] ss:$8 sps:$4 sm:$0xff]  }
  0x24   : > { %8454 = vmatpush3.bf16.msra.mxu0 %v9182_v7  ;;  %v7818_v41 = vcombine.high %v463_v39, %v463_v39  ;;  %v7817_v42 = vcombine.low %v463_v39, %v463_v39  ;;  %v9231_v44 = vld [vmem:[%s12077_s3 + $0x4] ss:$8 sps:$4 sm:$0xff]   ;;  %v10138_v48 = vld [vmem:[%s12076_s2] ss:$0 sm:$0xff]  ;;  %s7720_s22 = scalar_lea.sflag [#allocation3], %s431_s19  ;;  %s9872_s20 = scalar_lea.vmem %s9871_s14, 32 }
  0x25   : > { %8455 = vmatprep.subr.bf16.mxu0 %v9183_v8  ;;  %7931 = vmatprep.mubr.msk.bf16.mxu1 %vm1428_vm0, %v9231_v44  ;;  %p9874_p1 = scmp.lt.s32.totalorder %s9872_s20, %s9866_s27 }
  0x27   : > { %p9875_p2 = por %p9874_p1, %p9873_p0 }
  0x28   : > { %8456 = vmatpush3.bf16.msra.mxu0 %v9184_v9 }
  0x29   : > { %8457 = vmatprep.subr.bf16.mxu0 %v9185_v10  ;;  %p9876_p3 = pnand %p9875_p2, %p9869_p13 }
  0x2c   : > { %8458 = vmatpush3.bf16.msra.mxu0 %v9186_v12 }
  0x2d   : > { %8459 = vmatprep.subr.bf16.mxu0 %v9187_v13 }
  0x30   : > { %8460 = vmatpush3.bf16.msra.mxu0 %v9188_v14 }
  0x31   : > { %8461 = vmatprep.subr.bf16.mxu0 %v9189_v15 }
  0x34   : > { %8462 = vmatpush3.bf16.msra.mxu0 %v9190_v16 }
  0x37   : > { %759 = vmatmul.mubr.bf16.vlgmr.msra.gmra.mxu0 %v9191_v17 }
  0x38   : > { %766 = vmatprep.mubr.bf16.mxu0 %v9194_v18 }
  0x3f   : > { %767 = vmatmul.mubr.bf16.gmra.mxu0 %v9196_v19 }
  0x40   : > { %774 = vmatprep.mubr.bf16.mxu0 %v9197_v20 }
  0x47   : > { %775 = vmatmul.mubr.bf16.gmra.mxu0 %v9199_v21 }
  0x48   : > { %782 = vmatprep.mubr.bf16.mxu0 %v9200_v22 }
  0x4f   : > { %783 = vmatmul.mubr.bf16.gmra.mxu0 %v9202_v23 }
  0x50   : > { %790 = vmatprep.mubr.bf16.mxu0 %v9203_v24 }
  0x57   : > { %791 = vmatmul.mubr.bf16.gmra.mxu0 %v9205_v25 }
  0x58   : > { %798 = vmatprep.mubr.bf16.mxu0 %v9206_v26 }
  0x5f   : > { %799 = vmatmul.mubr.bf16.gmra.mxu0 %v9208_v27 }
  0x60   : > { %806 = vmatprep.mubr.bf16.mxu0 %v9209_v28 }
  0x67   : > { %807 = vmatmul.mubr.bf16.gmra.mxu0 %v9211_v29 }
  0x68   : > { %814 = vmatprep.mubr.bf16.mxu0 %v9212_v30 }
  0x6f   : > { %815 = vmatmul.mubr.bf16.gmra.mxu0 %v9214_v31 }
  0x70   : > { %822 = vmatprep.mubr.bf16.mxu0 %v9215_v32 }
  0x77   : > { %823 = vmatmul.mubr.bf16.gmra.mxu0 %v9217_v33 }
  0x78   : > { %830 = vmatprep.mubr.bf16.mxu0 %v9218_v34 }
  0x7f   : > { %831 = vmatmul.mubr.bf16.gmra.mxu0 %v9220_v35 }
  0x80   : > { %838 = vmatprep.mubr.bf16.mxu0 %v9221_v36 }
  0x87   : > { %839 = vmatmul.mubr.bf16.gmra.mxu0 %v9223_v37 }
  0x88   : > { %846 = vmatprep.mubr.bf16.mxu0 %v9224_v38 }
  0x8f   : > { %847 = vmatmul.mubr.bf16.gmra.mxu0 %v9226_v40 }
  0x90   : > { %854 = vmatprep.mubr.bf16.mxu0 %v7818_v41 }
  0x97   : > { %855 = vmatmul.mubr.bf16.gmra.mxu0 %v7817_v42 }
  0xf7   : > { %v8463_v45 = vpop.f32.mrf.mxu0 }
  0xf9   : > { %v8464_v46 = vpop.f32.mrf.mxu0 }
  0xfa   : > { %v8465_v47 = vadd.f32 %v8464_v46, %v8463_v45 }
  0xfb   : > { %v8466_v49 = vpop.f32.mrf.mxu0 }
  0xfc   : > { %v761_v51 = vadd.f32 %v8465_v47, %v10138_v48 }
  0xfd   : > { %v8467_v50 = vpop.f32.mrf.mxu0 }
  0xfe   : > { %v8468_v52 = vadd.f32 %v8467_v50, %v8466_v49  ;;  %v862_v56 = vmax.f32 %v761_v51, 0.0 }
  0xff   : > { %v8469_v53 = vpop.f32.mrf.mxu0 }
 0x100   : > { %v764_v54 = vadd.f32 %v8468_v52, %v10138_v48 }
 0x101   : > { %v8470_v55 = vpop.f32.mrf.mxu0 }
 0x102   : > { %v863_v57 = vmax.f32 %v764_v54, 0.0  ;;  %v8471_v58 = vadd.f32 %v8470_v55, %v8469_v53 }
 0x103   : > { %v8472_v59 = vpop.f32.mrf.mxu0 }
 0x104   : > { %v10142_v60 = vpack.c.bf16 %v863_v57, %v862_v56  ;;  %v769_v62 = vadd.f32 %v8471_v58, %v10138_v48 }
 0x105   : > { %v8473_v61 = vpop.f32.mrf.mxu0 }
 0x106   : > { %v8474_v63 = vadd.f32 %v8473_v61, %v8472_v59  ;;  %v864_v3 = vmax.f32 %v769_v62, 0.0 }
 0x107   : > { %v8475_v0 = vpop.f32.mrf.mxu0 }
 0x108   : > { %v772_v1 = vadd.f32 %v8474_v63, %v10138_v48 }
 0x109   : > { %v8476_v2 = vpop.f32.mrf.mxu0 }
 0x10a   : > { %v865_v4 = vmax.f32 %v772_v1, 0.0  ;;  %v10146_v5 = vadd.f32 %v8476_v2, %v8475_v0 }
 0x10b   : > { %v8478_v6 = vpop.f32.mrf.mxu0 }
 0x10c   : > { %v10148_v7 = vpack.c.bf16 %v865_v4, %v864_v3 }
 0x10d   : > { %v8479_v8 = vpop.f32.mrf.mxu0 }
 0x10e   : > { %v8480_v1 = vadd.f32 %v8479_v8, %v8478_v6  ;;  %v777_v6 = vadd.f32 %v10146_v5, %v10138_v48 }
 0x10f   : > { %v8481_v9 = vpop.f32.mrf.mxu0 }
 0x111   : > { %v8482_v10 = vpop.f32.mrf.mxu0 }
 0x112   : > { %v8483_v61 = vadd.f32 %v8482_v10, %v8481_v9  ;;  %v780_v9 = vadd.f32 %v8480_v1, %v10138_v48  ;;  %v9234_v1 = vld [vmem:[%s12077_s3 + $0x10] ss:$8 sps:$4 sm:$0xff]  }
 0x113   : > { %v8484_v11 = vpop.f32.mrf.mxu0 }
 0x115   : > { %v8485_v12 = vpop.f32.mrf.mxu0 }
 0x116   : > { %v8486_v55 = vadd.f32 %v8485_v12, %v8484_v11  ;;  %v785_v11 = vadd.f32 %v8483_v61, %v10138_v48 }
 0x117   : > { %v8487_v13 = vpop.f32.mrf.mxu0 }
 0x118   : > { %v788_v2 = vadd.f32 %v8486_v55, %v10138_v48  ;;  %v868_v8 = vmax.f32 %v785_v11, 0.0  ;;  %v9929_v11 = vmov 0.0  }
 0x119   : > { %v8488_v14 = vpop.f32.mrf.mxu0  ;;  %8722 = vmatprep.subr.bf16.mxu0 %v9929_v11  ;;  %8726 = vmatprep.mubr.msk.bf16.mxu0 %vm9930_vm2, %v9929_v11 }
 0x11a   : > { %v8489_v51 = vadd.f32 %v8488_v14, %v8487_v13  ;;  %v869_v10 = vmax.f32 %v788_v2, 0.0  ;;  %v9235_v2 = vld [vmem:[%s12077_s3 + $0x24] ss:$8 sps:$4 sm:$0xff]  }
 0x11b   : > { %v8490_v15 = vpop.f32.mrf.mxu0 }
 0x11c   : > { %v793_v62 = vadd.f32 %v8489_v51, %v10138_v48 }
 0x11d   : > { %v8491_v16 = vpop.f32.mrf.mxu0 }
 0x11e   : > { %v8492_v45 = vadd.f32 %v8491_v16, %v8490_v15  ;;  %v870_v12 = vmax.f32 %v793_v62, 0.0 }
 0x11f   : > { %v8493_v17 = vpop.f32.mrf.mxu0 }
 0x120   : > { %v796_v56 = vadd.f32 %v8492_v45, %v10138_v48 }
 0x121   : > { %v8494_v18 = vpop.f32.mrf.mxu0 }
 0x122   : > { %v8495_v39 = vadd.f32 %v8494_v18, %v8493_v17  ;;  %v871_v3 = vmax.f32 %v796_v56, 0.0  ;;  %v867_v18 = vmax.f32 %v780_v9, 0.0  ;;  %v9290_v9 = vld [vmem:[%s12078_s4 + $0x18] sm:$0xff]  }
 0x123   : > { %v8496_v19 = vpop.f32.mrf.mxu0  ;;  %8723 = vmatpush3.bf16.msra.mxu0 %v9290_v9 }
 0x124   : > { %v801_v52 = vadd.f32 %v8495_v39, %v10138_v48  ;;  %v891_v15 = vpack.c.bf16 %v871_v3, %v870_v12  ;;  %v9237_v3 = vld [vmem:[%s12077_s3 + $0x20] ss:$8 sps:$4 sm:$0xff]   ;;  %v9240_v12 = vld [vmem:[%s12077_s3 + $0x30] ss:$8 sps:$4 sm:$0xff]   ;;  %8724 = vmatprep.subr.bf16.mxu0 %v9929_v11 }
 0x125   : > { %v8497_v20 = vpop.f32.mrf.mxu0 }
 0x126   : > { %v8498_v35 = vadd.f32 %v8497_v20, %v8496_v19  ;;  %v872_v63 = vmax.f32 %v801_v52, 0.0  ;;  %v890_v19 = vpack.c.bf16 %v869_v10, %v868_v8  ;;  %v9243_v10 = vld [vmem:[%s12077_s3 + $0x40] ss:$8 sps:$4 sm:$0xff]  }
 0x127   : > { %v8499_v21 = vpop.f32.mrf.mxu0  ;;  %v9249_v8 = vld [vmem:[%s12077_s3 + $0x60] ss:$8 sps:$4 sm:$0xff]  }
 0x128   : > { %v804_v46 = vadd.f32 %v8498_v35, %v10138_v48 }
 0x129   : > { %v8500_v22 = vpop.f32.mrf.mxu0 }
 0x12a   : > { %v8501_v31 = vadd.f32 %v8500_v22, %v8499_v21  ;;  %v873_v57 = vmax.f32 %v804_v46, 0.0  ;;  %v866_v21 = vmax.f32 %v777_v6, 0.0  ;;  %v9247_v6 = vld [vmem:[%s12077_s3 + $0x64] ss:$8 sps:$4 sm:$0xff]  }
 0x12b   : > { %v8502_v23 = vpop.f32.mrf.mxu0 }
 0x12c   : > { %v809_v40 = vadd.f32 %v8501_v31, %v10138_v48  ;;  %v892_v4 = vpack.c.bf16 %v873_v57, %v872_v63 }
 0x12d   : > { %v8503_v24 = vpop.f32.mrf.mxu0 }
 0x12e   : > { %v8504_v29 = vadd.f32 %v8503_v24, %v8502_v23  ;;  %v874_v53 = vmax.f32 %v809_v40, 0.0  ;;  %v889_v23 = vpack.c.bf16 %v867_v18, %v866_v21  ;;  %v9252_v18 = vld [vmem:[%s12077_s3 + $0x70] ss:$8 sps:$4 sm:$0xff]   ;;  %v9256_v21 = vld [vmem:[%s12077_s3 + $0x94] ss:$8 sps:$4 sm:$0xff]  }
 0x12f   : > { %v8505_v25 = vpop.f32.mrf.mxu0 }
 0x130   : > { %v812_v36 = vadd.f32 %v8504_v29, %v10138_v48 }
 0x131   : > { %v8506_v26 = vpop.f32.mrf.mxu0 }
 0x132   : > { %v8507_v27 = vadd.f32 %v8506_v26, %v8505_v25  ;;  %v875_v47 = vmax.f32 %v812_v36, 0.0 }
 0x133   : > { %v8508_v28 = vpop.f32.mrf.mxu0 }
 0x134   : > { %v817_v32 = vadd.f32 %v8507_v27, %v10138_v48  ;;  %v893_v58 = vpack.c.bf16 %v875_v47, %v874_v53 }
 0x135   : > { %v8509_v30 = vpop.f32.mrf.mxu0 }
 0x136   : > { %v8510_v33 = vadd.f32 %v8509_v30, %v8508_v28  ;;  %v876_v41 = vmax.f32 %v817_v32, 0.0 }
 0x137   : > { %v10151_v34 = vpop.f32.mrf.mxu0 }
 0x138   : > { %v820_v37 = vadd.f32 %v8510_v33, %v10138_v48 }
 0x139   : > { %v10155_v38 = vpop.f32.mrf.mxu0 }
 0x13a   : > { %v877_v42 = vmax.f32 %v820_v37, 0.0  ;;  %v8513_v56 = vadd.f32 %v10155_v38, %v10151_v34  ;;  %v9229_v38 = vld [vmem:[%s12077_s3] ss:$8 sps:$4 sm:$0xff]  }
 0x13b   : > { %v10158_v44 = vpop.f32.mrf.mxu0 }
 0x13c   : > { %v894_v49 = vpack.c.bf16 %v877_v42, %v876_v41  ;;  %v825_v62 = vadd.f32 %v8513_v56, %v10138_v48  ;;  %v9303_v56 = vld [vmem:[%s12077_s3 + $0x184] ss:$8 sps:$4 sm:$0xff]  }
 0x13d   : > { %v10161_v50 = vpop.f32.mrf.mxu0 }
 0x13e   : > { %1578 = vmatpush1.bf16.msra.mxu1 %v894_v49  ;;  %v8516_v51 = vadd.f32 %v10161_v50, %v10158_v44 }
 0x13f   : > { %v10164_v54 = vpop.f32.mrf.mxu0  ;;  %1579 = vmatprep.subr.bf16.mxu1 %v9928_v43 }
 0x141   : > { %v8518_v59 = vpop.f32.mrf.mxu0 }
 0x142   : > { %1580 = vmatpush1.bf16.msra.mxu1 %v893_v58  ;;  %v8519_v46 = vadd.f32 %v8518_v59, %v10164_v54  ;;  %v828_v54 = vadd.f32 %v8516_v51, %v10138_v48  ;;  %v9297_v51 = vld [vmem:[%s12077_s3 + $0x164] ss:$8 sps:$4 sm:$0xff]  }
 0x143   : > { %v8520_v0 = vpop.f32.mrf.mxu0  ;;  %1581 = vmatprep.subr.bf16.mxu1 %v9928_v43 }
 0x144   : > { %v833_v57 = vadd.f32 %v8519_v46, %v10138_v48  ;;  %v879_v50 = vmax.f32 %v828_v54, 0.0  ;;  %v9293_v46 = vld [vmem:[%s12077_s3 + $0x140] ss:$8 sps:$4 sm:$0xff]  }
 0x145   : > { %v8521_v13 = vpop.f32.mrf.mxu0 }
 0x146   : > { %1582 = vmatpush1.bf16.msra.mxu1 %v892_v4  ;;  %v8522_v41 = vadd.f32 %v8521_v13, %v8520_v0  ;;  %v880_v44 = vmax.f32 %v833_v57, 0.0  ;;  %v878_v0 = vmax.f32 %v825_v62, 0.0  ;;  %v9238_v4 = vld [vmem:[%s12077_s3 + $0x34] ss:$8 sps:$4 sm:$0xff]   ;;  %v9305_v57 = vld [vmem:[%s12077_s3 + $0x180] ss:$8 sps:$4 sm:$0xff]  }
 0x147   : > { %v8523_v14 = vpop.f32.mrf.mxu0  ;;  %1583 = vmatprep.subr.bf16.mxu1 %v9928_v43  ;;  %v9286_v13 = vld [vmem:[%s12078_s4 + $0xd8] sm:$0xff]  }
 0x148   : > { %v836_v52 = vadd.f32 %v8522_v41, %v10138_v48  ;;  %v895_v34 = vpack.c.bf16 %v879_v50, %v878_v0  ;;  %v9285_v41 = vld [vmem:[%s12077_s3 + $0x120] ss:$8 sps:$4 sm:$0xff]   ;;  %v9308_v62 = vld [vmem:[%s12077_s3 + $0x190] ss:$8 sps:$4 sm:$0xff]  }
 0x149   : > { %v8524_v16 = vpop.f32.mrf.mxu0 }
 0x14a   : > { %1584 = vmatpush1.bf16.msra.mxu1 %v891_v15  ;;  %v881_v59 = vmax.f32 %v836_v52, 0.0  ;;  %v9244_v15 = vld [vmem:[%s12077_s3 + $0x54] ss:$8 sps:$4 sm:$0xff]   ;;  %v9299_v52 = vld [vmem:[%s12077_s3 + $0x160] ss:$8 sps:$4 sm:$0xff]  }
 0x14b   : > { %v8526_v17 = vpop.f32.mrf.mxu0  ;;  %1585 = vmatprep.subr.bf16.mxu1 %v9928_v43 }
 0x14c   : > { %v896_v63 = vpack.c.bf16 %v881_v59, %v880_v44  ;;  %v9309_v44 = vld [vmem:[%s12077_s3 + $0x1a4] ss:$8 sps:$4 sm:$0xff]  }
 0x14d   : > { %v8527_v20 = vpop.f32.mrf.mxu0 }
 0x14e   : > { %1586 = vmatpush1.bf16.msra.mxu1 %v890_v19  ;;  %v8528_v33 = vadd.f32 %v8527_v20, %v8526_v17  ;;  %v9250_v17 = vld [vmem:[%s12077_s3 + $0x74] ss:$8 sps:$4 sm:$0xff]   ;;  %v9253_v19 = vld [vmem:[%s12077_s3 + $0x84] ss:$8 sps:$4 sm:$0xff]   ;;  %v9255_v20 = vld [vmem:[%s12077_s3 + $0x80] ss:$8 sps:$4 sm:$0xff]  }
 0x14f   : > { %v8529_v22 = vpop.f32.mrf.mxu0  ;;  %1587 = vmatprep.subr.bf16.mxu1 %v9928_v43 }
 0x150   : > { %v844_v42 = vadd.f32 %v8528_v33, %v10138_v48  ;;  %v9274_v33 = vld [vmem:[%s12077_s3 + $0xf4] ss:$8 sps:$4 sm:$0xff]  }
 0x151   : > { %v8530_v24 = vpop.f32.mrf.mxu0 }
 0x152   : > { %1588 = vmatpush1.bf16.msra.mxu1 %v889_v23  ;;  %v8531_v30 = vadd.f32 %v8530_v24, %v8529_v22  ;;  %v883_v53 = vmax.f32 %v844_v42, 0.0  ;;  %v9258_v22 = vld [vmem:[%s12077_s3 + $0x90] ss:$8 sps:$4 sm:$0xff]   ;;  %v9259_v23 = vld [vmem:[%s12077_s3 + $0xa4] ss:$8 sps:$4 sm:$0xff]  }
 0x153   : > { %v8532_v25 = vpop.f32.mrf.mxu0  ;;  %1589 = vmatprep.subr.bf16.mxu1 %v9928_v43  ;;  %v9261_v24 = vld [vmem:[%s12077_s3 + $0xa0] ss:$8 sps:$4 sm:$0xff]   ;;  %v9287_v42 = vld [vmem:[%s12077_s3 + $0x134] ss:$8 sps:$4 sm:$0xff]  }
 0x154   : > { %v849_v39 = vadd.f32 %v8531_v30, %v10138_v48  ;;  %v9270_v30 = vld [vmem:[%s12077_s3 + $0xd0] ss:$8 sps:$4 sm:$0xff]  }
 0x155   : > { %v8533_v5 = vpop.f32.mrf.mxu0 }
 0x156   : > { %1590 = vmatpush1.bf16.msra.mxu1 %v10148_v7  ;;  %v8534_v27 = vadd.f32 %v8533_v5, %v8532_v25  ;;  %v8525_v7 = vadd.f32 %v8524_v16, %v8523_v14  ;;  %v884_v49 = vmax.f32 %v849_v39, 0.0  ;;  %v9241_v14 = vld [vmem:[%s12077_s3 + $0x44] ss:$8 sps:$4 sm:$0xff]   ;;  %v9246_v16 = vld [vmem:[%s12077_s3 + $0x50] ss:$8 sps:$4 sm:$0xff]  }
 0x157   : > { %v8535_v26 = vpop.f32.mrf.mxu0  ;;  %1591 = vmatprep.subr.bf16.mxu1 %v9928_v43  ;;  %v9262_v25 = vld [vmem:[%s12077_s3 + $0xb4] ss:$8 sps:$4 sm:$0xff]   ;;  %v9282_v39 = vld [vmem:[%s12077_s3 + $0x110] ss:$8 sps:$4 sm:$0xff]  }
 0x158   : > { %v852_v35 = vadd.f32 %v8534_v27, %v10138_v48  ;;  %v841_v47 = vadd.f32 %v8525_v7, %v10138_v48  ;;  %v9312_v5 = vld [vmem:[%s12078_s4 + $0x10] sm:$0xff]   ;;  %v9265_v27 = vld [vmem:[%s12077_s3 + $0xc4] ss:$8 sps:$4 sm:$0xff]  }
 0x159   : > { %v8536_v28 = vpop.f32.mrf.mxu0  ;;  %8725 = vmatpush3.bf16.msra.mxu0 %v9312_v5  ;;  %v9280_v7 = vld [vmem:[%s12077_s3 + $0x114] ss:$8 sps:$4 sm:$0xff]   ;;  %v9322_v5 = vld [vmem:[%s12077_s3 + $0x1e4] ss:$8 sps:$4 sm:$0xff]  }
 0x15a   : > { %v8537_v29 = vadd.f32 %v8536_v28, %v8535_v26  ;;  %1592 = vmatpush1.bf16.msra.mxu1 %v10142_v60  ;;  %v885_v60 = vmax.f32 %v852_v35, 0.0  ;;  %v882_v58 = vmax.f32 %v841_v47, 0.0  ;;  %v9264_v26 = vld [vmem:[%s12077_s3 + $0xb0] ss:$8 sps:$4 sm:$0xff]   ;;  %8738 = vmatprep.subr.bf16.mxu0 %v9929_v11  ;;  %v9267_v28 = vld [vmem:[%s12077_s3 + $0xc0] ss:$8 sps:$4 sm:$0xff]  }
 0x15b   : > { %v8538_v31 = vpop.f32.mrf.mxu0  ;;  %1599 = vmatprep.subr.bf16.mxu1 %v9928_v43  ;;  %v9276_v35 = vld [vmem:[%s12077_s3 + $0xf0] ss:$8 sps:$4 sm:$0xff]   ;;  %v9294_v47 = vld [vmem:[%s12077_s3 + $0x154] ss:$8 sps:$4 sm:$0xff]  }
 0x15c   : > { %v857_v32 = vadd.f32 %v8537_v29, %v10138_v48  ;;  %v898_v55 = vpack.c.bf16 %v885_v60, %v884_v49  ;;  %v897_v61 = vpack.c.bf16 %v883_v53, %v882_v58  ;;  %v9232_v48 = vld [vmem:[%s12077_s3 + $0x14] ss:$8 sps:$4 sm:$0xff]   ;;  %v9271_v31 = vld [vmem:[%s12077_s3 + $0xe4] ss:$8 sps:$4 sm:$0xff]   ;;  %v9289_v60 = vld [vmem:[%s12077_s3 + $0x130] ss:$8 sps:$4 sm:$0xff]  }
 0x15d   : > { %v8539_v36 = vpop.f32.mrf.mxu0  ;;  %v9268_v29 = vld [vmem:[%s12077_s3 + $0xd4] ss:$8 sps:$4 sm:$0xff]   ;;  %v9296_v49 = vld [vmem:[%s12077_s3 + $0x150] ss:$8 sps:$4 sm:$0xff]  }
 0x15e   : > { %v886_v37 = vmax.f32 %v857_v32, 0.0  ;;  %v9273_v32 = vld [vmem:[%s12077_s3 + $0xe0] ss:$8 sps:$4 sm:$0xff]   ;;  %v9277_v36 = vld [vmem:[%s12077_s3 + $0x104] ss:$8 sps:$4 sm:$0xff]  }
 0x15f   : > { %v9300_v53 = vld [vmem:[%s12077_s3 + $0x174] ss:$8 sps:$4 sm:$0xff]  }
 0x160   : > { %v899_v40 = vpack.c.bf16 %v886_v37, %v886_v37  ;;  %v9279_v37 = vld [vmem:[%s12077_s3 + $0x100] ss:$8 sps:$4 sm:$0xff]   ;;  %v9306_v58 = vld [vmem:[%s12077_s3 + $0x194] ss:$8 sps:$4 sm:$0xff]  }
 0x162   : > { %v1575_v45 = vsel %vm1573_vm1, %v899_v40, 0  ;;  %v9283_v40 = vld [vmem:[%s12077_s3 + $0x124] ss:$8 sps:$4 sm:$0xff]  }
 0x163   : > { %1600 = vmatpush2.bf16.msra.mxu1 %v1575_v45  ;;  %v9291_v45 = vld [vmem:[%s12077_s3 + $0x144] ss:$8 sps:$4 sm:$0xff]  }
 0x164   : > { %1601 = vmatprep.subr.bf16.mxu1 %v9928_v43 }
 0x167   : > { %1602 = vmatpush2.bf16.msra.mxu1 %v898_v55  ;;  %v9302_v55 = vld [vmem:[%s12077_s3 + $0x170] ss:$8 sps:$4 sm:$0xff]  }
 0x168   : > { %1603 = vmatprep.subr.bf16.mxu1 %v9928_v43 }
 0x16b   : > { %1604 = vmatpush2.bf16.msra.mxu1 %v897_v61 }
 0x16c   : > { %1605 = vmatprep.subr.bf16.mxu1 %v9928_v43 }
 0x16f   : > { %1606 = vmatpush2.bf16.msra.mxu1 %v896_v63 }
 0x170   : > { %1607 = vmatprep.subr.bf16.mxu1 %v9928_v43 }
 0x173   : > { %1608 = vmatpush2.bf16.msra.mxu1 %v895_v34 }
 0x174   : > { %8930 = vmatprep.subr.bf16.mxu1 %v9929_v11 }
 0x176   : > { %1610 = vmatmul.mubr.bf16.vlgmr.msra.gmra.mxu1 %v9229_v38  ;;  %v9311_v38 = vld [vmem:[%s12077_s3 + $0x1a0] ss:$8 sps:$4 sm:$0xff]  }
 0x177   : > { %7932 = vmatprep.mubr.msk.bf16.mxu1 %vm1428_vm0, %v9232_v48  ;;  %8931 = vmatpush3.bf16.msra.mxu1 %v9286_v13  ;;  %v9313_v48 = vld [vmem:[%s12077_s3 + $0x1b4] ss:$8 sps:$4 sm:$0xff]   ;;  %v9315_v13 = vld [vmem:[%s12077_s3 + $0x1b0] ss:$8 sps:$4 sm:$0xff]  }
 0x178   : > { %8932 = vmatprep.subr.bf16.mxu1 %v9929_v11 }
 0x17e   : > { %1618 = vmatmul.mubr.bf16.gmra.mxu1 %v9234_v1 }
 0x17f   : > { %7933 = vmatprep.mubr.msk.bf16.mxu1 %vm1428_vm0, %v9235_v2 }
 0x186   : > { %1626 = vmatmul.mubr.bf16.gmra.mxu1 %v9237_v3 }
 0x187   : > { %7934 = vmatprep.mubr.msk.bf16.mxu1 %vm1428_vm0, %v9238_v4 }
 0x18e   : > { %1634 = vmatmul.mubr.bf16.gmra.mxu1 %v9240_v12  ;;  %v9316_v12 = vld [vmem:[%s12077_s3 + $0x1c4] ss:$8 sps:$4 sm:$0xff]  }
 0x18f   : > { %7935 = vmatprep.mubr.msk.bf16.mxu1 %vm1428_vm0, %v9241_v14  ;;  %v9371_v14 = vld [vmem:[%s12078_s4 + $0xd0] sm:$0xff]  }
 0x190   : > { %8933 = vmatpush3.bf16.msra.mxu1 %v9371_v14  ;;  %v9344_v14 = vld [vmem:[%s12077_s3 + $0x244] ss:$8 sps:$4 sm:$0xff]  }
 0x191   : > { %9128 = vmatprep.subr.bf16.mxu1 %v9929_v11 }
 0x196   : > { %1642 = vmatmul.mubr.bf16.gmra.mxu1 %v9243_v10 }
 0x197   : > { %7936 = vmatprep.mubr.msk.bf16.mxu1 %vm1428_vm0, %v9244_v15 }
 0x19e   : > { %1650 = vmatmul.mubr.bf16.gmra.mxu1 %v9246_v16 }
 0x19f   : > { %7937 = vmatprep.mubr.msk.bf16.mxu1 %vm1428_vm0, %v9247_v6  ;;  %v9318_v6 = vld [vmem:[%s12077_s3 + $0x1c0] ss:$8 sps:$4 sm:$0xff]  }
 0x1a6   : > { %1658 = vmatmul.mubr.bf16.gmra.mxu1 %v9249_v8 }
 0x1a7   : > { %7938 = vmatprep.mubr.msk.bf16.mxu1 %vm1428_vm0, %v9250_v17  ;;  %v9319_v17 = vld [vmem:[%s12077_s3 + $0x1d4] ss:$8 sps:$4 sm:$0xff]  }
 0x1ae   : > { %1666 = vmatmul.mubr.bf16.gmra.mxu1 %v9252_v18  ;;  %v9325_v18 = vld [vmem:[%s12078_s4 + $0x8] sm:$0xff]  }
 0x1af   : > { %7939 = vmatprep.mubr.msk.bf16.mxu1 %vm1428_vm0, %v9253_v19 }
 0x1b6   : > { %1674 = vmatmul.mubr.bf16.gmra.mxu1 %v9255_v20 }
 0x1b7   : > { %7940 = vmatprep.mubr.msk.bf16.mxu1 %vm1428_vm0, %v9256_v21  ;;  %v9326_v21 = vld [vmem:[%s12078_s4] sm:$0xff]  }
 0x1be   : > { %1682 = vmatmul.mubr.bf16.gmra.mxu1 %v9258_v22 }
 0x1bf   : > { %7941 = vmatprep.mubr.msk.bf16.mxu1 %vm1428_vm0, %v9259_v23 }
 0x1c6   : > { %1690 = vmatmul.mubr.bf16.gmra.mxu1 %v9261_v24  ;;  %v9321_v24 = vld [vmem:[%s12077_s3 + $0x1d0] ss:$8 sps:$4 sm:$0xff]  }
 0x1c7   : > { %7942 = vmatprep.mubr.msk.bf16.mxu1 %vm1428_vm0, %v9262_v25 }
 0x1ce   : > { %1698 = vmatmul.mubr.bf16.gmra.mxu1 %v9264_v26 }
 0x1cf   : > { %7943 = vmatprep.mubr.msk.bf16.mxu1 %vm1428_vm0, %v9265_v27 }
 0x1d6   : > { %1706 = vmatmul.mubr.bf16.gmra.mxu1 %v9267_v28 }
 0x1d7   : > { %7944 = vmatprep.mubr.msk.bf16.mxu1 %vm1428_vm0, %v9268_v29 }
 0x1de   : > { %1714 = vmatmul.mubr.bf16.gmra.mxu1 %v9270_v30  ;;  %v9324_v30 = vld [vmem:[%s12077_s3 + $0x1e0] ss:$8 sps:$4 sm:$0xff]  }
 0x1df   : > { %7945 = vmatprep.mubr.msk.bf16.mxu1 %vm1428_vm0, %v9271_v31 }
 0x1e6   : > { %1722 = vmatmul.mubr.bf16.gmra.mxu1 %v9273_v32  ;;  %v9327_v32 = vld [vmem:[%s12077_s3 + $0x1f4] ss:$8 sps:$4 sm:$0xff]  }
 0x1e7   : > { %7946 = vmatprep.mubr.msk.bf16.mxu1 %vm1428_vm0, %v9274_v33 }
 0x1ee   : > { %1730 = vmatmul.mubr.bf16.gmra.mxu1 %v9276_v35 }
 0x1ef   : > { %7947 = vmatprep.mubr.msk.bf16.mxu1 %vm1428_vm0, %v9277_v36 }
 0x1f6   : > { %1738 = vmatmul.mubr.bf16.gmra.mxu1 %v9279_v37 }
 0x1f7   : > { %7948 = vmatprep.mubr.msk.bf16.mxu1 %vm1428_vm0, %v9280_v7  ;;  %v9329_v7 = vld [vmem:[%s12077_s3 + $0x1f0] ss:$8 sps:$4 sm:$0xff]  }
 0x1fe   : > { %1746 = vmatmul.mubr.bf16.gmra.mxu1 %v9282_v39 }
 0x1ff   : > { %7949 = vmatprep.mubr.msk.bf16.mxu1 %vm1428_vm0, %v9283_v40  ;;  %v9330_v40 = vld [vmem:[%s12077_s3 + $0x204] ss:$8 sps:$4 sm:$0xff]  }
 0x206   : > { %1754 = vmatmul.mubr.bf16.gmra.mxu1 %v9285_v41  ;;  %v9336_v41 = vld [vmem:[%s12078_s4 + $0x28] sm:$0xff]  }
 0x207   : > { %7950 = vmatprep.mubr.msk.bf16.mxu1 %vm1428_vm0, %v9287_v42 }
 0x20e   : > { %1762 = vmatmul.mubr.bf16.gmra.mxu1 %v9289_v60 }
 0x20f   : > { %7951 = vmatprep.mubr.msk.bf16.mxu1 %vm1428_vm0, %v9291_v45  ;;  %v9337_v45 = vld [vmem:[%s12078_s4 + $0x20] sm:$0xff]  }
 0x216   : > { %1770 = vmatmul.mubr.bf16.gmra.mxu1 %v9293_v46 }
 0x217   : > { %7952 = vmatprep.mubr.msk.bf16.mxu1 %vm1428_vm0, %v9294_v47 }
 0x21e   : > { %1778 = vmatmul.mubr.bf16.gmra.mxu1 %v9296_v49  ;;  %v9332_v49 = vld [vmem:[%s12077_s3 + $0x200] ss:$8 sps:$4 sm:$0xff]  }
 0x21f   : > { %7953 = vmatprep.mubr.msk.bf16.mxu1 %vm1428_vm0, %v9297_v51 }
 0x226   : > { %1786 = vmatmul.mubr.bf16.gmra.mxu1 %v9299_v52  ;;  %v9333_v52 = vld [vmem:[%s12077_s3 + $0x214] ss:$8 sps:$4 sm:$0xff]  }
 0x227   : > { %7954 = vmatprep.mubr.msk.bf16.mxu1 %vm1428_vm0, %v9300_v53 }
 0x22e   : > { %1794 = vmatmul.mubr.bf16.gmra.mxu1 %v9302_v55 }
 0x22f   : > { %7955 = vmatprep.mubr.msk.bf16.mxu1 %vm1428_vm0, %v9303_v56 }
 0x236   : > { %v10391_v54 = vpop.f32.mrf.mxu1  ;;  %1802 = vmatmul.mubr.bf16.gmra.mxu1 %v9305_v57 }
 0x237   : > { %7956 = vmatprep.mubr.msk.bf16.mxu1 %vm1428_vm0, %v9306_v58  ;;  %v9335_v58 = vld [vmem:[%s12077_s3 + $0x210] ss:$8 sps:$4 sm:$0xff]  }
 0x238   : > { %v1613_v59 = vpop.f32.mrf.mxu1 }
 0x239   : > { %v9338_v59 = vld [vmem:[%s12077_s3 + $0x224] ss:$8 sps:$4 sm:$0xff]  }
 0x23a   : > { %v10394_v61 = vpop.f32.mrf.mxu1 }
 0x23b   : > { %v1994_v39 = vpack.c.bf16 %v10394_v61, %v10391_v54 }
 0x23c   : > { %v1616_v50 = vpop.f32.mrf.mxu1 }
 0x23e   : > { %v10402_v63 = vpop.f32.mrf.mxu1  ;;  %1810 = vmatmul.mubr.bf16.gmra.mxu1 %v9308_v62 }
 0x23f   : > { %7957 = vmatprep.mubr.msk.bf16.mxu1 %vm1428_vm0, %v9309_v44 }
 0x240   : > { %v1621_v0 = vpop.f32.mrf.mxu1 }
 0x242   : > { %v10405_v34 = vpop.f32.mrf.mxu1 }
 0x243   : > { %v1995_v51 = vpack.c.bf16 %v10405_v34, %v10402_v63  ;;  %v9340_v63 = vld [vmem:[%s12077_s3 + $0x220] ss:$8 sps:$4 sm:$0xff]   ;;  %v9341_v34 = vld [vmem:[%s12077_s3 + $0x234] ss:$8 sps:$4 sm:$0xff]  }
 0x244   : > { %v1624_v1 = vpop.f32.mrf.mxu1 }
 0x246   : > { %v10413_v2 = vpop.f32.mrf.mxu1  ;;  %1818 = vmatmul.mubr.bf16.gmra.mxu1 %v9311_v38  ;;  %v9347_v38 = vld [vmem:[%s12078_s4 + $0x38] sm:$0xff]  }
 0x247   : > { %7958 = vmatprep.mubr.msk.bf16.mxu1 %vm1428_vm0, %v9313_v48 }
 0x248   : > { %v1629_v3 = vpop.f32.mrf.mxu1 }
 0x24a   : > { %v10416_v4 = vpop.f32.mrf.mxu1 }
 0x24b   : > { %v1996_v54 = vpack.c.bf16 %v10416_v4, %v10413_v2  ;;  %v9348_v2 = vld [vmem:[%s12078_s4 + $0x30] sm:$0xff]  }
 0x24c   : > { %v1632_v9 = vpop.f32.mrf.mxu1 }
 0x24e   : > { %v1635_v10 = vpop.f32.mrf.mxu1  ;;  %1826 = vmatmul.mubr.bf16.gmra.mxu1 %v9315_v13  ;;  %v9343_v13 = vld [vmem:[%s12077_s3 + $0x230] ss:$8 sps:$4 sm:$0xff]  }
 0x24f   : > { %7959 = vmatprep.mubr.msk.bf16.mxu1 %vm1428_vm0, %v9316_v12 }
 0x250   : > { %v1637_v15 = vpop.f32.mrf.mxu1 }
 0x252   : > { %v1638_v16 = vpop.f32.mrf.mxu1 }
 0x253   : > { %v1997_v8 = vpack.c.bf16 %v1638_v16, %v1635_v10 }
 0x254   : > { %v1640_v19 = vpop.f32.mrf.mxu1 }
 0x255   : > { %8727 = vmatmul.mubr.msk.bf16.vlgmr.msra.gmra.mxu0 %vm2062_vm3, %v1997_v8 }
 0x256   : > { %v1643_v20 = vpop.f32.mrf.mxu1  ;;  %1834 = vmatmul.mubr.bf16.gmra.mxu1 %v9318_v6  ;;  %8730 = vmatprep.mubr.msk.bf16.mxu0 %vm9930_vm2, %v9929_v11  ;;  %v9346_v6 = vld [vmem:[%s12077_s3 + $0x240] ss:$8 sps:$4 sm:$0xff]  }
 0x257   : > { %7960 = vmatprep.mubr.msk.bf16.mxu1 %vm1428_vm0, %v9319_v17  ;;  %8739 = vmatpush3.bf16.msra.mxu0 %v9325_v18  ;;  %v9349_v17 = vld [vmem:[%s12077_s3 + $0x254] ss:$8 sps:$4 sm:$0xff]  }
 0x258   : > { %v1645_v22 = vpop.f32.mrf.mxu1  ;;  %8740 = vmatprep.subr.bf16.mxu0 %v9929_v11 }
 0x259   : > { %v9351_v22 = vld [vmem:[%s12077_s3 + $0x250] ss:$8 sps:$4 sm:$0xff]  }
 0x25a   : > { %v1646_v23 = vpop.f32.mrf.mxu1 }
 0x25b   : > { %v1998_v25 = vpack.c.bf16 %v1646_v23, %v1643_v20  ;;  %8741 = vmatpush3.bf16.msra.mxu0 %v9326_v21 }
 0x25c   : > { %v1648_v26 = vpop.f32.mrf.mxu1  ;;  %8754 = vmatprep.subr.bf16.mxu0 %v9929_v11 }
 0x25d   : > { %8731 = vmatmul.mubr.msk.bf16.gmra.mxu0 %vm2062_vm3, %v1998_v25  ;;  %v9358_v25 = vld [vmem:[%s12078_s4 + $0x48] sm:$0xff]  }
 0x25e   : > { %v1651_v27 = vpop.f32.mrf.mxu1  ;;  %1842 = vmatmul.mubr.bf16.gmra.mxu1 %v9321_v24  ;;  %8734 = vmatprep.mubr.msk.bf16.mxu0 %vm9930_vm2, %v9929_v11  ;;  %v9352_v24 = vld [vmem:[%s12077_s3 + $0x264] ss:$8 sps:$4 sm:$0xff]  }
 0x25f   : > { %7961 = vmatprep.mubr.msk.bf16.mxu1 %vm1428_vm0, %v9322_v5 }
 0x260   : > { %v1653_v28 = vpop.f32.mrf.mxu1 }
 0x262   : > { %v1654_v29 = vpop.f32.mrf.mxu1 }
 0x263   : > { %v1999_v31 = vpack.c.bf16 %v1654_v29, %v1651_v27  ;;  %v9359_v27 = vld [vmem:[%s12078_s4 + $0x40] sm:$0xff]  }
 0x264   : > { %v1656_v33 = vpop.f32.mrf.mxu1 }
 0x265   : > { %8735 = vmatmul.mubr.msk.bf16.gmra.mxu0 %vm2062_vm3, %v1999_v31 }
 0x266   : > { %v1659_v35 = vpop.f32.mrf.mxu1  ;;  %1850 = vmatmul.mubr.bf16.gmra.mxu1 %v9324_v30  ;;  %8742 = vmatprep.mubr.msk.bf16.mxu0 %vm9930_vm2, %v9929_v11  ;;  %v9354_v30 = vld [vmem:[%s12077_s3 + $0x260] ss:$8 sps:$4 sm:$0xff]  }
 0x267   : > { %7962 = vmatprep.mubr.msk.bf16.mxu1 %vm1428_vm0, %v9327_v32  ;;  %v9355_v32 = vld [vmem:[%s12077_s3 + $0x274] ss:$8 sps:$4 sm:$0xff]  }
 0x268   : > { %v1661_v36 = vpop.f32.mrf.mxu1 }
 0x26a   : > { %v1662_v37 = vpop.f32.mrf.mxu1 }
 0x26b   : > { %v2000_v0 = vpack.c.bf16 %v1662_v37, %v1659_v35 }
 0x26c   : > { %v1664_v42 = vpop.f32.mrf.mxu1 }
 0x26d   : > { %8743 = vmatmul.mubr.msk.bf16.vlgmr.msra.gmra.mxu0 %vm2062_vm3, %v1994_v39 }
 0x26e   : > { %v1667_v60 = vpop.f32.mrf.mxu1  ;;  %1858 = vmatmul.mubr.bf16.gmra.mxu1 %v9329_v7  ;;  %8746 = vmatprep.mubr.msk.bf16.mxu0 %vm9930_vm2, %v9929_v11  ;;  %v9357_v7 = vld [vmem:[%s12077_s3 + $0x270] ss:$8 sps:$4 sm:$0xff]  }
 0x26f   : > { %7963 = vmatprep.mubr.msk.bf16.mxu1 %vm1428_vm0, %v9330_v40  ;;  %8755 = vmatpush3.bf16.msra.mxu0 %v9336_v41  ;;  %v9360_v40 = vld [vmem:[%s12077_s3 + $0x284] ss:$8 sps:$4 sm:$0xff]  }
 0x270   : > { %v1669_v46 = vpop.f32.mrf.mxu1  ;;  %8756 = vmatprep.subr.bf16.mxu0 %v9929_v11 }
 0x271   : > { %v9362_v46 = vld [vmem:[%s12077_s3 + $0x280] ss:$8 sps:$4 sm:$0xff]  }
 0x272   : > { %v1670_v47 = vpop.f32.mrf.mxu1 }
 0x273   : > { %8757 = vmatpush3.bf16.msra.mxu0 %v9337_v45  ;;  %v2001_v12 = vpack.c.bf16 %v1670_v47, %v1667_v60 }
 0x274   : > { %v1672_v53 = vpop.f32.mrf.mxu1  ;;  %8770 = vmatprep.subr.bf16.mxu0 %v9929_v11 }
 0x275   : > { %8747 = vmatmul.mubr.msk.bf16.gmra.mxu0 %vm2062_vm3, %v1995_v51  ;;  %v9369_v51 = vld [vmem:[%s12078_s4 + $0x58] sm:$0xff]  }
 0x276   : > { %v1675_v55 = vpop.f32.mrf.mxu1  ;;  %1866 = vmatmul.mubr.bf16.gmra.mxu1 %v9332_v49  ;;  %8750 = vmatprep.mubr.msk.bf16.mxu0 %vm9930_vm2, %v9929_v11  ;;  %v9363_v49 = vld [vmem:[%s12077_s3 + $0x294] ss:$8 sps:$4 sm:$0xff]  }
 0x277   : > { %7964 = vmatprep.mubr.msk.bf16.mxu1 %vm1428_vm0, %v9333_v52 }
 0x278   : > { %v1677_v56 = vpop.f32.mrf.mxu1 }
 0x27a   : > { %v1678_v57 = vpop.f32.mrf.mxu1 }
 0x27b   : > { %v2002_v8 = vpack.c.bf16 %v1678_v57, %v1675_v55  ;;  %v9370_v55 = vld [vmem:[%s12078_s4 + $0x50] sm:$0xff]  }
 0x27c   : > { %v1680_v61 = vpop.f32.mrf.mxu1 }
 0x27d   : > { %8751 = vmatmul.mubr.msk.bf16.gmra.mxu0 %vm2062_vm3, %v1996_v54 }
 0x27e   : > { %v1683_v62 = vpop.f32.mrf.mxu1  ;;  %1874 = vmatmul.mubr.bf16.gmra.mxu1 %v9335_v58  ;;  %8758 = vmatprep.mubr.msk.bf16.mxu0 %vm9930_vm2, %v9929_v11  ;;  %v9365_v58 = vld [vmem:[%s12077_s3 + $0x290] ss:$8 sps:$4 sm:$0xff]  }
 0x27f   : > { %7965 = vmatprep.mubr.msk.bf16.mxu1 %vm1428_vm0, %v9338_v59  ;;  %v9366_v59 = vld [vmem:[%s12077_s3 + $0x2a4] ss:$8 sps:$4 sm:$0xff]  }
 0x280   : > { %v1685_v44 = vpop.f32.mrf.mxu1 }
 0x282   : > { %v1686_v50 = vpop.f32.mrf.mxu1 }
 0x283   : > { %v2003_v23 = vpack.c.bf16 %v1686_v50, %v1683_v62 }
 0x284   : > { %v1688_v48 = vpop.f32.mrf.mxu1 }
 0x285   : > { %8759 = vmatmul.mubr.msk.bf16.vlgmr.msra.gmra.mxu0 %vm2062_vm3, %v2000_v0 }
 0x286   : > { %v1691_v1 = vpop.f32.mrf.mxu1  ;;  %1882 = vmatmul.mubr.bf16.gmra.mxu1 %v9340_v63  ;;  %8762 = vmatprep.mubr.msk.bf16.mxu0 %vm9930_vm2, %v9929_v11  ;;  %v9368_v63 = vld [vmem:[%s12077_s3 + $0x2a0] ss:$8 sps:$4 sm:$0xff]  }
 0x287   : > { %7966 = vmatprep.mubr.msk.bf16.mxu1 %vm1428_vm0, %v9341_v34  ;;  %8771 = vmatpush3.bf16.msra.mxu0 %v9347_v38  ;;  %v9372_v34 = vld [vmem:[%s12077_s3 + $0x2b4] ss:$8 sps:$4 sm:$0xff]  }
 0x288   : > { %v1693_v3 = vpop.f32.mrf.mxu1  ;;  %8772 = vmatprep.subr.bf16.mxu0 %v9929_v11 }
 0x289   : > { %v9374_v3 = vld [vmem:[%s12077_s3 + $0x2b0] ss:$8 sps:$4 sm:$0xff]  }
 0x28a   : > { %v1694_v4 = vpop.f32.mrf.mxu1 }
 0x28b   : > { %8773 = vmatpush3.bf16.msra.mxu0 %v9348_v2  ;;  %v2004_v31 = vpack.c.bf16 %v1694_v4, %v1691_v1 }
 0x28c   : > { %v1696_v9 = vpop.f32.mrf.mxu1  ;;  %8786 = vmatprep.subr.bf16.mxu0 %v9929_v11 }
 0x28d   : > { %8763 = vmatmul.mubr.msk.bf16.gmra.mxu0 %vm2062_vm3, %v2001_v12  ;;  %v9381_v12 = vld [vmem:[%s12078_s4 + $0x68] sm:$0xff]  }
 0x28e   : > { %v1699_v10 = vpop.f32.mrf.mxu1  ;;  %1890 = vmatmul.mubr.bf16.gmra.mxu1 %v9343_v13  ;;  %8766 = vmatprep.mubr.msk.bf16.mxu0 %vm9930_vm2, %v9929_v11  ;;  %v9375_v13 = vld [vmem:[%s12077_s3 + $0x2c4] ss:$8 sps:$4 sm:$0xff]  }
 0x28f   : > { %7967 = vmatprep.mubr.msk.bf16.mxu1 %vm1428_vm0, %v9344_v14 }
 0x290   : > { %v1701_v15 = vpop.f32.mrf.mxu1 }
 0x292   : > { %v1702_v16 = vpop.f32.mrf.mxu1 }
 0x293   : > { %v2005_v39 = vpack.c.bf16 %v1702_v16, %v1699_v10  ;;  %v9382_v10 = vld [vmem:[%s12078_s4 + $0x60] sm:$0xff]  }
 0x294   : > { %v1704_v18 = vpop.f32.mrf.mxu1 }
 0x295   : > { %8767 = vmatmul.mubr.msk.bf16.gmra.mxu0 %vm2062_vm3, %v2002_v8 }
 0x296   : > { %v1707_v19 = vpop.f32.mrf.mxu1  ;;  %1898 = vmatmul.mubr.bf16.gmra.mxu1 %v9346_v6  ;;  %8774 = vmatprep.mubr.msk.bf16.mxu0 %vm9930_vm2, %v9929_v11  ;;  %v9377_v6 = vld [vmem:[%s12077_s3 + $0x2c0] ss:$8 sps:$4 sm:$0xff]  }
 0x297   : > { %7968 = vmatprep.mubr.msk.bf16.mxu1 %vm1428_vm0, %v9349_v17  ;;  %v9378_v17 = vld [vmem:[%s12077_s3 + $0x2d4] ss:$8 sps:$4 sm:$0xff]  }
 0x298   : > { %v1709_v20 = vpop.f32.mrf.mxu1 }
 0x29a   : > { %v1710_v21 = vpop.f32.mrf.mxu1 }
 0x29b   : > { %v2006_v47 = vpack.c.bf16 %v1710_v21, %v1707_v19 }
 0x29c   : > { %v1712_v5 = vpop.f32.mrf.mxu1 }
 0x29d   : > { %8775 = vmatmul.mubr.msk.bf16.vlgmr.msra.gmra.mxu0 %vm2062_vm3, %v2003_v23 }
 0x29e   : > { %v1715_v26 = vpop.f32.mrf.mxu1  ;;  %1906 = vmatmul.mubr.bf16.gmra.mxu1 %v9351_v22  ;;  %8778 = vmatprep.mubr.msk.bf16.mxu0 %vm9930_vm2, %v9929_v11  ;;  %v9380_v22 = vld [vmem:[%s12077_s3 + $0x2d0] ss:$8 sps:$4 sm:$0xff]  }
 0x29f   : > { %7969 = vmatprep.mubr.msk.bf16.mxu1 %vm1428_vm0, %v9352_v24  ;;  %8787 = vmatpush3.bf16.msra.mxu0 %v9358_v25  ;;  %v9383_v24 = vld [vmem:[%s12077_s3 + $0x2e4] ss:$8 sps:$4 sm:$0xff]  }
 0x2a0   : > { %v1717_v28 = vpop.f32.mrf.mxu1  ;;  %8788 = vmatprep.subr.bf16.mxu0 %v9929_v11 }
 0x2a1   : > { %v9385_v28 = vld [vmem:[%s12077_s3 + $0x2e0] ss:$8 sps:$4 sm:$0xff]  }
 0x2a2   : > { %v1718_v29 = vpop.f32.mrf.mxu1 }
 0x2a3   : > { %8789 = vmatpush3.bf16.msra.mxu0 %v9359_v27  ;;  %v2007_v54 = vpack.c.bf16 %v1718_v29, %v1715_v26 }
 0x2a4   : > { %v1720_v33 = vpop.f32.mrf.mxu1  ;;  %8802 = vmatprep.subr.bf16.mxu0 %v9929_v11 }
 0x2a5   : > { %8779 = vmatmul.mubr.msk.bf16.gmra.mxu0 %vm2062_vm3, %v2004_v31  ;;  %v9389_v31 = vld [vmem:[%s12078_s4 + $0x78] sm:$0xff]  }
 0x2a6   : > { %v1723_v35 = vpop.f32.mrf.mxu1  ;;  %1914 = vmatmul.mubr.bf16.gmra.mxu1 %v9354_v30  ;;  %8782 = vmatprep.mubr.msk.bf16.mxu0 %vm9930_vm2, %v9929_v11  ;;  %v9386_v30 = vld [vmem:[%s12077_s3 + $0x2f4] ss:$8 sps:$4 sm:$0xff]  }
 0x2a7   : > { %7970 = vmatprep.mubr.msk.bf16.mxu1 %vm1428_vm0, %v9355_v32 }
 0x2a8   : > { %v1725_v36 = vpop.f32.mrf.mxu1 }
 0x2aa   : > { %v1726_v37 = vpop.f32.mrf.mxu1 }
 0x2ab   : > { %v2008_v0 = vpack.c.bf16 %v1726_v37, %v1723_v35  ;;  %v9390_v35 = vld [vmem:[%s12078_s4 + $0x70] sm:$0xff]  }
 0x2ac   : > { %v1728_v41 = vpop.f32.mrf.mxu1 }
 0x2ad   : > { %8783 = vmatmul.mubr.msk.bf16.gmra.mxu0 %vm2062_vm3, %v2005_v39 }
 0x2ae   : > { %v1731_v42 = vpop.f32.mrf.mxu1  ;;  %1922 = vmatmul.mubr.bf16.gmra.mxu1 %v9357_v7  ;;  %8790 = vmatprep.mubr.msk.bf16.mxu0 %vm9930_vm2, %v9929_v11  ;;  %v9388_v7 = vld [vmem:[%s12077_s3 + $0x2f0] ss:$8 sps:$4 sm:$0xff]  }
 0x2af   : > { %7971 = vmatprep.mubr.msk.bf16.mxu1 %vm1428_vm0, %v9360_v40 }
 0x2b0   : > { %v1733_v60 = vpop.f32.mrf.mxu1 }
 0x2b2   : > { %v1734_v45 = vpop.f32.mrf.mxu1 }
 0x2b3   : > { %v2009_v4 = vpack.c.bf16 %v1734_v45, %v1731_v42 }
 0x2b4   : > { %v1736_v52 = vpop.f32.mrf.mxu1 }
 0x2b5   : > { %8791 = vmatmul.mubr.msk.bf16.vlgmr.msra.gmra.mxu0 %vm2062_vm3, %v2006_v47  ;;  %v9391_v52 = vld [vmem:[%s12078_s4 + $0x88] sm:$0xff]  }
 0x2b6   : > { %v1739_v53 = vpop.f32.mrf.mxu1  ;;  %1930 = vmatmul.mubr.bf16.gmra.mxu1 %v9362_v46  ;;  %8794 = vmatprep.mubr.msk.bf16.mxu0 %vm9930_vm2, %v9929_v11 }
 0x2b7   : > { %7972 = vmatprep.mubr.msk.bf16.mxu1 %vm1428_vm0, %v9363_v49  ;;  %8803 = vmatpush3.bf16.msra.mxu0 %v9369_v51 }
 0x2b8   : > { %v1741_v56 = vpop.f32.mrf.mxu1  ;;  %8804 = vmatprep.subr.bf16.mxu0 %v9929_v11 }
 0x2ba   : > { %v1742_v57 = vpop.f32.mrf.mxu1 }
 0x2bb   : > { %8805 = vmatpush3.bf16.msra.mxu0 %v9370_v55  ;;  %v2010_v8 = vpack.c.bf16 %v1742_v57, %v1739_v53  ;;  %v9392_v57 = vld [vmem:[%s12078_s4 + $0x80] sm:$0xff]  }
 0x2bc   : > { %v1744_v61 = vpop.f32.mrf.mxu1  ;;  %8818 = vmatprep.subr.bf16.mxu0 %v9929_v11 }
 0x2bd   : > { %8795 = vmatmul.mubr.msk.bf16.gmra.mxu0 %vm2062_vm3, %v2007_v54 }
 0x2be   : > { %v1747_v62 = vpop.f32.mrf.mxu1  ;;  %1938 = vmatmul.mubr.bf16.gmra.mxu1 %v9365_v58  ;;  %8798 = vmatprep.mubr.msk.bf16.mxu0 %vm9930_vm2, %v9929_v11 }
 0x2bf   : > { %7973 = vmatprep.mubr.msk.bf16.mxu1 %vm1428_vm0, %v9366_v59 }
 0x2c0   : > { %v1749_v44 = vpop.f32.mrf.mxu1 }
 0x2c2   : > { %v1750_v50 = vpop.f32.mrf.mxu1 }
 0x2c3   : > { %v2011_v23 = vpack.c.bf16 %v1750_v50, %v1747_v62 }
 0x2c4   : > { %v1752_v38 = vpop.f32.mrf.mxu1 }
 0x2c5   : > { %8799 = vmatmul.mubr.msk.bf16.gmra.mxu0 %vm2062_vm3, %v2008_v0 }
 0x2c6   : > { %v1755_v48 = vpop.f32.mrf.mxu1  ;;  %1946 = vmatmul.mubr.bf16.gmra.mxu1 %v9368_v63  ;;  %8806 = vmatprep.mubr.msk.bf16.mxu0 %vm9930_vm2, %v9929_v11 }
 0x2c7   : > { %7974 = vmatprep.mubr.msk.bf16.mxu1 %vm1428_vm0, %v9372_v34 }
 0x2c8   : > { %v1757_v1 = vpop.f32.mrf.mxu1 }
 0x2c9   : > { %v9393_v1 = vld [vmem:[%s12078_s4 + $0x98] sm:$0xff]  }
 0x2ca   : > { %v1758_v2 = vpop.f32.mrf.mxu1 }
 0x2cb   : > { %v2012_v29 = vpack.c.bf16 %v1758_v2, %v1755_v48 }
 0x2cc   : > { %v1760_v14 = vpop.f32.mrf.mxu1 }
 0x2cd   : > { %8807 = vmatmul.mubr.msk.bf16.vlgmr.msra.gmra.mxu0 %vm2062_vm3, %v2009_v4 }
 0x2ce   : > { %v1763_v9 = vpop.f32.mrf.mxu1  ;;  %1954 = vmatmul.mubr.bf16.gmra.mxu1 %v9374_v3  ;;  %8810 = vmatprep.mubr.msk.bf16.mxu0 %vm9930_vm2, %v9929_v11 }
 0x2cf   : > { %7975 = vmatprep.mubr.msk.bf16.mxu1 %vm1428_vm0, %v9375_v13  ;;  %8819 = vmatpush3.bf16.msra.mxu0 %v9381_v12  ;;  %v9394_v12 = vld [vmem:[%s12078_s4 + $0x90] sm:$0xff]  }
 0x2d0   : > { %v1765_v15 = vpop.f32.mrf.mxu1  ;;  %8820 = vmatprep.subr.bf16.mxu0 %v9929_v11 }
 0x2d2   : > { %v1766_v16 = vpop.f32.mrf.mxu1 }
 0x2d3   : > { %8821 = vmatpush3.bf16.msra.mxu0 %v9382_v10  ;;  %v2013_v39 = vpack.c.bf16 %v1766_v16, %v1763_v9 }
 0x2d4   : > { %v1768_v18 = vpop.f32.mrf.mxu1  ;;  %8834 = vmatprep.subr.bf16.mxu0 %v9929_v11 }
 0x2d5   : > { %8811 = vmatmul.mubr.msk.bf16.gmra.mxu0 %vm2062_vm3, %v2010_v8 }
 0x2d6   : > { %v1771_v19 = vpop.f32.mrf.mxu1  ;;  %1962 = vmatmul.mubr.bf16.gmra.mxu1 %v9377_v6  ;;  %8814 = vmatprep.mubr.msk.bf16.mxu0 %vm9930_vm2, %v9929_v11 }
 0x2d7   : > { %7976 = vmatprep.mubr.msk.bf16.mxu1 %vm1428_vm0, %v9378_v17 }
 0x2d8   : > { %v1773_v20 = vpop.f32.mrf.mxu1 }
 0x2da   : > { %v1774_v21 = vpop.f32.mrf.mxu1 }
 0x2db   : > { %v2014_v45 = vpack.c.bf16 %v1774_v21, %v1771_v19 }
 0x2dc   : > { %v1776_v25 = vpop.f32.mrf.mxu1 }
 0x2dd   : > { %8815 = vmatmul.mubr.msk.bf16.gmra.mxu0 %vm2062_vm3, %v2011_v23 }
 0x2de   : > { %v1779_v5 = vpop.f32.mrf.mxu1  ;;  %1970 = vmatmul.mubr.bf16.gmra.mxu1 %v9380_v22  ;;  %8822 = vmatprep.mubr.msk.bf16.mxu0 %vm9930_vm2, %v9929_v11 }
 0x2df   : > { %7977 = vmatprep.mubr.msk.bf16.mxu1 %vm1428_vm0, %v9383_v24 }
 0x2e0   : > { %v1781_v26 = vpop.f32.mrf.mxu1 }
 0x2e2   : > { %v1782_v27 = vpop.f32.mrf.mxu1 }
 0x2e3   : > { %v2015_v53 = vpack.c.bf16 %v1782_v27, %v1779_v5 }
 0x2e4   : > { %v1784_v32 = vpop.f32.mrf.mxu1 }
 0x2e5   : > { %8823 = vmatmul.mubr.msk.bf16.vlgmr.msra.gmra.mxu0 %vm2062_vm3, %v2012_v29 }
 0x2e6   : > { %v1787_v33 = vpop.f32.mrf.mxu1  ;;  %1978 = vmatmul.mubr.bf16.gmra.mxu1 %v9385_v28  ;;  %8826 = vmatprep.mubr.msk.bf16.mxu0 %vm9930_vm2, %v9929_v11 }
 0x2e7   : > { %7978 = vmatprep.mubr.msk.bf16.mxu1 %vm1428_vm0, %v9386_v30  ;;  %8835 = vmatpush3.bf16.msra.mxu0 %v9389_v31  ;;  %v9395_v31 = vld [vmem:[%s12078_s4 + $0xa8] sm:$0xff]  }
 0x2e8   : > { %v1789_v36 = vpop.f32.mrf.mxu1  ;;  %8836 = vmatprep.subr.bf16.mxu0 %v9929_v11 }
 0x2ea   : > { %v1790_v37 = vpop.f32.mrf.mxu1 }
 0x2eb   : > { %8837 = vmatpush3.bf16.msra.mxu0 %v9390_v35  ;;  %v2016_v59 = vpack.c.bf16 %v1790_v37, %v1787_v33 }
 0x2ec   : > { %v1792_v40 = vpop.f32.mrf.mxu1  ;;  %8850 = vmatprep.subr.bf16.mxu0 %v9929_v11 }
 0x2ed   : > { %8827 = vmatmul.mubr.msk.bf16.gmra.mxu0 %vm2062_vm3, %v2013_v39  ;;  %v9396_v39 = vld [vmem:[%s12078_s4 + $0xa0] sm:$0xff]  }
 0x2ee   : > { %v1795_v41 = vpop.f32.mrf.mxu1  ;;  %1986 = vmatmul.mubr.bf16.gmra.mxu1 %v9388_v7  ;;  %8830 = vmatprep.mubr.msk.bf16.mxu0 %vm9930_vm2, %v9929_v11 }
 0x2ef   : > { %8934 = vmatprep.mubr.msk.bf16.mxu1 %vm9930_vm2, %v9929_v11 }
 0x2f0   : > { %v1797_v42 = vpop.f32.mrf.mxu1 }
 0x2f2   : > { %v1798_v60 = vpop.f32.mrf.mxu1 }
 0x2f3   : > { %v2017_v63 = vpack.c.bf16 %v1798_v60, %v1795_v41 }
 0x2f4   : > { %v1800_v46 = vpop.f32.mrf.mxu1 }
 0x2f5   : > { %8831 = vmatmul.mubr.msk.bf16.gmra.mxu0 %vm2062_vm3, %v2014_v45 }
 0x2f6   : > { %v1803_v47 = vpop.f32.mrf.mxu1  ;;  %8838 = vmatprep.mubr.msk.bf16.mxu0 %vm9930_vm2, %v9929_v11 }
 0x2f8   : > { %v1805_v49 = vpop.f32.mrf.mxu1 }
 0x2fa   : > { %v1806_v51 = vpop.f32.mrf.mxu1 }
 0x2fb   : > { %v2018_v2 = vpack.c.bf16 %v1806_v51, %v1803_v47 }
 0x2fc   : > { %v1808_v55 = vpop.f32.mrf.mxu1 }
 0x2fd   : > { %8839 = vmatmul.mubr.msk.bf16.vlgmr.msra.gmra.mxu0 %vm2062_vm3, %v2015_v53 }
 0x2fe   : > { %v1811_v56 = vpop.f32.mrf.mxu1  ;;  %8842 = vmatprep.mubr.msk.bf16.mxu0 %vm9930_vm2, %v9929_v11  ;;  %8851 = vmatpush3.bf16.msra.mxu0 %v9391_v52 }
 0x2ff   : > { %8852 = vmatprep.subr.bf16.mxu0 %v9929_v11 }
 0x300   : > { %v1813_v58 = vpop.f32.mrf.mxu1 }
 0x302   : > { %v1814_v54 = vpop.f32.mrf.mxu1  ;;  %8853 = vmatpush3.bf16.msra.mxu0 %v9392_v57 }
 0x303   : > { %8866 = vmatprep.subr.bf16.mxu0 %v9929_v11  ;;  %v2019_v16 = vpack.c.bf16 %v1814_v54, %v1811_v56 }
 0x304   : > { %v1816_v61 = vpop.f32.mrf.mxu1 }
 0x305   : > { %8843 = vmatmul.mubr.msk.bf16.gmra.mxu0 %vm2062_vm3, %v2016_v59 }
 0x306   : > { %v1819_v62 = vpop.f32.mrf.mxu1  ;;  %8846 = vmatprep.mubr.msk.bf16.mxu0 %vm9930_vm2, %v9929_v11 }
 0x308   : > { %v1821_v44 = vpop.f32.mrf.mxu1 }
 0x30a   : > { %v1822_v50 = vpop.f32.mrf.mxu1 }
 0x30b   : > { %v2020_v23 = vpack.c.bf16 %v1822_v50, %v1819_v62 }
 0x30c   : > { %v1824_v0 = vpop.f32.mrf.mxu1 }
 0x30d   : > { %8847 = vmatmul.mubr.msk.bf16.gmra.mxu0 %vm2062_vm3, %v2017_v63 }
 0x30e   : > { %v1827_v34 = vpop.f32.mrf.mxu1  ;;  %8854 = vmatprep.mubr.msk.bf16.mxu0 %vm9930_vm2, %v9929_v11 }
 0x310   : > { %v1829_v38 = vpop.f32.mrf.mxu1 }
 0x312   : > { %v1830_v48 = vpop.f32.mrf.mxu1 }
 0x313   : > { %v2021_v32 = vpack.c.bf16 %v1830_v48, %v1827_v34 }
 0x314   : > { %v1832_v3 = vpop.f32.mrf.mxu1 }
 0x315   : > { %v2106_v4 = vpop.f32.mrf.mxu0  ;;  %8855 = vmatmul.mubr.msk.bf16.vlgmr.msra.gmra.mxu0 %vm2062_vm3, %v2018_v2  ;;  %v9397_v2 = vld [vmem:[%s12078_s4 + $0xb8] sm:$0xff]  }
 0x316   : > { %v1835_v13 = vpop.f32.mrf.mxu1  ;;  %8858 = vmatprep.mubr.msk.bf16.mxu0 %vm9930_vm2, %v9929_v11  ;;  %8867 = vmatpush3.bf16.msra.mxu0 %v9393_v1 }
 0x317   : > { %v8728_v14 = vpop.f32.mrf.mxu0  ;;  %8868 = vmatprep.subr.bf16.mxu0 %v9929_v11 }
 0x318   : > { %v1837_v9 = vpop.f32.mrf.mxu1 }
 0x319   : > { %v2109_v10 = vpop.f32.mrf.mxu0 }
 0x31a   : > { %v1838_v15 = vpop.f32.mrf.mxu1  ;;  %8869 = vmatpush3.bf16.msra.mxu0 %v9394_v12 }
 0x31b   : > { %v8729_v6 = vpop.f32.mrf.mxu0  ;;  %8882 = vmatprep.subr.bf16.mxu0 %v9929_v11  ;;  %v2022_v46 = vpack.c.bf16 %v1838_v15, %v1835_v13 }
 0x31c   : > { %v1840_v8 = vpop.f32.mrf.mxu1 }
 0x31d   : > { %v2114_v17 = vpop.f32.mrf.mxu0  ;;  %8859 = vmatmul.mubr.msk.bf16.gmra.mxu0 %vm2062_vm3, %v2019_v16 }
 0x31e   : > { %v1843_v18 = vpop.f32.mrf.mxu1  ;;  %8862 = vmatprep.mubr.msk.bf16.mxu0 %vm9930_vm2, %v9929_v11 }
 0x31f   : > { %v8732_v19 = vpop.f32.mrf.mxu0 }
 0x320   : > { %v1845_v20 = vpop.f32.mrf.mxu1 }
 0x321   : > { %v2117_v21 = vpop.f32.mrf.mxu0 }
 0x322   : > { %v1846_v22 = vpop.f32.mrf.mxu1 }
 0x323   : > { %v8733_v24 = vpop.f32.mrf.mxu0  ;;  %v2023_v59 = vpack.c.bf16 %v1846_v22, %v1843_v18 }
 0x324   : > { %v1848_v25 = vpop.f32.mrf.mxu1 }
 0x325   : > { %v2122_v5 = vpop.f32.mrf.mxu0  ;;  %8863 = vmatmul.mubr.msk.bf16.gmra.mxu0 %vm2062_vm3, %v2020_v23 }
 0x326   : > { %v1851_v26 = vpop.f32.mrf.mxu1  ;;  %8870 = vmatprep.mubr.msk.bf16.mxu0 %vm9930_vm2, %v9929_v11 }
 0x327   : > { %v8736_v27 = vpop.f32.mrf.mxu0 }
 0x328   : > { %v1853_v28 = vpop.f32.mrf.mxu1 }
 0x329   : > { %v2125_v29 = vpop.f32.mrf.mxu0 }
 0x32a   : > { %v1854_v30 = vpop.f32.mrf.mxu1 }
 0x32b   : > { %v8737_v33 = vpop.f32.mrf.mxu0  ;;  %v2024_v3 = vpack.c.bf16 %v1854_v30, %v1851_v26 }
 0x32c   : > { %v1856_v35 = vpop.f32.mrf.mxu1 }
 0x32d   : > { %v2184_v36 = vpop.f32.mrf.mxu0  ;;  %8871 = vmatmul.mubr.msk.bf16.vlgmr.msra.gmra.mxu0 %vm2062_vm3, %v2021_v32 }
 0x32e   : > { %v2185_v37 = vadd.f32 %v2184_v36, %v2106_v4  ;;  %v1859_v7 = vpop.f32.mrf.mxu1  ;;  %8874 = vmatprep.mubr.msk.bf16.mxu0 %vm9930_vm2, %v9929_v11  ;;  %8883 = vmatpush3.bf16.msra.mxu0 %v9395_v31 }
 0x32f   : > { %v8744_v40 = vpop.f32.mrf.mxu0  ;;  %8884 = vmatprep.subr.bf16.mxu0 %v9929_v11 }
 0x330   : > { %v1861_v41 = vpop.f32.mrf.mxu1  ;;  %v9399_v40 = vld [vmem:[%s12078_s4 + $0xc8] sm:$0xff]  }
 0x331   : > { %v2187_v42 = vpop.f32.mrf.mxu0 }
 0x332   : > { %v2188_v60 = vadd.f32 %v2187_v42, %v2109_v10  ;;  %v1862_v45 = vpop.f32.mrf.mxu1  ;;  %8885 = vmatpush3.bf16.msra.mxu0 %v9396_v39  ;;  %v9398_v10 = vld [vmem:[%s12078_s4 + $0xb0] sm:$0xff]  }
 0x333   : > { %v8745_v47 = vpop.f32.mrf.mxu0  ;;  %8898 = vmatprep.subr.bf16.mxu0 %v9929_v11  ;;  %v2025_v18 = vpack.c.bf16 %v1862_v45, %v1859_v7 }
 0x334   : > { %v1864_v49 = vpop.f32.mrf.mxu1 }
 0x335   : > { %v2192_v51 = vpop.f32.mrf.mxu0  ;;  %8875 = vmatmul.mubr.msk.bf16.gmra.mxu0 %vm2062_vm3, %v2022_v46  ;;  %v9400_v49 = vld [vmem:[%s12078_s4 + $0xc0] sm:$0xff]  }
 0x336   : > { %v2193_v52 = vadd.f32 %v2192_v51, %v2114_v17  ;;  %v1867_v53 = vpop.f32.mrf.mxu1  ;;  %8878 = vmatprep.mubr.msk.bf16.mxu0 %vm9930_vm2, %v9929_v11 }
 0x337   : > { %v8748_v55 = vpop.f32.mrf.mxu0 }
 0x338   : > { %v1869_v56 = vpop.f32.mrf.mxu1 }
 0x339   : > { %v2195_v57 = vpop.f32.mrf.mxu0 }
 0x33a   : > { %v2196_v58 = vadd.f32 %v2195_v57, %v2117_v21  ;;  %v1870_v54 = vpop.f32.mrf.mxu1 }
 0x33b   : > { %v8749_v61 = vpop.f32.mrf.mxu0  ;;  %v2026_v28 = vpack.c.bf16 %v1870_v54, %v1867_v53 }
 0x33c   : > { %v1872_v62 = vpop.f32.mrf.mxu1 }
 0x33d   : > { %v2200_v44 = vpop.f32.mrf.mxu0  ;;  %8879 = vmatmul.mubr.msk.bf16.gmra.mxu0 %vm2062_vm3, %v2023_v59 }
 0x33e   : > { %v2201_v50 = vadd.f32 %v2200_v44, %v2122_v5  ;;  %v1875_v63 = vpop.f32.mrf.mxu1  ;;  %8886 = vmatprep.mubr.msk.bf16.mxu0 %vm9930_vm2, %v9929_v11 }
 0x33f   : > { %v8752_v0 = vpop.f32.mrf.mxu0 }
 0x340   : > { %v1877_v34 = vpop.f32.mrf.mxu1 }
 0x341   : > { %v2203_v38 = vpop.f32.mrf.mxu0 }
 0x342   : > { %v2204_v48 = vadd.f32 %v2203_v38, %v2125_v29  ;;  %v1878_v1 = vpop.f32.mrf.mxu1 }
 0x343   : > { %v8753_v4 = vpop.f32.mrf.mxu0  ;;  %v2027_v41 = vpack.c.bf16 %v1878_v1, %v1875_v63 }
 0x344   : > { %v1880_v13 = vpop.f32.mrf.mxu1 }
 0x345   : > { %v2266_v12 = vpop.f32.mrf.mxu0  ;;  %8887 = vmatmul.mubr.msk.bf16.vlgmr.msra.gmra.mxu0 %vm2062_vm3, %v2024_v3 }
 0x346   : > { %v2289_v14 = vadd.f32 %v2266_v12, %v2185_v37  ;;  %v1883_v9 = vpop.f32.mrf.mxu1  ;;  %8890 = vmatprep.mubr.msk.bf16.mxu0 %vm9930_vm2, %v9929_v11  ;;  %8899 = vmatpush3.bf16.msra.mxu0 %v9397_v2 }
 0x347   : > { %v8760_v15 = vpop.f32.mrf.mxu0  ;;  %8900 = vmatprep.subr.bf16.mxu0 %v9929_v11 }
 0x348   : > { %v1885_v16 = vpop.f32.mrf.mxu1 }
 0x349   : > { %v2269_v6 = vpop.f32.mrf.mxu0 }
 0x34a   : > { %v2290_v8 = vadd.f32 %v2269_v6, %v2188_v60  ;;  %v1886_v17 = vpop.f32.mrf.mxu1  ;;  %8901 = vmatpush3.bf16.msra.mxu0 %v9398_v10 }
 0x34b   : > { %v8761_v19 = vpop.f32.mrf.mxu0  ;;  %8914 = vmatprep.subr.bf16.mxu0 %v9929_v11  ;;  %v2028_v57 = vpack.c.bf16 %v1886_v17, %v1883_v9 }
 0x34c   : > { %v1888_v20 = vpop.f32.mrf.mxu1 }
 0x34d   : > { %v2274_v21 = vpop.f32.mrf.mxu0  ;;  %8891 = vmatmul.mubr.msk.bf16.gmra.mxu0 %vm2062_vm3, %v2025_v18 }
 0x34e   : > { %v2291_v22 = vadd.f32 %v2274_v21, %v2193_v52  ;;  %v1891_v23 = vpop.f32.mrf.mxu1  ;;  %8894 = vmatprep.mubr.msk.bf16.mxu0 %vm9930_vm2, %v9929_v11 }
 0x34f   : > { %v8764_v24 = vpop.f32.mrf.mxu0 }
 0x350   : > { %v1893_v25 = vpop.f32.mrf.mxu1 }
 0x351   : > { %v2277_v5 = vpop.f32.mrf.mxu0 }
 0x352   : > { %v2292_v26 = vadd.f32 %v2277_v5, %v2196_v58  ;;  %v1894_v27 = vpop.f32.mrf.mxu1 }
 0x353   : > { %v8765_v29 = vpop.f32.mrf.mxu0  ;;  %v2029_v38 = vpack.c.bf16 %v1894_v27, %v1891_v23 }
 0x354   : > { %v1896_v30 = vpop.f32.mrf.mxu1 }
 0x355   : > { %v2282_v31 = vpop.f32.mrf.mxu0  ;;  %8895 = vmatmul.mubr.msk.bf16.gmra.mxu0 %vm2062_vm3, %v2026_v28 }
 0x356   : > { %v2293_v32 = vadd.f32 %v2282_v31, %v2201_v50  ;;  %v1899_v33 = vpop.f32.mrf.mxu1  ;;  %8902 = vmatprep.mubr.msk.bf16.mxu0 %vm9930_vm2, %v9929_v11 }
 0x357   : > { %v8768_v35 = vpop.f32.mrf.mxu0 }
 0x358   : > { %v1901_v36 = vpop.f32.mrf.mxu1 }
 0x359   : > { %v2285_v37 = vpop.f32.mrf.mxu0 }
 0x35a   : > { %v2294_v7 = vadd.f32 %v2285_v37, %v2204_v48  ;;  %v1902_v39 = vpop.f32.mrf.mxu1 }
 0x35b   : > { %v8769_v42 = vpop.f32.mrf.mxu0  ;;  %v2030_v15 = vpack.c.bf16 %v1902_v39, %v1899_v33 }
 0x35c   : > { %v1904_v60 = vpop.f32.mrf.mxu1 }
 0x35d   : > { %v2354_v45 = vpop.f32.mrf.mxu0  ;;  %8903 = vmatmul.mubr.msk.bf16.vlgmr.msra.gmra.mxu0 %vm2062_vm3, %v2027_v41 }
 0x35e   : > { %v2377_v46 = vadd.f32 %v2354_v45, %v2289_v14  ;;  %v10764_v47 = vpop.f32.mrf.mxu1  ;;  %8906 = vmatprep.mubr.msk.bf16.mxu0 %vm9930_vm2, %v9929_v11  ;;  %8915 = vmatpush3.bf16.msra.mxu0 %v9399_v40 }
 0x35f   : > { %v8776_v51 = vpop.f32.mrf.mxu0  ;;  %8916 = vmatprep.subr.bf16.mxu0 %v9929_v11 }
 0x360   : > { %v1909_v52 = vpop.f32.mrf.mxu1 }
 0x361   : > { %v2357_v53 = vpop.f32.mrf.mxu0 }
 0x362   : > { %v2378_v55 = vadd.f32 %v2357_v53, %v2290_v8  ;;  %v1910_v56 = vpop.f32.mrf.mxu1  ;;  %8917 = vmatpush3.bf16.msra.mxu0 %v9400_v49  ;;  %v9401_v8 = vld [vmem:[%s12078_s4 + $0xe8] sm:$0xff]  }
 0x363   : > { %v8777_v58 = vpop.f32.mrf.mxu0  ;;  %8946 = vmatprep.subr.bf16.mxu0 %v9929_v11 }
 0x364   : > { %v1912_v54 = vpop.f32.mrf.mxu1 }
 0x365   : > { %v2362_v59 = vpop.f32.mrf.mxu0  ;;  %8907 = vmatmul.mubr.msk.bf16.gmra.mxu0 %vm2062_vm3, %v2028_v57 }
 0x366   : > { %v2379_v61 = vadd.f32 %v2362_v59, %v2291_v22  ;;  %v10774_v62 = vpop.f32.mrf.mxu1  ;;  %8910 = vmatprep.mubr.msk.bf16.mxu0 %vm9930_vm2, %v9929_v11  ;;  %v9402_v22 = vld [vmem:[%s12078_s4 + $0xe0] sm:$0xff]  }
 0x367   : > { %v8780_v44 = vpop.f32.mrf.mxu0 }
 0x368   : > { %v1917_v50 = vpop.f32.mrf.mxu1 }
 0x369   : > { %v2365_v63 = vpop.f32.mrf.mxu0 }
 0x36a   : > { %v2380_v0 = vadd.f32 %v2365_v63, %v2292_v26  ;;  %v1918_v34 = vpop.f32.mrf.mxu1  ;;  %v2031_v26 = vpack.c.bf16 %v1910_v56, %v10764_v47 }
 0x36b   : > { %v8781_v48 = vpop.f32.mrf.mxu0  ;;  %v2032_v39 = vpack.c.bf16 %v1918_v34, %v10774_v62 }
 0x36c   : > { %v1920_v1 = vpop.f32.mrf.mxu1 }
 0x36d   : > { %v2370_v2 = vpop.f32.mrf.mxu0  ;;  %8911 = vmatmul.mubr.msk.bf16.gmra.mxu0 %vm2062_vm3, %v2029_v38 }
 0x36e   : > { %v2381_v3 = vadd.f32 %v2370_v2, %v2293_v32  ;;  %v1923_v4 = vpop.f32.mrf.mxu1  ;;  %8918 = vmatprep.mubr.msk.bf16.mxu0 %vm9930_vm2, %v9929_v11 }
 0x36f   : > { %v8784_v13 = vpop.f32.mrf.mxu0 }
 0x370   : > { %v1925_v12 = vpop.f32.mrf.mxu1 }
 0x371   : > { %v2373_v14 = vpop.f32.mrf.mxu0 }
 0x372   : > { %v2382_v9 = vadd.f32 %v2373_v14, %v2294_v7  ;;  %v1926_v10 = vpop.f32.mrf.mxu1 }
 0x373   : > { %v2033_v16 = vpack.c.bf16 %v1926_v10, %v1923_v4  ;;  %v8785_v6 = vpop.f32.mrf.mxu0 }
 0x374   : > { %v1928_v17 = vpop.f32.mrf.mxu1 }
 0x375   : > { %v2442_v18 = vpop.f32.mrf.mxu0  ;;  %8919 = vmatmul.mubr.msk.bf16.vlgmr.msra.gmra.mxu0 %vm2062_vm3, %v2030_v15  ;;  %8935 = vmatmul.mubr.msk.bf16.vlgmr.msra.gmra.mxu1 %vm2062_vm3, %v2033_v16 }
 0x376   : > { %v2465_v19 = vadd.f32 %v2442_v18, %v2377_v46  ;;  %v1931_v20 = vpop.f32.mrf.mxu1  ;;  %8922 = vmatprep.mubr.msk.bf16.mxu0 %vm9930_vm2, %v9929_v11  ;;  %8938 = vmatprep.mubr.msk.bf16.mxu1 %vm9930_vm2, %v9929_v11  ;;  %v9404_v18 = vld [vmem:[%s12078_s4 + $0xf0] sm:$0xff]  }
 0x377   : > { %v8792_v21 = vpop.f32.mrf.mxu0  ;;  %8947 = vmatpush3.bf16.msra.mxu0 %v9401_v8  ;;  %9130 = vmatpush3.bf16.msra.mxu1 %v9401_v8 }
 0x378   : > { %v1933_v23 = vpop.f32.mrf.mxu1  ;;  %8948 = vmatprep.subr.bf16.mxu0 %v9929_v11  ;;  %9129 = vmatprep.subr.bf16.mxu1 %v9929_v11 }
 0x379   : > { %v2445_v24 = vpop.f32.mrf.mxu0 }
 0x37a   : > { %v2466_v25 = vadd.f32 %v2445_v24, %v2378_v55  ;;  %v1934_v5 = vpop.f32.mrf.mxu1 }
 0x37b   : > { %v2034_v27 = vpack.c.bf16 %v1934_v5, %v1931_v20  ;;  %v8793_v28 = vpop.f32.mrf.mxu0  ;;  %8949 = vmatpush3.bf16.msra.mxu0 %v9402_v22  ;;  %9131 = vmatpush3.bf16.msra.mxu1 %v9402_v22 }
 0x37c   : > { %v1936_v29 = vpop.f32.mrf.mxu1  ;;  %8962 = vmatprep.subr.bf16.mxu1 %v9929_v11  ;;  %8978 = vmatprep.subr.bf16.mxu0 %v9929_v11 }
 0x37d   : > { %v2450_v30 = vpop.f32.mrf.mxu0  ;;  %8923 = vmatmul.mubr.msk.bf16.gmra.mxu0 %vm2062_vm3, %v2031_v26  ;;  %8939 = vmatmul.mubr.msk.bf16.gmra.mxu1 %vm2062_vm3, %v2034_v27 }
 0x37e   : > { %v2467_v31 = vadd.f32 %v2450_v30, %v2379_v61  ;;  %v1939_v32 = vpop.f32.mrf.mxu1  ;;  %8926 = vmatprep.mubr.msk.bf16.mxu0 %vm9930_vm2, %v9929_v11  ;;  %8942 = vmatprep.mubr.msk.bf16.mxu1 %vm9930_vm2, %v9929_v11 }
 0x37f   : > { %v8796_v33 = vpop.f32.mrf.mxu0 }
 0x380   : > { %v1941_v35 = vpop.f32.mrf.mxu1 }
 0x381   : > { %v2453_v36 = vpop.f32.mrf.mxu0 }
 0x382   : > { %v2468_v37 = vadd.f32 %v2453_v36, %v2380_v0  ;;  %v1942_v7 = vpop.f32.mrf.mxu1 }
 0x383   : > { %v2035_v40 = vpack.c.bf16 %v1942_v7, %v1939_v32  ;;  %v8797_v41 = vpop.f32.mrf.mxu0 }
 0x384   : > { %v1944_v42 = vpop.f32.mrf.mxu1 }
 0x385   : > { %v2458_v60 = vpop.f32.mrf.mxu0  ;;  %8927 = vmatmul.mubr.msk.bf16.gmra.mxu0 %vm2062_vm3, %v2032_v39  ;;  %8943 = vmatmul.mubr.msk.bf16.gmra.mxu1 %vm2062_vm3, %v2035_v40 }
 0x386   : > { %v2469_v45 = vadd.f32 %v2458_v60, %v2381_v3  ;;  %v1947_v46 = vpop.f32.mrf.mxu1  ;;  %8950 = vmatprep.mubr.msk.bf16.mxu0 %vm9930_vm2, %v9929_v11  ;;  %8958 = vmatprep.mubr.msk.bf16.mxu1 %vm9930_vm2, %v9929_v11 }
 0x387   : > { %v8800_v47 = vpop.f32.mrf.mxu0 }
 0x388   : > { %v1949_v49 = vpop.f32.mrf.mxu1 }
 0x389   : > { %v2461_v51 = vpop.f32.mrf.mxu0 }
 0x38a   : > { %v2470_v52 = vadd.f32 %v2461_v51, %v2382_v9  ;;  %v1950_v53 = vpop.f32.mrf.mxu1  ;;  %v9403_v9 = vld [vmem:[%s12078_s4 + $0xf8] sm:$0xff]  }
 0x38b   : > { %v2036_v55 = vpack.c.bf16 %v1950_v53, %v1947_v46  ;;  %v8801_v56 = vpop.f32.mrf.mxu0 }
 0x38c   : > { %v1952_v57 = vpop.f32.mrf.mxu1 }
 0x38d   : > { %v2530_v58 = vpop.f32.mrf.mxu0  ;;  %8951 = vmatmul.mubr.msk.bf16.vlgmr.msra.gmra.mxu0 %vm2062_vm3, %v2036_v55 }
 0x38e   : > { %v2553_v54 = vadd.f32 %v2530_v58, %v2465_v19  ;;  %v1955_v59 = vpop.f32.mrf.mxu1  ;;  %8954 = vmatprep.mubr.msk.bf16.mxu0 %vm9930_vm2, %v9929_v11 }
 0x38f   : > { %v8808_v61 = vpop.f32.mrf.mxu0 }
 0x390   : > { %v1957_v62 = vpop.f32.mrf.mxu1 }
 0x391   : > { %v2533_v44 = vpop.f32.mrf.mxu0 }
 0x392   : > { %v2554_v50 = vadd.f32 %v2533_v44, %v2466_v25  ;;  %v1958_v63 = vpop.f32.mrf.mxu1 }
 0x393   : > { %v2037_v0 = vpack.c.bf16 %v1958_v63, %v1955_v59  ;;  %v8809_v34 = vpop.f32.mrf.mxu0 }
 0x394   : > { %v1960_v38 = vpop.f32.mrf.mxu1 }
 0x395   : > { %v2538_v48 = vpop.f32.mrf.mxu0  ;;  %8955 = vmatmul.mubr.msk.bf16.gmra.mxu0 %vm2062_vm3, %v2037_v0 }
 0x396   : > { %v2555_v1 = vadd.f32 %v2538_v48, %v2467_v31  ;;  %v1963_v2 = vpop.f32.mrf.mxu1  ;;  %8984 = vmatprep.mubr.msk.bf16.mxu0 %vm9930_vm2, %v9929_v11 }
 0x397   : > { %v8812_v3 = vpop.f32.mrf.mxu0 }
 0x398   : > { %v1965_v4 = vpop.f32.mrf.mxu1 }
 0x399   : > { %v2541_v13 = vpop.f32.mrf.mxu0 }
 0x39a   : > { %v2556_v12 = vadd.f32 %v2541_v13, %v2468_v37  ;;  %v1966_v14 = vpop.f32.mrf.mxu1 }
 0x39b   : > { %v2038_v10 = vpack.c.bf16 %v1966_v14, %v1963_v2  ;;  %v8813_v15 = vpop.f32.mrf.mxu0 }
 0x39c   : > { %v1968_v16 = vpop.f32.mrf.mxu1 }
 0x39d   : > { %v2546_v6 = vpop.f32.mrf.mxu0  ;;  %8959 = vmatmul.mubr.msk.bf16.vlgmr.msra.gmra.mxu1 %vm2062_vm3, %v2038_v10 }
 0x39e   : > { %v2557_v8 = vadd.f32 %v2546_v6, %v2469_v45  ;;  %v1971_v17 = vpop.f32.mrf.mxu1  ;;  %8963 = vmatpush3.bf16.msra.mxu1 %v9403_v9  ;;  %8966 = vmatprep.mubr.msk.bf16.mxu1 %vm9930_vm2, %v9929_v11 }
 0x39f   : > { %v8816_v19 = vpop.f32.mrf.mxu0  ;;  %8964 = vmatprep.subr.bf16.mxu1 %v9929_v11 }
 0x3a0   : > { %v1973_v20 = vpop.f32.mrf.mxu1 }
 0x3a1   : > { %v2549_v21 = vpop.f32.mrf.mxu0 }
 0x3a2   : > { %v2558_v22 = vadd.f32 %v2549_v21, %v2470_v52  ;;  %v1974_v23 = vpop.f32.mrf.mxu1  ;;  %8965 = vmatpush3.bf16.msra.mxu1 %v9404_v18 }
 0x3a3   : > { %v2039_v24 = vpack.c.bf16 %v1974_v23, %v1971_v17  ;;  %v8817_v25 = vpop.f32.mrf.mxu0  ;;  %9020 = vmatprep.subr.bf16.mxu1 %v9929_v11 }
 0x3a4   : > { %v1976_v5 = vpop.f32.mrf.mxu1 }
 0x3a5   : > { %v2618_v26 = vpop.f32.mrf.mxu0  ;;  %8967 = vmatmul.mubr.msk.bf16.vlgmr.msra.gmra.mxu1 %vm2062_vm3, %v2039_v24 }
 0x3a6   : > { %v2641_v27 = vadd.f32 %v2618_v26, %v2553_v54  ;;  %v1979_v28 = vpop.f32.mrf.mxu1  ;;  %8970 = vmatprep.mubr.msk.bf16.mxu1 %vm9930_vm2, %v9929_v11 }
 0x3a7   : > { %v8824_v29 = vpop.f32.mrf.mxu0 }
 0x3a8   : > { %v1981_v30 = vpop.f32.mrf.mxu1 }
 0x3a9   : > { %v2621_v31 = vpop.f32.mrf.mxu0 }
 0x3aa   : > { %v2642_v32 = vadd.f32 %v2621_v31, %v2554_v50  ;;  %v1982_v33 = vpop.f32.mrf.mxu1 }
 0x3ab   : > { %v2040_v35 = vpack.c.bf16 %v1982_v33, %v1979_v28  ;;  %v8825_v36 = vpop.f32.mrf.mxu0 }
 0x3ac   : > { %v1984_v37 = vpop.f32.mrf.mxu1 }
 0x3ad   : > { %v2626_v7 = vpop.f32.mrf.mxu0  ;;  %8971 = vmatmul.mubr.msk.bf16.gmra.mxu1 %vm2062_vm3, %v2040_v35 }
 0x3ae   : > { %v2643_v39 = vadd.f32 %v2626_v7, %v2555_v1  ;;  %v1987_v40 = vpop.f32.mrf.mxu1  ;;  %8974 = vmatprep.mubr.msk.bf16.mxu1 %vm9930_vm2, %v9929_v11 }
 0x3af   : > { %v8828_v41 = vpop.f32.mrf.mxu0 }
 0x3b0   : > { %v1989_v42 = vpop.f32.mrf.mxu1 }
 0x3b1   : > { %v2629_v60 = vpop.f32.mrf.mxu0 }
 0x3b2   : > { %v2644_v45 = vadd.f32 %v2629_v60, %v2556_v12  ;;  %v1990_v46 = vpop.f32.mrf.mxu1 }
 0x3b3   : > { %v2041_v47 = vpack.c.bf16 %v1990_v46, %v1987_v40  ;;  %v8829_v49 = vpop.f32.mrf.mxu0 }
 0x3b4   : > { %v1992_v51 = vpop.f32.mrf.mxu1 }
 0x3b5   : > { %v2634_v52 = vpop.f32.mrf.mxu0  ;;  %8975 = vmatmul.mubr.msk.bf16.gmra.mxu1 %vm2062_vm3, %v2041_v47 }
 0x3b6   : > { %v2645_v53 = vadd.f32 %v2634_v52, %v2557_v8  ;;  %9028 = vmatprep.mubr.msk.bf16.mxu1 %vm9930_vm2, %v9929_v11 }
 0x3b7   : > { %v8832_v55 = vpop.f32.mrf.mxu0 }
 0x3b9   : > { %v2637_v56 = vpop.f32.mrf.mxu0 }
 0x3ba   : > { %v2646_v57 = vadd.f32 %v2637_v56, %v2558_v22 }
 0x3bb   : > { %v8833_v58 = vpop.f32.mrf.mxu0 }
 0x3bd   : > { %v2706_v54 = vpop.f32.mrf.mxu0 }
 0x3be   : > { %v2729_v59 = vadd.f32 %v2706_v54, %v2641_v27 }
 0x3bf   : > { %v8840_v61 = vpop.f32.mrf.mxu0 }
 0x3c1   : > { %v2709_v62 = vpop.f32.mrf.mxu0 }
 0x3c2   : > { %v2730_v44 = vadd.f32 %v2709_v62, %v2642_v32 }
 0x3c3   : > { %v8841_v50 = vpop.f32.mrf.mxu0 }
 0x3c5   : > { %v2714_v63 = vpop.f32.mrf.mxu0 }
 0x3c6   : > { %v2731_v0 = vadd.f32 %v2714_v63, %v2643_v39 }
 0x3c7   : > { %v8844_v34 = vpop.f32.mrf.mxu0 }
 0x3c9   : > { %v2717_v38 = vpop.f32.mrf.mxu0 }
 0x3ca   : > { %v2732_v48 = vadd.f32 %v2717_v38, %v2644_v45 }
 0x3cb   : > { %v8845_v1 = vpop.f32.mrf.mxu0 }
 0x3cd   : > { %v2722_v2 = vpop.f32.mrf.mxu0 }
 0x3ce   : > { %v2733_v3 = vadd.f32 %v2722_v2, %v2645_v53 }
 0x3cf   : > { %v8848_v4 = vpop.f32.mrf.mxu0 }
 0x3d1   : > { %v2725_v13 = vpop.f32.mrf.mxu0 }
 0x3d2   : > { %v2734_v12 = vadd.f32 %v2725_v13, %v2646_v57 }
 0x3d3   : > { %v8849_v14 = vpop.f32.mrf.mxu0 }
 0x3d5   : > { %v2794_v9 = vpop.f32.mrf.mxu0 }
 0x3d6   : > { %v2817_v10 = vadd.f32 %v2794_v9, %v2729_v59 }
 0x3d7   : > { %v8856_v15 = vpop.f32.mrf.mxu0 }
 0x3d9   : > { %v2797_v16 = vpop.f32.mrf.mxu0 }
 0x3da   : > { %v2818_v6 = vadd.f32 %v2797_v16, %v2730_v44 }
 0x3db   : > { %v8857_v8 = vpop.f32.mrf.mxu0 }
 0x3dd   : > { %v2802_v17 = vpop.f32.mrf.mxu0 }
 0x3de   : > { %v2819_v18 = vadd.f32 %v2802_v17, %v2731_v0 }
 0x3df   : > { %v8860_v19 = vpop.f32.mrf.mxu0 }
 0x3e1   : > { %v2805_v20 = vpop.f32.mrf.mxu0 }
 0x3e2   : > { %v2820_v21 = vadd.f32 %v2805_v20, %v2732_v48 }
 0x3e3   : > { %v8861_v22 = vpop.f32.mrf.mxu0 }
 0x3e5   : > { %v2810_v23 = vpop.f32.mrf.mxu0 }
 0x3e6   : > { %v2821_v24 = vadd.f32 %v2810_v23, %v2733_v3 }
 0x3e7   : > { %v8864_v25 = vpop.f32.mrf.mxu0 }
 0x3e9   : > { %v2813_v5 = vpop.f32.mrf.mxu0 }
 0x3ea   : > { %v2822_v26 = vadd.f32 %v2813_v5, %v2734_v12 }
 0x3eb   : > { %v8865_v27 = vpop.f32.mrf.mxu0 }
 0x3ed   : > { %v2882_v28 = vpop.f32.mrf.mxu0 }
 0x3ee   : > { %v2905_v29 = vadd.f32 %v2882_v28, %v2817_v10 }
 0x3ef   : > { %v8872_v30 = vpop.f32.mrf.mxu0 }
 0x3f1   : > { %v2885_v31 = vpop.f32.mrf.mxu0 }
 0x3f2   : > { %v2906_v32 = vadd.f32 %v2885_v31, %v2818_v6 }
 0x3f3   : > { %v8873_v33 = vpop.f32.mrf.mxu0 }
 0x3f5   : > { %v2890_v35 = vpop.f32.mrf.mxu0 }
 0x3f6   : > { %v2907_v36 = vadd.f32 %v2890_v35, %v2819_v18 }
 0x3f7   : > { %v8876_v37 = vpop.f32.mrf.mxu0 }
 0x3f9   : > { %v2893_v7 = vpop.f32.mrf.mxu0 }
 0x3fa   : > { %v2908_v39 = vadd.f32 %v2893_v7, %v2820_v21 }
 0x3fb   : > { %v8877_v40 = vpop.f32.mrf.mxu0 }
 0x3fd   : > { %v2898_v41 = vpop.f32.mrf.mxu0 }
 0x3fe   : > { %v2909_v42 = vadd.f32 %v2898_v41, %v2821_v24 }
 0x3ff   : > { %v8880_v60 = vpop.f32.mrf.mxu0 }
 0x401   : > { %v2901_v45 = vpop.f32.mrf.mxu0 }
 0x402   : > { %v2910_v46 = vadd.f32 %v2901_v45, %v2822_v26 }
 0x403   : > { %v8881_v47 = vpop.f32.mrf.mxu0 }
 0x405   : > { %v2970_v49 = vpop.f32.mrf.mxu0 }
 0x406   : > { %v2993_v51 = vadd.f32 %v2970_v49, %v2905_v29 }
 0x407   : > { %v8888_v52 = vpop.f32.mrf.mxu0 }
 0x409   : > { %v2973_v53 = vpop.f32.mrf.mxu0 }
 0x40a   : > { %v2994_v55 = vadd.f32 %v2973_v53, %v2906_v32  ;;  %v9414_v53 = vld [vmem:[%s12081_s7 + $0x38] sm:$0xff]  }
 0x40b   : > { %v8889_v56 = vpop.f32.mrf.mxu0  ;;  %9021 = vmatpush3.bf16.msra.mxu1 %v9414_v53  ;;  %v9406_v53 = vld [vmem:[%s12080_s6 + $0x8] sm:$0xff]  }
 0x40c   : > { %9022 = vmatprep.subr.bf16.mxu1 %v9929_v11 }
 0x40d   : > { %v2978_v57 = vpop.f32.mrf.mxu0 }
 0x40e   : > { %v2995_v58 = vadd.f32 %v2978_v57, %v2907_v36 }
 0x40f   : > { %v8892_v54 = vpop.f32.mrf.mxu0 }
 0x411   : > { %v2981_v59 = vpop.f32.mrf.mxu0 }
 0x412   : > { %v2996_v61 = vadd.f32 %v2981_v59, %v2908_v39 }
 0x413   : > { %v8893_v62 = vpop.f32.mrf.mxu0 }
 0x415   : > { %v2986_v44 = vpop.f32.mrf.mxu0 }
 0x416   : > { %v2997_v50 = vadd.f32 %v2986_v44, %v2909_v42 }
 0x417   : > { %v8896_v63 = vpop.f32.mrf.mxu0 }
 0x419   : > { %v2989_v0 = vpop.f32.mrf.mxu0 }
 0x41a   : > { %v2998_v34 = vadd.f32 %v2989_v0, %v2910_v46 }
 0x41b   : > { %v8897_v38 = vpop.f32.mrf.mxu0 }
 0x41d   : > { %v3058_v48 = vpop.f32.mrf.mxu0 }
 0x41e   : > { %v3081_v1 = vadd.f32 %v3058_v48, %v2993_v51 }
 0x41f   : > { %v8904_v2 = vpop.f32.mrf.mxu0 }
 0x421   : > { %v3061_v3 = vpop.f32.mrf.mxu0 }
 0x422   : > { %v3082_v4 = vadd.f32 %v3061_v3, %v2994_v55 }
 0x423   : > { %v8905_v13 = vpop.f32.mrf.mxu0 }
 0x425   : > { %v3066_v12 = vpop.f32.mrf.mxu0 }
 0x426   : > { %v3083_v14 = vadd.f32 %v3066_v12, %v2995_v58 }
 0x427   : > { %v8908_v9 = vpop.f32.mrf.mxu0 }
 0x429   : > { %v3069_v10 = vpop.f32.mrf.mxu0 }
 0x42a   : > { %v3084_v15 = vadd.f32 %v3069_v10, %v2996_v61 }
 0x42b   : > { %v8909_v16 = vpop.f32.mrf.mxu0 }
 0x42d   : > { %v3074_v6 = vpop.f32.mrf.mxu0 }
 0x42e   : > { %v10837_v8 = vadd.f32 %v3074_v6, %v2997_v50 }
 0x42f   : > { %v8912_v17 = vpop.f32.mrf.mxu0 }
 0x431   : > { %v3077_v18 = vpop.f32.mrf.mxu0 }
 0x432   : > { %v10839_v19 = vadd.f32 %v3077_v18, %v2998_v34 }
 0x433   : > { %v8913_v20 = vpop.f32.mrf.mxu0 }
 0x435   : > { %v3146_v21 = vpop.f32.mrf.mxu0  ;;  %v3234_v22 = vpop.f32.mrf.mxu1 }
 0x436   : > { %v3169_v23 = vadd.f32 %v3146_v21, %v3081_v1  ;;  %v8059_v1 = vld [vmem:[%s12079_s5] ss:$0 sm:$0xff] }
 0x437   : > { %v8920_v24 = vpop.f32.mrf.mxu0  ;;  %v8936_v25 = vpop.f32.mrf.mxu1 }
 0x438   : > { %v3257_v5 = vadd.f32 %v3234_v22, %v3169_v23 }
 0x439   : > { %v3149_v26 = vpop.f32.mrf.mxu0  ;;  %v3237_v27 = vpop.f32.mrf.mxu1 }
 0x43a   : > { %v3170_v28 = vadd.f32 %v3149_v26, %v3082_v4 }
 0x43b   : > { %v8921_v29 = vpop.f32.mrf.mxu0  ;;  %v8937_v30 = vpop.f32.mrf.mxu1 }
 0x43c   : > { %v3258_v31 = vadd.f32 %v3237_v27, %v3170_v28 }
 0x43d   : > { %v3154_v32 = vpop.f32.mrf.mxu0  ;;  %v3242_v33 = vpop.f32.mrf.mxu1 }
 0x43e   : > { %v3171_v38 = vadd.f32 %v3154_v32, %v3083_v14 }
 0x43f   : > { %v8924_v35 = vpop.f32.mrf.mxu0  ;;  %v8940_v36 = vpop.f32.mrf.mxu1 }
 0x440   : > { %v3259_v12 = vadd.f32 %v3242_v33, %v3171_v38 }
 0x441   : > { %v3157_v37 = vpop.f32.mrf.mxu0  ;;  %v3245_v7 = vpop.f32.mrf.mxu1 }
 0x442   : > { %v3172_v4 = vadd.f32 %v3157_v37, %v3084_v15 }
 0x443   : > { %v8925_v39 = vpop.f32.mrf.mxu0  ;;  %v8941_v40 = vpop.f32.mrf.mxu1 }
 0x444   : > { %v3260_v18 = vadd.f32 %v3245_v7, %v3172_v4 }
 0x445   : > { %v3162_v41 = vpop.f32.mrf.mxu0  ;;  %v3250_v42 = vpop.f32.mrf.mxu1 }
 0x446   : > { %v3173_v21 = vadd.f32 %v3162_v41, %v10837_v8 }
 0x447   : > { %v8928_v60 = vpop.f32.mrf.mxu0  ;;  %v8944_v45 = vpop.f32.mrf.mxu1 }
 0x448   : > { %v3261_v27 = vadd.f32 %v3250_v42, %v3173_v21 }
 0x449   : > { %v3165_v46 = vpop.f32.mrf.mxu0  ;;  %v3253_v47 = vpop.f32.mrf.mxu1 }
 0x44a   : > { %v3174_v15 = vadd.f32 %v3165_v46, %v10839_v19 }
 0x44b   : > { %v8929_v49 = vpop.f32.mrf.mxu0  ;;  %v8945_v51 = vpop.f32.mrf.mxu1 }
 0x44c   : > { %v3262_v35 = vadd.f32 %v3253_v47, %v3174_v15  ;;  %v9405_v47 = vld [vmem:[%s12080_s6] sm:$0xff]  }
 0x44d   : > { %v3322_v52 = vpop.f32.mrf.mxu0 }
 0x44e   : > { %v3345_v0 = vadd.f32 %v3322_v52, %v3257_v5  ;;  %v9415_v52 = vld [vmem:[%s12081_s7 + $0x98] sm:$0xff]  }
 0x44f   : > { %v8952_v55 = vpop.f32.mrf.mxu0 }
 0x450   : > { %v9407_v55 = vld [vmem:[%s12080_s6 + $0x10] sm:$0xff]  }
 0x451   : > { %v3325_v56 = vpop.f32.mrf.mxu0 }
 0x452   : > { %v3346_v3 = vadd.f32 %v3325_v56, %v3258_v31  ;;  %v9408_v56 = vld [vmem:[%s12080_s6 + $0x18] sm:$0xff]  }
 0x453   : > { %v8953_v57 = vpop.f32.mrf.mxu0 }
 0x454   : > { %v9409_v57 = vld [vmem:[%s12080_s6 + $0x20] sm:$0xff]  }
 0x455   : > { %v3330_v58 = vpop.f32.mrf.mxu0 }
 0x456   : > { %v3347_v6 = vadd.f32 %v3330_v58, %v3259_v12  ;;  %v9410_v58 = vld [vmem:[%s12080_s6 + $0x28] sm:$0xff]   ;;  %v9419_v12 = vld [vmem:[%s12081_s7 + $0x18] sm:$0xff]  }
 0x457   : > { %v8956_v54 = vpop.f32.mrf.mxu0 }
 0x458   : > { %v9411_v54 = vld [vmem:[%s12080_s6 + $0x30] sm:$0xff]  }
 0x459   : > { %v3333_v59 = vpop.f32.mrf.mxu0 }
 0x45a   : > { %v3348_v25 = vadd.f32 %v3333_v59, %v3260_v18  ;;  %v9412_v59 = vld [vmem:[%s12080_s6 + $0x38] sm:$0xff]   ;;  %v9422_v18 = vld [vmem:[%s12081_s7 + $0x8] sm:$0xff]  }
 0x45b   : > { %v8957_v61 = vpop.f32.mrf.mxu0 }
 0x45c   : > { %v9413_v61 = vld [vmem:[%s12080_s6 + $0x40] sm:$0xff]  }
 0x45d   : > { %v3338_v62 = vpop.f32.mrf.mxu1 }
 0x45e   : > { %v3349_v31 = vadd.f32 %v3338_v62, %v3261_v27  ;;  %v9416_v62 = vld [vmem:[%s12081_s7 + $0x30] sm:$0xff]  }
 0x45f   : > { %v8960_v44 = vpop.f32.mrf.mxu1  ;;  %9023 = vmatpush3.bf16.msra.mxu1 %v9416_v62  ;;  %v9426_v27 = vld [vmem:[%s12081_s7 + $0x50] sm:$0xff]   ;;  %v9446_v62 = vld [vmem:[%s12081_s7 + $0x108] sm:$0xff]  }
 0x460   : > { %9024 = vmatprep.subr.bf16.mxu1 %v9929_v11  ;;  %v9417_v44 = vld [vmem:[%s12081_s7 + $0x28] sm:$0xff]  }
 0x461   : > { %v3341_v50 = vpop.f32.mrf.mxu1 }
 0x462   : > { %v3350_v39 = vadd.f32 %v3341_v50, %v3262_v35  ;;  %v9418_v50 = vld [vmem:[%s12081_s7 + $0x20] sm:$0xff]  }
 0x463   : > { %v8961_v63 = vpop.f32.mrf.mxu1  ;;  %9025 = vmatpush3.bf16.msra.mxu1 %v9417_v44  ;;  %v9428_v35 = vld [vmem:[%s12081_s7 + $0x40] sm:$0xff]  }
 0x464   : > { %9026 = vmatprep.subr.bf16.mxu1 %v9929_v11  ;;  %v9420_v63 = vld [vmem:[%s12081_s7 + $0x90] sm:$0xff]  }
 0x465   : > { %v3410_v34 = vpop.f32.mrf.mxu1 }
 0x466   : > { %v3433_v48 = vadd.f32 %v3410_v34, %v3345_v0  ;;  %v9425_v0 = vld [vmem:[%s12081_s7 + $0x88] sm:$0xff]   ;;  %v9431_v34 = vld [vmem:[%s12081_s7 + $0x80] sm:$0xff]  }
 0x467   : > { %v8968_v2 = vpop.f32.mrf.mxu1  ;;  %9027 = vmatpush3.bf16.msra.mxu1 %v9418_v50  ;;  %v9437_v50 = vld [vmem:[%s12081_s7 + $0xb0] sm:$0xff]  }
 0x468   : > { %v3446_v9 = vadd.f32 %v8059_v1, %v3433_v48  ;;  %9032 = vmatprep.subr.bf16.mxu1 %v9929_v11 }
 0x469   : > { %v3413_v13 = vpop.f32.mrf.mxu1 }
 0x46a   : > { %v3434_v10 = vadd.f32 %v3413_v13, %v3346_v3  ;;  %v3452_v14 = vmax.f32 %v3446_v9, 0.0 }
 0x46b   : > { %v8969_v16 = vpop.f32.mrf.mxu1 }
 0x46c   : > { %v3447_v17 = vadd.f32 %v8059_v1, %v3434_v10  ;;  %v9421_v16 = vld [vmem:[%s12081_s7 + $0x10] sm:$0xff]  }
 0x46d   : > { %v3418_v20 = vpop.f32.mrf.mxu1 }
 0x46e   : > { %v3453_v22 = vmax.f32 %v3447_v17, 0.0  ;;  %v3435_v23 = vadd.f32 %v3418_v20, %v3347_v6 }
 0x46f   : > { %v8972_v24 = vpop.f32.mrf.mxu1 }
 0x470   : > { %v3458_v5 = vpack.c.bf16 %v3453_v22, %v3452_v14  ;;  %v3448_v28 = vadd.f32 %v8059_v1, %v3435_v23  ;;  %v9423_v14 = vld [vmem:[%s12081_s7] sm:$0xff]   ;;  %v9424_v24 = vld [vmem:[%s12081_s7 + $0x58] sm:$0xff]  }
 0x471   : > { %v3421_v26 = vpop.f32.mrf.mxu1 }
 0x472   : > { %v3436_v29 = vadd.f32 %v3421_v26, %v3348_v25  ;;  %v3454_v36 = vmax.f32 %v3448_v28, 0.0 }
 0x473   : > { %v8973_v30 = vpop.f32.mrf.mxu1 }
 0x474   : > { %v3449_v32 = vadd.f32 %v8059_v1, %v3436_v29  ;;  %v9427_v29 = vld [vmem:[%s12081_s7 + $0x48] sm:$0xff]  }
 0x475   : > { %v3426_v33 = vpop.f32.mrf.mxu1 }
 0x476   : > { %v3455_v37 = vmax.f32 %v3449_v32, 0.0  ;;  %v3437_v8 = vadd.f32 %v3426_v33, %v3349_v31  ;;  %v9434_v31 = vld [vmem:[%s12081_s7 + $0xd8] sm:$0xff]  }
 0x477   : > { %v8976_v7 = vpop.f32.mrf.mxu1 }
 0x478   : > { %v3459_v40 = vpack.c.bf16 %v3455_v37, %v3454_v36  ;;  %v3450_v60 = vadd.f32 %v8059_v1, %v3437_v8  ;;  %v9436_v37 = vld [vmem:[%s12081_s7 + $0xd0] sm:$0xff]   ;;  %v9429_v7 = vld [vmem:[%s12081_s7 + $0x78] sm:$0xff]  }
 0x479   : > { %v3429_v41 = vpop.f32.mrf.mxu1 }
 0x47a   : > { %v3438_v45 = vadd.f32 %v3429_v41, %v3350_v39  ;;  %v3456_v51 = vmax.f32 %v3450_v60, 0.0  ;;  %v9438_v41 = vld [vmem:[%s12081_s7 + $0xc8] sm:$0xff]  }
 0x47b   : > { %v8977_v49 = vpop.f32.mrf.mxu1 }
 0x47c   : > { %v3451_v42 = vadd.f32 %v8059_v1, %v3438_v45  ;;  %v9430_v45 = vld [vmem:[%s12081_s7 + $0x70] sm:$0xff]  }
 0x47e   : > { %v3457_v19 = vmax.f32 %v3451_v42, 0.0  ;;  %v9440_v42 = vld [vmem:[%s12081_s7 + $0xc0] sm:$0xff]  }
 0x480   : > { %v3460_v46 = vpack.c.bf16 %v3457_v19, %v3456_v51  ;;  %v9432_v19 = vld [vmem:[%s12081_s7 + $0x68] sm:$0xff]  }
 0x482   : > { %8979 = vmatpush3.bf16.msra.mxu0 %v3460_v46 }
 0x483   : > { %8980 = vmatprep.subr.bf16.mxu0 %v9929_v11 }
 0x486   : > { %8981 = vmatpush3.bf16.msra.mxu0 %v3459_v40 }
 0x487   : > { %8982 = vmatprep.subr.bf16.mxu0 %v9929_v11 }
 0x48a   : > { %8983 = vmatpush3.bf16.msra.mxu0 %v3458_v5 }
 0x48b   : > { %9068 = vmatprep.subr.bf16.mxu0 %v9929_v11 }
 0x48d   : > { %8985 = vmatmul.mubr.msk.bf16.vlgmr.msra.gmra.mxu0 %vm3524_vm4, %v9405_v47 }
 0x48e   : > { %8988 = vmatprep.mubr.msk.bf16.mxu0 %vm9930_vm2, %v9929_v11  ;;  %9069 = vmatpush3.bf16.msra.mxu0 %v9415_v52  ;;  %v9442_v52 = vld [vmem:[%s12081_s7 + $0x118] sm:$0xff]  }
 0x48f   : > { %9070 = vmatprep.subr.bf16.mxu0 %v9929_v11 }
 0x492   : > { %9071 = vmatpush3.bf16.msra.mxu0 %v9420_v63 }
 0x493   : > { %9072 = vmatprep.subr.bf16.mxu0 %v9929_v11 }
 0x495   : > { %8989 = vmatmul.mubr.msk.bf16.gmra.mxu0 %vm3524_vm4, %v9406_v53 }
 0x496   : > { %8992 = vmatprep.mubr.msk.bf16.mxu0 %vm9930_vm2, %v9929_v11  ;;  %9073 = vmatpush3.bf16.msra.mxu0 %v9425_v0  ;;  %v9448_v0 = vld [vmem:[%s12081_s7 + $0x100] sm:$0xff]  }
 0x497   : > { %9074 = vmatprep.subr.bf16.mxu0 %v9929_v11 }
 0x49a   : > { %9075 = vmatpush3.bf16.msra.mxu0 %v9431_v34 }
 0x49b   : > { %9092 = vmatprep.subr.bf16.mxu0 %v9929_v11 }
 0x49d   : > { %8993 = vmatmul.mubr.msk.bf16.gmra.mxu0 %vm3524_vm4, %v9407_v55  ;;  %v9433_v55 = vld [vmem:[%s12081_s7 + $0x60] sm:$0xff]  }
 0x49e   : > { %8996 = vmatprep.mubr.msk.bf16.mxu0 %vm9930_vm2, %v9929_v11 }
 0x4a5   : > { %8997 = vmatmul.mubr.msk.bf16.gmra.mxu0 %vm3524_vm4, %v9408_v56 }
 0x4a6   : > { %9000 = vmatprep.mubr.msk.bf16.mxu0 %vm9930_vm2, %v9929_v11 }
 0x4ad   : > { %9001 = vmatmul.mubr.msk.bf16.gmra.mxu0 %vm3524_vm4, %v9409_v57  ;;  %v9444_v57 = vld [vmem:[%s12081_s7 + $0x110] sm:$0xff]  }
 0x4ae   : > { %9004 = vmatprep.mubr.msk.bf16.mxu0 %vm9930_vm2, %v9929_v11 }
 0x4b5   : > { %9005 = vmatmul.mubr.msk.bf16.gmra.mxu0 %vm3524_vm4, %v9410_v58 }
 0x4b6   : > { %9008 = vmatprep.mubr.msk.bf16.mxu0 %vm9930_vm2, %v9929_v11 }
 0x4bd   : > { %9009 = vmatmul.mubr.msk.bf16.gmra.mxu0 %vm3524_vm4, %v9411_v54  ;;  %v9435_v54 = vld [vmem:[%s12081_s7 + $0xb8] sm:$0xff]  }
 0x4be   : > { %9012 = vmatprep.mubr.msk.bf16.mxu0 %vm9930_vm2, %v9929_v11 }
 0x4c5   : > { %9013 = vmatmul.mubr.msk.bf16.gmra.mxu0 %vm3524_vm4, %v9412_v59 }
 0x4c6   : > { %9016 = vmatprep.mubr.msk.bf16.mxu0 %vm9930_vm2, %v9929_v11 }
 0x4cd   : > { %9017 = vmatmul.mubr.msk.bf16.gmra.mxu0 %vm3524_vm4, %v9413_v61 }
 0x4ce   : > { %9076 = vmatprep.mubr.msk.bf16.mxu0 %vm9930_vm2, %v9929_v11 }
 0x54d   : > { %v3586_v38 = vpop.f32.mrf.mxu0 }
 0x54f   : > { %v8986_v48 = vpop.f32.mrf.mxu0 }
 0x551   : > { %v3589_v1 = vpop.f32.mrf.mxu0 }
 0x552   : > { %v3657_v5 = vpack.c.bf16 %v3589_v1, %v3586_v38  ;;  %v9439_v38 = vld [vmem:[%s12081_s7 + $0xa8] sm:$0xff]  }
 0x553   : > { %v8987_v2 = vpop.f32.mrf.mxu0 }
 0x555   : > { %v3594_v3 = vpop.f32.mrf.mxu0 }
 0x557   : > { %v8990_v4 = vpop.f32.mrf.mxu0 }
 0x558   : > { %v9443_v4 = vld [vmem:[%s12081_s7 + $0xf8] sm:$0xff]  }
 0x559   : > { %v3597_v13 = vpop.f32.mrf.mxu0 }
 0x55a   : > { %v3658_v9 = vpack.c.bf16 %v3597_v13, %v3594_v3  ;;  %v9441_v3 = vld [vmem:[%s12081_s7 + $0xa0] sm:$0xff]  }
 0x55b   : > { %v8991_v10 = vpop.f32.mrf.mxu0 }
 0x55c   : > { %9029 = vmatmul.mubr.msk.bf16.vlgmr.msra.gmra.mxu1 %vm3706_vm5, %v3658_v9  ;;  %v9447_v9 = vld [vmem:[%s12081_s7 + $0xe8] sm:$0xff]   ;;  %v9449_v10 = vld [vmem:[%s12081_s7 + $0xe0] sm:$0xff]  }
 0x55d   : > { %9033 = vmatpush3.bf16.msra.mxu1 %v9419_v12  ;;  %9040 = vmatprep.mubr.msk.bf16.mxu1 %vm9930_vm2, %v9929_v11  ;;  %v3602_v6 = vpop.f32.mrf.mxu0  ;;  %v9445_v12 = vld [vmem:[%s12081_s7 + $0xf0] sm:$0xff]  }
 0x55e   : > { %9034 = vmatprep.subr.bf16.mxu1 %v9929_v11 }
 0x55f   : > { %v8994_v17 = vpop.f32.mrf.mxu0 }
 0x560   : > { %v9455_v17 = vld [vmem:[%s12083_s9 + $0xec] ss:$16 sps:$4 sm:$0xff]  }
 0x561   : > { %9035 = vmatpush3.bf16.msra.mxu1 %v9421_v16  ;;  %v3605_v20 = vpop.f32.mrf.mxu0 }
 0x562   : > { %9036 = vmatprep.subr.bf16.mxu1 %v9929_v11  ;;  %v3659_v40 = vpack.c.bf16 %v3605_v20, %v3602_v6  ;;  %v9452_v6 = vld [vmem:[%s12083_s9 + $0xe4] ss:$16 sps:$4 sm:$0xff]  }
 0x563   : > { %v8995_v21 = vpop.f32.mrf.mxu0  ;;  %v9458_v20 = vld [vmem:[%s12083_s9 + $0xc4] ss:$16 sps:$4 sm:$0xff]  }
 0x564   : > { %v9461_v21 = vld [vmem:[%s12083_s9 + $0xcc] ss:$16 sps:$4 sm:$0xff]  }
 0x565   : > { %9037 = vmatpush3.bf16.msra.mxu1 %v9422_v18  ;;  %v10952_v22 = vpop.f32.mrf.mxu0  ;;  %v9450_v18 = vld [vmem:[%s12083_s9 + $0xe0] ss:$16 sps:$4 sm:$0xff]  }
 0x566   : > { %9038 = vmatprep.subr.bf16.mxu1 %v9929_v11 }
 0x567   : > { %v8998_v23 = vpop.f32.mrf.mxu0 }
 0x568   : > { %v9464_v23 = vld [vmem:[%s12083_s9 + $0xa4] ss:$16 sps:$4 sm:$0xff]  }
 0x569   : > { %9039 = vmatpush3.bf16.msra.mxu1 %v9423_v14  ;;  %v10958_v25 = vpop.f32.mrf.mxu0  ;;  %v9456_v14 = vld [vmem:[%s12083_s9 + $0xc0] ss:$16 sps:$4 sm:$0xff]  }
 0x56a   : > { %9044 = vmatprep.subr.bf16.mxu1 %v9929_v11  ;;  %v3660_v61 = vpack.c.bf16 %v10958_v25, %v10952_v22  ;;  %v9459_v22 = vld [vmem:[%s12083_s9 + $0xc8] ss:$16 sps:$4 sm:$0xff]   ;;  %v9462_v25 = vld [vmem:[%s12083_s9 + $0xa0] ss:$16 sps:$4 sm:$0xff]  }
 0x56b   : > { %v8999_v26 = vpop.f32.mrf.mxu0 }
 0x56c   : > { %9041 = vmatmul.mubr.msk.bf16.vlgmr.msra.gmra.mxu1 %vm3706_vm5, %v3657_v5  ;;  %v9465_v5 = vld [vmem:[%s12083_s9 + $0xa8] ss:$16 sps:$4 sm:$0xff]   ;;  %v9470_v26 = vld [vmem:[%s12083_s9 + $0x84] ss:$16 sps:$4 sm:$0xff]  }
 0x56d   : > { %9045 = vmatpush3.bf16.msra.mxu1 %v9424_v24  ;;  %9052 = vmatprep.mubr.msk.bf16.mxu1 %vm9930_vm2, %v9929_v11  ;;  %v3618_v15 = vpop.f32.mrf.mxu0  ;;  %v9467_v24 = vld [vmem:[%s12083_s9 + $0xac] ss:$16 sps:$4 sm:$0xff]  }
 0x56e   : > { %9046 = vmatprep.subr.bf16.mxu1 %v9929_v11 }
 0x56f   : > { %v9002_v28 = vpop.f32.mrf.mxu0 }
 0x570   : > { %v9471_v28 = vld [vmem:[%s12083_s9 + $0x88] ss:$16 sps:$4 sm:$0xff]  }
 0x571   : > { %9047 = vmatpush3.bf16.msra.mxu1 %v9426_v27  ;;  %v3621_v30 = vpop.f32.mrf.mxu0  ;;  %v9473_v27 = vld [vmem:[%s12083_s9 + $0x8c] ss:$16 sps:$4 sm:$0xff]  }
 0x572   : > { %9048 = vmatprep.subr.bf16.mxu1 %v9929_v11  ;;  %v3661_v32 = vpack.c.bf16 %v3621_v30, %v3618_v15  ;;  %v9468_v15 = vld [vmem:[%s12083_s9 + $0x80] ss:$16 sps:$4 sm:$0xff]   ;;  %v9479_v30 = vld [vmem:[%s12083_s9 + $0x6c] ss:$16 sps:$4 sm:$0xff]  }
 0x573   : > { %v9003_v33 = vpop.f32.mrf.mxu0 }
 0x574   : > { %9077 = vmatmul.mubr.msk.bf16.vlgmr.msra.gmra.mxu0 %vm3706_vm5, %v3661_v32 }
 0x575   : > { %9049 = vmatpush3.bf16.msra.mxu1 %v9427_v29  ;;  %v10979_v36 = vpop.f32.mrf.mxu0  ;;  %9093 = vmatpush3.bf16.msra.mxu0 %v9434_v31  ;;  %v9476_v29 = vld [vmem:[%s12083_s9 + $0x64] ss:$16 sps:$4 sm:$0xff]  }
 0x576   : > { %9050 = vmatprep.subr.bf16.mxu1 %v9929_v11  ;;  %9094 = vmatprep.subr.bf16.mxu0 %v9929_v11 }
 0x577   : > { %v9006_v8 = vpop.f32.mrf.mxu0  ;;  %9100 = vmatprep.mubr.msk.bf16.mxu0 %vm9930_vm2, %v9929_v11 }
 0x579   : > { %9051 = vmatpush3.bf16.msra.mxu1 %v9428_v35  ;;  %v10991_v39 = vpop.f32.mrf.mxu0  ;;  %9095 = vmatpush3.bf16.msra.mxu0 %v9436_v37 }
 0x57a   : > { %9056 = vmatprep.subr.bf16.mxu1 %v9929_v11  ;;  %9096 = vmatprep.subr.bf16.mxu0 %v9929_v11  ;;  %v3662_v13 = vpack.c.bf16 %v10991_v39, %v10979_v36 }
 0x57b   : > { %v9007_v60 = vpop.f32.mrf.mxu0 }
 0x57c   : > { %9053 = vmatmul.mubr.msk.bf16.vlgmr.msra.gmra.mxu1 %vm3706_vm5, %v3659_v40 }
 0x57d   : > { %9057 = vmatpush3.bf16.msra.mxu1 %v9429_v7  ;;  %9064 = vmatprep.mubr.msk.bf16.mxu1 %vm9930_vm2, %v9929_v11  ;;  %v3634_v49 = vpop.f32.mrf.mxu0 }
 0x57e   : > { %9058 = vmatprep.subr.bf16.mxu1 %v9929_v11  ;;  %9097 = vmatpush3.bf16.msra.mxu0 %v9438_v41 }
 0x57f   : > { %v9010_v51 = vpop.f32.mrf.mxu0  ;;  %9098 = vmatprep.subr.bf16.mxu0 %v9929_v11 }
 0x581   : > { %9059 = vmatpush3.bf16.msra.mxu1 %v9430_v45  ;;  %v3637_v46 = vpop.f32.mrf.mxu0 }
 0x582   : > { %9060 = vmatprep.subr.bf16.mxu1 %v9929_v11  ;;  %v3663_v47 = vpack.c.bf16 %v3637_v46, %v3634_v49  ;;  %9099 = vmatpush3.bf16.msra.mxu0 %v9440_v42 }
 0x583   : > { %v9011_v53 = vpop.f32.mrf.mxu0  ;;  %9116 = vmatprep.subr.bf16.mxu0 %v9929_v11 }
 0x585   : > { %9061 = vmatpush3.bf16.msra.mxu1 %v9432_v19  ;;  %9101 = vmatmul.mubr.msk.bf16.vlgmr.msra.gmra.mxu0 %vm3706_vm5, %v3663_v47  ;;  %v3642_v56 = vpop.f32.mrf.mxu0 }
 0x586   : > { %9062 = vmatprep.subr.bf16.mxu1 %v9929_v11  ;;  %9117 = vmatpush3.bf16.msra.mxu0 %v9442_v52 }
 0x587   : > { %v9014_v58 = vpop.f32.mrf.mxu0  ;;  %9118 = vmatprep.subr.bf16.mxu0 %v9929_v11  ;;  %9124 = vmatprep.mubr.msk.bf16.mxu0 %vm9930_vm2, %v9929_v11 }
 0x589   : > { %9063 = vmatpush3.bf16.msra.mxu1 %v9433_v55  ;;  %v3645_v59 = vpop.f32.mrf.mxu0 }
 0x58a   : > { %9080 = vmatprep.subr.bf16.mxu1 %v9929_v11  ;;  %9119 = vmatpush3.bf16.msra.mxu0 %v9444_v57  ;;  %v3664_v16 = vpack.c.bf16 %v3645_v59, %v3642_v56 }
 0x58b   : > { %v9015_v44 = vpop.f32.mrf.mxu0  ;;  %9120 = vmatprep.subr.bf16.mxu0 %v9929_v11 }
 0x58c   : > { %9065 = vmatmul.mubr.msk.bf16.vlgmr.msra.gmra.mxu1 %vm3706_vm5, %v3660_v61 }
 0x58d   : > { %9081 = vmatpush3.bf16.msra.mxu1 %v9435_v54  ;;  %9088 = vmatprep.mubr.msk.bf16.mxu1 %vm9930_vm2, %v9929_v11  ;;  %v3650_v63 = vpop.f32.mrf.mxu0 }
 0x58e   : > { %9082 = vmatprep.subr.bf16.mxu1 %v9929_v11  ;;  %9121 = vmatpush3.bf16.msra.mxu0 %v9446_v62 }
 0x58f   : > { %v9018_v34 = vpop.f32.mrf.mxu0  ;;  %9122 = vmatprep.subr.bf16.mxu0 %v9929_v11 }
 0x591   : > { %9083 = vmatpush3.bf16.msra.mxu1 %v9437_v50  ;;  %v3653_v48 = vpop.f32.mrf.mxu0 }
 0x592   : > { %9084 = vmatprep.subr.bf16.mxu1 %v9929_v11  ;;  %v3665_v1 = vpack.c.bf16 %v3653_v48, %v3650_v63  ;;  %9123 = vmatpush3.bf16.msra.mxu0 %v9448_v0 }
 0x593   : > { %v9019_v2 = vpop.f32.mrf.mxu0  ;;  %4544 = vmatprep.subr.bf16.mxu0 %v9455_v17 }
 0x595   : > { %9085 = vmatpush3.bf16.msra.mxu1 %v9439_v38  ;;  %9125 = vmatmul.mubr.msk.bf16.vlgmr.msra.gmra.mxu0 %vm3706_vm5, %v3665_v1 }
 0x596   : > { %9086 = vmatprep.subr.bf16.mxu1 %v9929_v11  ;;  %4568 = vmatprep.mubr.bf16.mxu0 %v9928_v43 }
 0x599   : > { %9087 = vmatpush3.bf16.msra.mxu1 %v9441_v3 }
 0x59a   : > { %9104 = vmatprep.subr.bf16.mxu1 %v9929_v11 }
 0x59c   : > { %9089 = vmatmul.mubr.msk.bf16.vlgmr.msra.gmra.mxu1 %vm3706_vm5, %v3662_v13 }
 0x59d   : > { %9105 = vmatpush3.bf16.msra.mxu1 %v9443_v4  ;;  %9112 = vmatprep.mubr.msk.bf16.mxu1 %vm9930_vm2, %v9929_v11 }
 0x59e   : > { %9106 = vmatprep.subr.bf16.mxu1 %v9929_v11 }
 0x5a1   : > { %9107 = vmatpush3.bf16.msra.mxu1 %v9445_v12 }
 0x5a2   : > { %9108 = vmatprep.subr.bf16.mxu1 %v9929_v11 }
 0x5a5   : > { %9109 = vmatpush3.bf16.msra.mxu1 %v9447_v9 }
 0x5a6   : > { %9110 = vmatprep.subr.bf16.mxu1 %v9929_v11  ;;  %v9453_v11 = vld [vmem:[%s12083_s9 + $0xe8] ss:$16 sps:$4 sm:$0xff]  }
 0x5a7   : > { %4545 = vmatpush1.bf16.msra.mxu0 %v9453_v11  ;;  %v8123_v11 = vld [vmem:[%s12082_s8] ss:$0 sm:$0xff] }
 0x5a8   : > { %4546 = vmatprep.subr.bf16.mxu0 %v9461_v21 }
 0x5a9   : > { %9111 = vmatpush3.bf16.msra.mxu1 %v9449_v10 }
 0x5aa   : > { %4503 = vmatprep.subr.bf16.mxu1 %v9452_v6 }
 0x5ab   : > { %4547 = vmatpush1.bf16.msra.mxu0 %v9459_v22 }
 0x5ac   : > { %9113 = vmatmul.mubr.msk.bf16.vlgmr.msra.gmra.mxu1 %vm3706_vm5, %v3664_v16  ;;  %4548 = vmatprep.subr.bf16.mxu0 %v9467_v24 }
 0x5ad   : > { %4527 = vmatprep.mubr.bf16.mxu1 %v9928_v43  ;;  %4504 = vmatpush1.bf16.msra.mxu1 %v9450_v18 }
 0x5ae   : > { %4505 = vmatprep.subr.bf16.mxu1 %v9458_v20 }
 0x5af   : > { %4549 = vmatpush1.bf16.msra.mxu0 %v9465_v5 }
 0x5b0   : > { %4550 = vmatprep.subr.bf16.mxu0 %v9473_v27  ;;  %v9474_v27 = vld [vmem:[%s12083_s9 + $0x60] ss:$16 sps:$4 sm:$0xff]  }
 0x5b1   : > { %4506 = vmatpush1.bf16.msra.mxu1 %v9456_v14 }
 0x5b2   : > { %4507 = vmatprep.subr.bf16.mxu1 %v9464_v23 }
 0x5b3   : > { %4551 = vmatpush1.bf16.msra.mxu0 %v9471_v28 }
 0x5b4   : > { %4708 = vmatprep.subr.bf16.mxu0 %v9479_v30  ;;  %v9485_v30 = vld [vmem:[%s12083_s9 + $0x4c] ss:$16 sps:$4 sm:$0xff]  }
 0x5b5   : > { %4508 = vmatpush1.bf16.msra.mxu1 %v9462_v25 }
 0x5b6   : > { %4509 = vmatprep.subr.bf16.mxu1 %v9470_v26 }
 0x5b9   : > { %4510 = vmatpush1.bf16.msra.mxu1 %v9468_v15  ;;  %v9477_v15 = vld [vmem:[%s12083_s9 + $0x68] ss:$16 sps:$4 sm:$0xff]  }
 0x5ba   : > { %4667 = vmatprep.subr.bf16.mxu1 %v9476_v29  ;;  %v9482_v29 = vld [vmem:[%s12083_s9 + $0x44] ss:$16 sps:$4 sm:$0xff]  }
 0x61c   : > { %v3744_v31 = vpop.f32.mrf.mxu1 }
 0x61e   : > { %v9030_v32 = vpop.f32.mrf.mxu1 }
 0x61f   : > { %v9483_v32 = vld [vmem:[%s12083_s9 + $0x48] ss:$16 sps:$4 sm:$0xff]  }
 0x620   : > { %v3747_v33 = vpop.f32.mrf.mxu1 }
 0x622   : > { %v9031_v35 = vpop.f32.mrf.mxu1 }
 0x623   : > { %v9491_v35 = vld [vmem:[%s12083_s9 + $0x2c] ss:$16 sps:$4 sm:$0xff]  }
 0x62c   : > { %v3812_v36 = vpop.f32.mrf.mxu1 }
 0x62d   : > { %v3813_v44 = vadd.f32 %v3812_v36, %v3744_v31  ;;  %v9480_v31 = vld [vmem:[%s12083_s9 + $0x40] ss:$16 sps:$4 sm:$0xff]  }
 0x62e   : > { %v9042_v37 = vpop.f32.mrf.mxu1  ;;  %v9486_v36 = vld [vmem:[%s12083_s9 + $0x20] ss:$16 sps:$4 sm:$0xff]  }
 0x62f   : > { %v9489_v37 = vld [vmem:[%s12083_s9 + $0x28] ss:$16 sps:$4 sm:$0xff]  }
 0x630   : > { %v3815_v8 = vpop.f32.mrf.mxu1 }
 0x631   : > { %v3816_v34 = vadd.f32 %v3815_v8, %v3747_v33  ;;  %v9488_v33 = vld [vmem:[%s12083_s9 + $0x24] ss:$16 sps:$4 sm:$0xff]  }
 0x632   : > { %v9043_v7 = vpop.f32.mrf.mxu1  ;;  %v9494_v8 = vld [vmem:[%s12083_s9 + $0x4] ss:$16 sps:$4 sm:$0xff]  }
 0x633   : > { %v9497_v7 = vld [vmem:[%s12083_s9 + $0xc] ss:$16 sps:$4 sm:$0xff]  }
 0x634   : > { %v4044_v39 = vpop.f32.mrf.mxu0 }
 0x636   : > { %v9078_v40 = vpop.f32.mrf.mxu0 }
 0x637   : > { %v9495_v40 = vld [vmem:[%s12083_s9 + $0x8] ss:$16 sps:$4 sm:$0xff]  }
 0x638   : > { %v4047_v41 = vpop.f32.mrf.mxu0 }
 0x63a   : > { %v9079_v60 = vpop.f32.mrf.mxu0 }
 0x63b   : > { %v9503_v60 = vld [vmem:[%s12083_s9 + $0x16c] ss:$16 sps:$4 sm:$0xff]  }
 0x63c   : > { %v3888_v45 = vpop.f32.mrf.mxu1 }
 0x63d   : > { %v3895_v63 = vadd.f32 %v3888_v45, %v3813_v44  ;;  %v9498_v45 = vld [vmem:[%s12083_s9 + $0x160] ss:$16 sps:$4 sm:$0xff]   ;;  %v9525_v44 = vld [vmem:[%s12083_s9 + $0x1e8] ss:$16 sps:$4 sm:$0xff]  }
 0x63e   : > { %v9054_v49 = vpop.f32.mrf.mxu1 }
 0x63f   : > { %v9501_v49 = vld [vmem:[%s12083_s9 + $0x168] ss:$16 sps:$4 sm:$0xff]  }
 0x640   : > { %v3891_v42 = vpop.f32.mrf.mxu1 }
 0x641   : > { %v3896_v1 = vadd.f32 %v3891_v42, %v3816_v34  ;;  %v9506_v42 = vld [vmem:[%s12083_s9 + $0x144] ss:$16 sps:$4 sm:$0xff]   ;;  %v9528_v34 = vld [vmem:[%s12083_s9 + $0x1c0] ss:$16 sps:$4 sm:$0xff]  }
 0x642   : > { %v9055_v51 = vpop.f32.mrf.mxu1 }
 0x643   : > { %v9509_v51 = vld [vmem:[%s12083_s9 + $0x14c] ss:$16 sps:$4 sm:$0xff]  }
 0x645   : > { %v4200_v19 = vpop.f32.mrf.mxu0 }
 0x647   : > { %v9102_v46 = vpop.f32.mrf.mxu0 }
 0x648   : > { %v9507_v46 = vld [vmem:[%s12083_s9 + $0x148] ss:$16 sps:$4 sm:$0xff]  }
 0x649   : > { %v4203_v47 = vpop.f32.mrf.mxu0 }
 0x64b   : > { %v9103_v52 = vpop.f32.mrf.mxu0 }
 0x64c   : > { %v3966_v53 = vpop.f32.mrf.mxu1  ;;  %v9515_v52 = vld [vmem:[%s12083_s9 + $0x12c] ss:$16 sps:$4 sm:$0xff]  }
 0x64d   : > { %v3973_v38 = vadd.f32 %v3966_v53, %v3895_v63  ;;  %v9510_v53 = vld [vmem:[%s12083_s9 + $0x120] ss:$16 sps:$4 sm:$0xff]   ;;  %v9530_v63 = vld [vmem:[%s12083_s9 + $0x1c4] ss:$16 sps:$4 sm:$0xff]  }
 0x64e   : > { %v9066_v55 = vpop.f32.mrf.mxu1 }
 0x64f   : > { %v4051_v3 = vadd.f32 %v4044_v39, %v3973_v38  ;;  %v9492_v39 = vld [vmem:[%s12083_s9] ss:$16 sps:$4 sm:$0xff]   ;;  %v9513_v55 = vld [vmem:[%s12083_s9 + $0x128] ss:$16 sps:$4 sm:$0xff]  }
 0x650   : > { %v3969_v56 = vpop.f32.mrf.mxu1  ;;  %v9531_v38 = vld [vmem:[%s12083_s9 + $0x1c8] ss:$16 sps:$4 sm:$0xff]  }
 0x651   : > { %v3974_v2 = vadd.f32 %v3969_v56, %v3896_v1  ;;  %v9518_v56 = vld [vmem:[%s12083_s9 + $0x104] ss:$16 sps:$4 sm:$0xff]   ;;  %v9539_v1 = vld [vmem:[%s12083_s9 + $0x1ac] ss:$16 sps:$4 sm:$0xff]  }
 0x652   : > { %v9067_v57 = vpop.f32.mrf.mxu1 }
 0x653   : > { %v4052_v13 = vadd.f32 %v4047_v41, %v3974_v2  ;;  %v9500_v41 = vld [vmem:[%s12083_s9 + $0x164] ss:$16 sps:$4 sm:$0xff]   ;;  %v9521_v57 = vld [vmem:[%s12083_s9 + $0x10c] ss:$16 sps:$4 sm:$0xff]   ;;  %v9534_v2 = vld [vmem:[%s12083_s9 + $0x1a0] ss:$16 sps:$4 sm:$0xff]  }
 0x655   : > { %v4356_v58 = vpop.f32.mrf.mxu0 }
 0x657   : > { %v9126_v54 = vpop.f32.mrf.mxu0 }
 0x658   : > { %v9519_v54 = vld [vmem:[%s12083_s9 + $0x108] ss:$16 sps:$4 sm:$0xff]  }
 0x659   : > { %v4359_v59 = vpop.f32.mrf.mxu0 }
 0x65b   : > { %v9127_v61 = vpop.f32.mrf.mxu0 }
 0x65c   : > { %v4122_v62 = vpop.f32.mrf.mxu1  ;;  %v9527_v61 = vld [vmem:[%s12083_s9 + $0x1ec] ss:$16 sps:$4 sm:$0xff]  }
 0x65d   : > { %v4129_v4 = vadd.f32 %v4122_v62, %v4051_v3  ;;  %v9522_v62 = vld [vmem:[%s12083_s9 + $0x1e0] ss:$16 sps:$4 sm:$0xff]   ;;  %v9537_v3 = vld [vmem:[%s12083_s9 + $0x1a8] ss:$16 sps:$4 sm:$0xff]  }
 0x65e   : > { %v9090_v50 = vpop.f32.mrf.mxu1 }
 0x65f   : > { %v4207_v9 = vadd.f32 %v4200_v19, %v4129_v4  ;;  %v9504_v19 = vld [vmem:[%s12083_s9 + $0x140] ss:$16 sps:$4 sm:$0xff]   ;;  %v9542_v4 = vld [vmem:[%s12083_s9 + $0x184] ss:$16 sps:$4 sm:$0xff]  }
 0x660   : > { %v4125_v0 = vpop.f32.mrf.mxu1 }
 0x661   : > { %v4130_v12 = vadd.f32 %v4125_v0, %v4052_v13  ;;  %v9533_v0 = vld [vmem:[%s12083_s9 + $0x1cc] ss:$16 sps:$4 sm:$0xff]  }
 0x662   : > { %v9091_v48 = vpop.f32.mrf.mxu1  ;;  %v9545_v13 = vld [vmem:[%s12083_s9 + $0x18c] ss:$16 sps:$4 sm:$0xff]  }
 0x663   : > { %v4208_v18 = vadd.f32 %v4203_v47, %v4130_v12  ;;  %v9512_v47 = vld [vmem:[%s12083_s9 + $0x124] ss:$16 sps:$4 sm:$0xff]   ;;  %v9540_v12 = vld [vmem:[%s12083_s9 + $0x180] ss:$16 sps:$4 sm:$0xff]  }
 0x664   : > { %v9536_v48 = vld [vmem:[%s12083_s9 + $0x1a4] ss:$16 sps:$4 sm:$0xff]  }
 0x66c   : > { %v4278_v10 = vpop.f32.mrf.mxu1 }
 0x66d   : > { %v4285_v16 = vadd.f32 %v4278_v10, %v4207_v9  ;;  %v9543_v9 = vld [vmem:[%s12083_s9 + $0x188] ss:$16 sps:$4 sm:$0xff]   ;;  %v9548_v10 = vld [vmem:[%s12083_s9 + $0x264] ss:$16 sps:$4 sm:$0xff]  }
 0x66e   : > { %v9114_v6 = vpop.f32.mrf.mxu1 }
 0x66f   : > { %v4363_v17 = vadd.f32 %v4356_v58, %v4285_v16  ;;  %v9516_v58 = vld [vmem:[%s12083_s9 + $0x100] ss:$16 sps:$4 sm:$0xff]   ;;  %v9551_v16 = vld [vmem:[%s12083_s9 + $0x26c] ss:$16 sps:$4 sm:$0xff]  }
 0x670   : > { %v4281_v20 = vpop.f32.mrf.mxu1  ;;  %v9546_v6 = vld [vmem:[%s12083_s9 + $0x260] ss:$16 sps:$4 sm:$0xff]  }
 0x671   : > { %v4286_v21 = vadd.f32 %v4281_v20, %v4208_v18  ;;  %v4372_v22 = vadd.f32 %v8123_v11, %v4363_v17  ;;  %v9549_v17 = vld [vmem:[%s12083_s9 + $0x268] ss:$16 sps:$4 sm:$0xff]   ;;  %v9557_v20 = vld [vmem:[%s12083_s9 + $0x24c] ss:$16 sps:$4 sm:$0xff]  }
 0x672   : > { %v9115_v14 = vpop.f32.mrf.mxu1 }
 0x673   : > { %v4364_v23 = vadd.f32 %v4359_v59, %v4286_v21  ;;  %v4374_v25 = vmax.f32 %v4372_v22, 0.0  ;;  %v9524_v59 = vld [vmem:[%s12083_s9 + $0x1e4] ss:$16 sps:$4 sm:$0xff]   ;;  %v9552_v21 = vld [vmem:[%s12083_s9 + $0x240] ss:$16 sps:$4 sm:$0xff]  }
 0x674   : > { %v9555_v14 = vld [vmem:[%s12083_s9 + $0x248] ss:$16 sps:$4 sm:$0xff]   ;;  %v9560_v22 = vld [vmem:[%s12083_s9 + $0x224] ss:$16 sps:$4 sm:$0xff]  }
 0x675   : > { %v4373_v24 = vadd.f32 %v8123_v11, %v4364_v23  ;;  %v9554_v11 = vld [vmem:[%s12083_s9 + $0x244] ss:$16 sps:$4 sm:$0xff]   ;;  %v9563_v23 = vld [vmem:[%s12083_s9 + $0x22c] ss:$16 sps:$4 sm:$0xff]  }
 0x677   : > { %v4375_v5 = vmax.f32 %v4373_v24, 0.0  ;;  %v9558_v24 = vld [vmem:[%s12083_s9 + $0x220] ss:$16 sps:$4 sm:$0xff]  }
 0x679   : > { %v11139_v26 = vpack.c.bf16 %v4375_v5, %v4374_v25  ;;  %v9561_v25 = vld [vmem:[%s12083_s9 + $0x228] ss:$16 sps:$4 sm:$0xff]   ;;  %v9566_v5 = vld [vmem:[%s12083_s9 + $0x204] ss:$16 sps:$4 sm:$0xff]  }
 0x67b   : > { %v11148_v28 = vshrl.u32 %v11139_v26, 16  ;;  %v4758_v50 = vrot.slane %v11139_v26, 1 }
 0x67d   : > { %8140 = vmatmul.mubr.msk.bf16.vlgmr.msra.gmra.mxu1 %vm3706_vm5, %v11148_v28  ;;  %8141 = vmatmul.mubr.msk.bf16.vlgmr.msra.gmra.mxu0 %vm3706_vm5, %v11148_v28  ;;  %v4944_v18 = vrot.slane %v11148_v28, 1 }
 0x67e   : > { %4668 = vmatpush1.bf16.msra.mxu1 %v9474_v27  ;;  %4709 = vmatpush1.bf16.msra.mxu0 %v9477_v15  ;;  %v9569_v27 = vld [vmem:[%s12083_s9 + $0x20c] ss:$16 sps:$4 sm:$0xff]   ;;  %v9564_v15 = vld [vmem:[%s12083_s9 + $0x200] ss:$16 sps:$4 sm:$0xff]  }
 0x67f   : > { %4669 = vmatprep.subr.bf16.mxu1 %v9482_v29  ;;  %4710 = vmatprep.subr.bf16.mxu0 %v9485_v30  ;;  %v9567_v29 = vld [vmem:[%s12083_s9 + $0x208] ss:$16 sps:$4 sm:$0xff]   ;;  %v9572_v30 = vld [vmem:[%s12083_s9 + $0x2e4] ss:$16 sps:$4 sm:$0xff]  }
 0x680   : > { %4691 = vmatprep.mubr.bf16.mxu1 %v9928_v43  ;;  %4732 = vmatprep.mubr.bf16.mxu0 %v9928_v43 }
 0x682   : > { %4670 = vmatpush1.bf16.msra.mxu1 %v9480_v31  ;;  %4711 = vmatpush1.bf16.msra.mxu0 %v9483_v32  ;;  %v9575_v31 = vld [vmem:[%s12083_s9 + $0x2ec] ss:$16 sps:$4 sm:$0xff]   ;;  %v9570_v32 = vld [vmem:[%s12083_s9 + $0x2e0] ss:$16 sps:$4 sm:$0xff]  }
 0x683   : > { %4671 = vmatprep.subr.bf16.mxu1 %v9488_v33  ;;  %4712 = vmatprep.subr.bf16.mxu0 %v9491_v35  ;;  %v9573_v33 = vld [vmem:[%s12083_s9 + $0x2e8] ss:$16 sps:$4 sm:$0xff]   ;;  %v5130_v35 = vrot.slane %v11139_v26, 2 }
 0x686   : > { %4672 = vmatpush1.bf16.msra.mxu1 %v9486_v36  ;;  %4713 = vmatpush1.bf16.msra.mxu0 %v9489_v37  ;;  %v9578_v36 = vld [vmem:[%s12083_s9 + $0x2c4] ss:$16 sps:$4 sm:$0xff]   ;;  %v9581_v37 = vld [vmem:[%s12083_s9 + $0x2cc] ss:$16 sps:$4 sm:$0xff]  }
 0x687   : > { %4673 = vmatprep.subr.bf16.mxu1 %v9494_v8  ;;  %4714 = vmatprep.subr.bf16.mxu0 %v9497_v7  ;;  %v9576_v8 = vld [vmem:[%s12083_s9 + $0x2c0] ss:$16 sps:$4 sm:$0xff]   ;;  %v9579_v7 = vld [vmem:[%s12083_s9 + $0x2c8] ss:$16 sps:$4 sm:$0xff]  }
 0x68a   : > { %4674 = vmatpush1.bf16.msra.mxu1 %v9492_v39  ;;  %4715 = vmatpush1.bf16.msra.mxu0 %v9495_v40  ;;  %v9584_v39 = vld [vmem:[%s12083_s9 + $0x2a4] ss:$16 sps:$4 sm:$0xff]   ;;  %v9587_v40 = vld [vmem:[%s12083_s9 + $0x2ac] ss:$16 sps:$4 sm:$0xff]  }
 0x68b   : > { %4850 = vmatprep.subr.bf16.mxu1 %v9500_v41  ;;  %4891 = vmatprep.subr.bf16.mxu0 %v9503_v60  ;;  %v9582_v41 = vld [vmem:[%s12083_s9 + $0x2a0] ss:$16 sps:$4 sm:$0xff]   ;;  %v9585_v60 = vld [vmem:[%s12083_s9 + $0x2a8] ss:$16 sps:$4 sm:$0xff]  }
 0x68d   : > { %8158 = vmatmul.mubr.msk.bf16.vlgmr.msra.gmra.mxu1 %vm3706_vm5, %v11139_v26  ;;  %8159 = vmatmul.mubr.msk.bf16.vlgmr.msra.gmra.mxu0 %vm3706_vm5, %v11139_v26 }
 0x68e   : > { %4851 = vmatpush1.bf16.msra.mxu1 %v9498_v45  ;;  %4892 = vmatpush1.bf16.msra.mxu0 %v9501_v49  ;;  %v9590_v45 = vld [vmem:[%s12083_s9 + $0x284] ss:$16 sps:$4 sm:$0xff]   ;;  %v9593_v49 = vld [vmem:[%s12083_s9 + $0x28c] ss:$16 sps:$4 sm:$0xff]  }
 0x68f   : > { %4852 = vmatprep.subr.bf16.mxu1 %v9506_v42  ;;  %4893 = vmatprep.subr.bf16.mxu0 %v9509_v51  ;;  %v9588_v42 = vld [vmem:[%s12083_s9 + $0x280] ss:$16 sps:$4 sm:$0xff]   ;;  %v9591_v51 = vld [vmem:[%s12083_s9 + $0x288] ss:$16 sps:$4 sm:$0xff]  }
 0x690   : > { %4874 = vmatprep.mubr.bf16.mxu1 %v9928_v43  ;;  %4915 = vmatprep.mubr.bf16.mxu0 %v9928_v43 }
 0x692   : > { %4853 = vmatpush1.bf16.msra.mxu1 %v9504_v19  ;;  %4894 = vmatpush1.bf16.msra.mxu0 %v9507_v46  ;;  %v9596_v19 = vld [vmem:[%s12083_s9 + $0x364] ss:$16 sps:$4 sm:$0xff]   ;;  %v9599_v46 = vld [vmem:[%s12083_s9 + $0x36c] ss:$16 sps:$4 sm:$0xff]  }
 0x693   : > { %4854 = vmatprep.subr.bf16.mxu1 %v9512_v47  ;;  %4895 = vmatprep.subr.bf16.mxu0 %v9515_v52  ;;  %v9594_v47 = vld [vmem:[%s12083_s9 + $0x360] ss:$16 sps:$4 sm:$0xff]   ;;  %v9597_v52 = vld [vmem:[%s12083_s9 + $0x368] ss:$16 sps:$4 sm:$0xff]  }
 0x696   : > { %4855 = vmatpush1.bf16.msra.mxu1 %v9510_v53  ;;  %4896 = vmatpush1.bf16.msra.mxu0 %v9513_v55  ;;  %v5316_v53 = vrot.slane %v11148_v28, 2  ;;  %v9602_v55 = vld [vmem:[%s12083_s9 + $0x344] ss:$16 sps:$4 sm:$0xff]  }
 0x697   : > { %4856 = vmatprep.subr.bf16.mxu1 %v9518_v56  ;;  %4897 = vmatprep.subr.bf16.mxu0 %v9521_v57  ;;  %v9605_v56 = vld [vmem:[%s12083_s9 + $0x34c] ss:$16 sps:$4 sm:$0xff]   ;;  %v9600_v57 = vld [vmem:[%s12083_s9 + $0x340] ss:$16 sps:$4 sm:$0xff]  }
 0x69a   : > { %4857 = vmatpush1.bf16.msra.mxu1 %v9516_v58  ;;  %4898 = vmatpush1.bf16.msra.mxu0 %v9519_v54  ;;  %v9603_v58 = vld [vmem:[%s12083_s9 + $0x348] ss:$16 sps:$4 sm:$0xff]   ;;  %v9608_v54 = vld [vmem:[%s12083_s9 + $0x324] ss:$16 sps:$4 sm:$0xff]  }
 0x69b   : > { %5036 = vmatprep.subr.bf16.mxu1 %v9524_v59  ;;  %5077 = vmatprep.subr.bf16.mxu0 %v9527_v61  ;;  %v9611_v59 = vld [vmem:[%s12083_s9 + $0x32c] ss:$16 sps:$4 sm:$0xff]   ;;  %v9606_v61 = vld [vmem:[%s12083_s9 + $0x320] ss:$16 sps:$4 sm:$0xff]  }
 0x69d   : > { %8176 = vmatmul.mubr.msk.bf16.vlgmr.msra.gmra.mxu1 %vm3706_vm5, %v4758_v50  ;;  %8177 = vmatmul.mubr.msk.bf16.vlgmr.msra.gmra.mxu0 %vm3706_vm5, %v4758_v50  ;;  %v9617_v50 = vld [vmem:[%s12083_s9 + $0x30c] ss:$16 sps:$4 sm:$0xff]  }
 0x69e   : > { %5037 = vmatpush1.bf16.msra.mxu1 %v9522_v62  ;;  %5078 = vmatpush1.bf16.msra.mxu0 %v9525_v44  ;;  %v9609_v62 = vld [vmem:[%s12083_s9 + $0x328] ss:$16 sps:$4 sm:$0xff]   ;;  %v9614_v44 = vld [vmem:[%s12083_s9 + $0x304] ss:$16 sps:$4 sm:$0xff]  }
 0x69f   : > { %5038 = vmatprep.subr.bf16.mxu1 %v9530_v63  ;;  %5079 = vmatprep.subr.bf16.mxu0 %v9533_v0  ;;  %v9612_v63 = vld [vmem:[%s12083_s9 + $0x300] ss:$16 sps:$4 sm:$0xff]   ;;  %v9615_v0 = vld [vmem:[%s12083_s9 + $0x308] ss:$16 sps:$4 sm:$0xff]  }
 0x6a0   : > { %5060 = vmatprep.mubr.bf16.mxu1 %v9928_v43  ;;  %5101 = vmatprep.mubr.bf16.mxu0 %v9928_v43 }
 0x6a2   : > { %5039 = vmatpush1.bf16.msra.mxu1 %v9528_v34  ;;  %5080 = vmatpush1.bf16.msra.mxu0 %v9531_v38  ;;  %v9620_v34 = vld [vmem:[%s12083_s9 + $0x3e4] ss:$16 sps:$4 sm:$0xff]   ;;  %v9623_v38 = vld [vmem:[%s12083_s9 + $0x3ec] ss:$16 sps:$4 sm:$0xff]  }
 0x6a3   : > { %5040 = vmatprep.subr.bf16.mxu1 %v9536_v48  ;;  %5081 = vmatprep.subr.bf16.mxu0 %v9539_v1  ;;  %v9618_v48 = vld [vmem:[%s12083_s9 + $0x3e0] ss:$16 sps:$4 sm:$0xff]   ;;  %v9621_v1 = vld [vmem:[%s12083_s9 + $0x3e8] ss:$16 sps:$4 sm:$0xff]  }
 0x6a6   : > { %5041 = vmatpush1.bf16.msra.mxu1 %v9534_v2  ;;  %5082 = vmatpush1.bf16.msra.mxu0 %v9537_v3  ;;  %v5502_v2 = vrot.slane %v11139_v26, 3  ;;  %v9626_v3 = vld [vmem:[%s12083_s9 + $0x3c4] ss:$16 sps:$4 sm:$0xff]  }
 0x6a7   : > { %5042 = vmatprep.subr.bf16.mxu1 %v9542_v4  ;;  %5083 = vmatprep.subr.bf16.mxu0 %v9545_v13  ;;  %v9629_v4 = vld [vmem:[%s12083_s9 + $0x3cc] ss:$16 sps:$4 sm:$0xff]   ;;  %v9624_v13 = vld [vmem:[%s12083_s9 + $0x3c0] ss:$16 sps:$4 sm:$0xff]  }
 0x6aa   : > { %5043 = vmatpush1.bf16.msra.mxu1 %v9540_v12  ;;  %5084 = vmatpush1.bf16.msra.mxu0 %v9543_v9  ;;  %v9627_v12 = vld [vmem:[%s12083_s9 + $0x3c8] ss:$16 sps:$4 sm:$0xff]   ;;  %v9632_v9 = vld [vmem:[%s12083_s9 + $0x3a4] ss:$16 sps:$4 sm:$0xff]  }
 0x6ab   : > { %5222 = vmatprep.subr.bf16.mxu1 %v9548_v10  ;;  %5263 = vmatprep.subr.bf16.mxu0 %v9551_v16  ;;  %v9635_v10 = vld [vmem:[%s12083_s9 + $0x3ac] ss:$16 sps:$4 sm:$0xff]   ;;  %v9630_v16 = vld [vmem:[%s12083_s9 + $0x3a0] ss:$16 sps:$4 sm:$0xff]  }
 0x6ad   : > { %8194 = vmatmul.mubr.msk.bf16.vlgmr.msra.gmra.mxu1 %vm3706_vm5, %v4944_v18  ;;  %8195 = vmatmul.mubr.msk.bf16.vlgmr.msra.gmra.mxu0 %vm3706_vm5, %v4944_v18  ;;  %v9641_v18 = vld [vmem:[%s12083_s9 + $0x38c] ss:$16 sps:$4 sm:$0xff]  }
 0x6ae   : > { %5223 = vmatpush1.bf16.msra.mxu1 %v9546_v6  ;;  %5264 = vmatpush1.bf16.msra.mxu0 %v9549_v17  ;;  %v9633_v6 = vld [vmem:[%s12083_s9 + $0x3a8] ss:$16 sps:$4 sm:$0xff]   ;;  %v9638_v17 = vld [vmem:[%s12083_s9 + $0x384] ss:$16 sps:$4 sm:$0xff]  }
 0x6af   : > { %5224 = vmatprep.subr.bf16.mxu1 %v9554_v11  ;;  %5265 = vmatprep.subr.bf16.mxu0 %v9557_v20  ;;  %v9636_v11 = vld [vmem:[%s12083_s9 + $0x380] ss:$16 sps:$4 sm:$0xff]   ;;  %v9639_v20 = vld [vmem:[%s12083_s9 + $0x388] ss:$16 sps:$4 sm:$0xff]  }
 0x6b0   : > { %5246 = vmatprep.mubr.bf16.mxu1 %v9928_v43  ;;  %5287 = vmatprep.mubr.bf16.mxu0 %v9928_v43 }
 0x6b2   : > { %5225 = vmatpush1.bf16.msra.mxu1 %v9552_v21  ;;  %5266 = vmatpush1.bf16.msra.mxu0 %v9555_v14  ;;  %v9644_v21 = vld [vmem:[%s12083_s9 + $0x464] ss:$16 sps:$4 sm:$0xff]   ;;  %v9647_v14 = vld [vmem:[%s12083_s9 + $0x46c] ss:$16 sps:$4 sm:$0xff]  }
 0x6b3   : > { %5226 = vmatprep.subr.bf16.mxu1 %v9560_v22  ;;  %5267 = vmatprep.subr.bf16.mxu0 %v9563_v23  ;;  %v9642_v22 = vld [vmem:[%s12083_s9 + $0x460] ss:$16 sps:$4 sm:$0xff]   ;;  %v9645_v23 = vld [vmem:[%s12083_s9 + $0x468] ss:$16 sps:$4 sm:$0xff]  }
 0x6b6   : > { %5227 = vmatpush1.bf16.msra.mxu1 %v9558_v24  ;;  %5268 = vmatpush1.bf16.msra.mxu0 %v9561_v25  ;;  %v5688_v24 = vrot.slane %v11148_v28, 3  ;;  %v9650_v25 = vld [vmem:[%s12083_s9 + $0x444] ss:$16 sps:$4 sm:$0xff]  }
 0x6b7   : > { %5228 = vmatprep.subr.bf16.mxu1 %v9566_v5  ;;  %5269 = vmatprep.subr.bf16.mxu0 %v9569_v27  ;;  %v9653_v5 = vld [vmem:[%s12083_s9 + $0x44c] ss:$16 sps:$4 sm:$0xff]   ;;  %v9648_v27 = vld [vmem:[%s12083_s9 + $0x440] ss:$16 sps:$4 sm:$0xff]  }
 0x6ba   : > { %5229 = vmatpush1.bf16.msra.mxu1 %v9564_v15  ;;  %5270 = vmatpush1.bf16.msra.mxu0 %v9567_v29  ;;  %v9651_v15 = vld [vmem:[%s12083_s9 + $0x448] ss:$16 sps:$4 sm:$0xff]   ;;  %v9656_v29 = vld [vmem:[%s12083_s9 + $0x424] ss:$16 sps:$4 sm:$0xff]  }
 0x6bb   : > { %5408 = vmatprep.subr.bf16.mxu1 %v9572_v30  ;;  %5449 = vmatprep.subr.bf16.mxu0 %v9575_v31  ;;  %v9659_v30 = vld [vmem:[%s12083_s9 + $0x42c] ss:$16 sps:$4 sm:$0xff]   ;;  %v9654_v31 = vld [vmem:[%s12083_s9 + $0x420] ss:$16 sps:$4 sm:$0xff]  }
 0x6bd   : > { %8212 = vmatmul.mubr.msk.bf16.vlgmr.msra.gmra.mxu1 %vm3706_vm5, %v5130_v35  ;;  %8213 = vmatmul.mubr.msk.bf16.vlgmr.msra.gmra.mxu0 %vm3706_vm5, %v5130_v35  ;;  %v9665_v35 = vld [vmem:[%s12083_s9 + $0x40c] ss:$16 sps:$4 sm:$0xff]  }
 0x6be   : > { %5409 = vmatpush1.bf16.msra.mxu1 %v9570_v32  ;;  %5450 = vmatpush1.bf16.msra.mxu0 %v9573_v33  ;;  %v9657_v32 = vld [vmem:[%s12083_s9 + $0x428] ss:$16 sps:$4 sm:$0xff]   ;;  %v9662_v33 = vld [vmem:[%s12083_s9 + $0x404] ss:$16 sps:$4 sm:$0xff]  }
 0x6bf   : > { %5410 = vmatprep.subr.bf16.mxu1 %v9578_v36  ;;  %5451 = vmatprep.subr.bf16.mxu0 %v9581_v37  ;;  %v9660_v36 = vld [vmem:[%s12083_s9 + $0x400] ss:$16 sps:$4 sm:$0xff]   ;;  %v9663_v37 = vld [vmem:[%s12083_s9 + $0x408] ss:$16 sps:$4 sm:$0xff]  }
 0x6c0   : > { %5432 = vmatprep.mubr.bf16.mxu1 %v9928_v43  ;;  %5473 = vmatprep.mubr.bf16.mxu0 %v9928_v43 }
 0x6c2   : > { %5411 = vmatpush1.bf16.msra.mxu1 %v9576_v8  ;;  %5452 = vmatpush1.bf16.msra.mxu0 %v9579_v7  ;;  %v9668_v8 = vld [vmem:[%s12083_s9 + $0x4e4] ss:$16 sps:$4 sm:$0xff]   ;;  %v9671_v7 = vld [vmem:[%s12083_s9 + $0x4ec] ss:$16 sps:$4 sm:$0xff]  }
 0x6c3   : > { %5412 = vmatprep.subr.bf16.mxu1 %v9584_v39  ;;  %5453 = vmatprep.subr.bf16.mxu0 %v9587_v40  ;;  %v9666_v39 = vld [vmem:[%s12083_s9 + $0x4e0] ss:$16 sps:$4 sm:$0xff]   ;;  %v9669_v40 = vld [vmem:[%s12083_s9 + $0x4e8] ss:$16 sps:$4 sm:$0xff]  }
 0x6c6   : > { %5413 = vmatpush1.bf16.msra.mxu1 %v9582_v41  ;;  %5454 = vmatpush1.bf16.msra.mxu0 %v9585_v60  ;;  %v5874_v41 = vrot.slane %v11139_v26, 4  ;;  %v9674_v60 = vld [vmem:[%s12083_s9 + $0x4c4] ss:$16 sps:$4 sm:$0xff]  }
 0x6c7   : > { %5414 = vmatprep.subr.bf16.mxu1 %v9590_v45  ;;  %5455 = vmatprep.subr.bf16.mxu0 %v9593_v49  ;;  %v9677_v45 = vld [vmem:[%s12083_s9 + $0x4cc] ss:$16 sps:$4 sm:$0xff]   ;;  %v9672_v49 = vld [vmem:[%s12083_s9 + $0x4c0] ss:$16 sps:$4 sm:$0xff]  }
 0x6ca   : > { %5415 = vmatpush1.bf16.msra.mxu1 %v9588_v42  ;;  %5456 = vmatpush1.bf16.msra.mxu0 %v9591_v51  ;;  %v9675_v42 = vld [vmem:[%s12083_s9 + $0x4c8] ss:$16 sps:$4 sm:$0xff]   ;;  %v9680_v51 = vld [vmem:[%s12083_s9 + $0x4a4] ss:$16 sps:$4 sm:$0xff]  }
 0x6cb   : > { %5594 = vmatprep.subr.bf16.mxu1 %v9596_v19  ;;  %5635 = vmatprep.subr.bf16.mxu0 %v9599_v46  ;;  %v9683_v19 = vld [vmem:[%s12083_s9 + $0x4ac] ss:$16 sps:$4 sm:$0xff]   ;;  %v9678_v46 = vld [vmem:[%s12083_s9 + $0x4a0] ss:$16 sps:$4 sm:$0xff]  }
 0x6cd   : > { %8230 = vmatmul.mubr.msk.bf16.vlgmr.msra.gmra.mxu1 %vm3706_vm5, %v5316_v53  ;;  %8231 = vmatmul.mubr.msk.bf16.vlgmr.msra.gmra.mxu0 %vm3706_vm5, %v5316_v53  ;;  %v9689_v53 = vld [vmem:[%s12083_s9 + $0x48c] ss:$16 sps:$4 sm:$0xff]  }
 0x6ce   : > { %5595 = vmatpush1.bf16.msra.mxu1 %v9594_v47  ;;  %5636 = vmatpush1.bf16.msra.mxu0 %v9597_v52  ;;  %v9681_v47 = vld [vmem:[%s12083_s9 + $0x4a8] ss:$16 sps:$4 sm:$0xff]   ;;  %v9686_v52 = vld [vmem:[%s12083_s9 + $0x484] ss:$16 sps:$4 sm:$0xff]  }
 0x6cf   : > { %5596 = vmatprep.subr.bf16.mxu1 %v9602_v55  ;;  %5637 = vmatprep.subr.bf16.mxu0 %v9605_v56  ;;  %v9684_v55 = vld [vmem:[%s12083_s9 + $0x480] ss:$16 sps:$4 sm:$0xff]   ;;  %v9687_v56 = vld [vmem:[%s12083_s9 + $0x488] ss:$16 sps:$4 sm:$0xff]  }
 0x6d0   : > { %5618 = vmatprep.mubr.bf16.mxu1 %v9928_v43  ;;  %5659 = vmatprep.mubr.bf16.mxu0 %v9928_v43 }
 0x6d2   : > { %5597 = vmatpush1.bf16.msra.mxu1 %v9600_v57  ;;  %5638 = vmatpush1.bf16.msra.mxu0 %v9603_v58  ;;  %v9692_v57 = vld [vmem:[%s12083_s9 + $0x564] ss:$16 sps:$4 sm:$0xff]   ;;  %v9695_v58 = vld [vmem:[%s12083_s9 + $0x56c] ss:$16 sps:$4 sm:$0xff]  }
 0x6d3   : > { %5598 = vmatprep.subr.bf16.mxu1 %v9608_v54  ;;  %5639 = vmatprep.subr.bf16.mxu0 %v9611_v59  ;;  %v9690_v54 = vld [vmem:[%s12083_s9 + $0x560] ss:$16 sps:$4 sm:$0xff]   ;;  %v9693_v59 = vld [vmem:[%s12083_s9 + $0x568] ss:$16 sps:$4 sm:$0xff]  }
 0x6d6   : > { %5599 = vmatpush1.bf16.msra.mxu1 %v9606_v61  ;;  %5640 = vmatpush1.bf16.msra.mxu0 %v9609_v62  ;;  %v6060_v61 = vrot.slane %v11148_v28, 4  ;;  %v9698_v62 = vld [vmem:[%s12083_s9 + $0x544] ss:$16 sps:$4 sm:$0xff]  }
 0x6d7   : > { %5600 = vmatprep.subr.bf16.mxu1 %v9614_v44  ;;  %5641 = vmatprep.subr.bf16.mxu0 %v9617_v50  ;;  %v9701_v44 = vld [vmem:[%s12083_s9 + $0x54c] ss:$16 sps:$4 sm:$0xff]   ;;  %v9696_v50 = vld [vmem:[%s12083_s9 + $0x540] ss:$16 sps:$4 sm:$0xff]  }
 0x6da   : > { %5601 = vmatpush1.bf16.msra.mxu1 %v9612_v63  ;;  %5642 = vmatpush1.bf16.msra.mxu0 %v9615_v0  ;;  %v9699_v63 = vld [vmem:[%s12083_s9 + $0x548] ss:$16 sps:$4 sm:$0xff]   ;;  %v9704_v0 = vld [vmem:[%s12083_s9 + $0x524] ss:$16 sps:$4 sm:$0xff]  }
 0x6db   : > { %5780 = vmatprep.subr.bf16.mxu1 %v9620_v34  ;;  %5821 = vmatprep.subr.bf16.mxu0 %v9623_v38  ;;  %v9707_v34 = vld [vmem:[%s12083_s9 + $0x52c] ss:$16 sps:$4 sm:$0xff]   ;;  %v9702_v38 = vld [vmem:[%s12083_s9 + $0x520] ss:$16 sps:$4 sm:$0xff]  }
 0x6dd   : > { %8248 = vmatmul.mubr.msk.bf16.vlgmr.msra.gmra.mxu1 %vm3706_vm5, %v5502_v2  ;;  %8249 = vmatmul.mubr.msk.bf16.vlgmr.msra.gmra.mxu0 %vm3706_vm5, %v5502_v2  ;;  %v9713_v2 = vld [vmem:[%s12083_s9 + $0x50c] ss:$16 sps:$4 sm:$0xff]  }
 0x6de   : > { %5781 = vmatpush1.bf16.msra.mxu1 %v9618_v48  ;;  %5822 = vmatpush1.bf16.msra.mxu0 %v9621_v1  ;;  %v9705_v48 = vld [vmem:[%s12083_s9 + $0x528] ss:$16 sps:$4 sm:$0xff]   ;;  %v9710_v1 = vld [vmem:[%s12083_s9 + $0x504] ss:$16 sps:$4 sm:$0xff]  }
 0x6df   : > { %5782 = vmatprep.subr.bf16.mxu1 %v9626_v3  ;;  %5823 = vmatprep.subr.bf16.mxu0 %v9629_v4  ;;  %v9708_v3 = vld [vmem:[%s12083_s9 + $0x500] ss:$16 sps:$4 sm:$0xff]   ;;  %v9711_v4 = vld [vmem:[%s12083_s9 + $0x508] ss:$16 sps:$4 sm:$0xff]  }
 0x6e0   : > { %5804 = vmatprep.mubr.bf16.mxu1 %v9928_v43  ;;  %5845 = vmatprep.mubr.bf16.mxu0 %v9928_v43 }
 0x6e2   : > { %5783 = vmatpush1.bf16.msra.mxu1 %v9624_v13  ;;  %5824 = vmatpush1.bf16.msra.mxu0 %v9627_v12  ;;  %v9716_v13 = vld [vmem:[%s12083_s9 + $0x5e4] ss:$16 sps:$4 sm:$0xff]   ;;  %v9719_v12 = vld [vmem:[%s12083_s9 + $0x5ec] ss:$16 sps:$4 sm:$0xff]  }
 0x6e3   : > { %5784 = vmatprep.subr.bf16.mxu1 %v9632_v9  ;;  %5825 = vmatprep.subr.bf16.mxu0 %v9635_v10  ;;  %v9714_v9 = vld [vmem:[%s12083_s9 + $0x5e0] ss:$16 sps:$4 sm:$0xff]   ;;  %v9717_v10 = vld [vmem:[%s12083_s9 + $0x5e8] ss:$16 sps:$4 sm:$0xff]  }
 0x6e6   : > { %5785 = vmatpush1.bf16.msra.mxu1 %v9630_v16  ;;  %5826 = vmatpush1.bf16.msra.mxu0 %v9633_v6  ;;  %v6246_v16 = vrot.slane %v11139_v26, 5  ;;  %v9722_v6 = vld [vmem:[%s12083_s9 + $0x5c4] ss:$16 sps:$4 sm:$0xff]  }
 0x6e7   : > { %5786 = vmatprep.subr.bf16.mxu1 %v9638_v17  ;;  %5827 = vmatprep.subr.bf16.mxu0 %v9641_v18  ;;  %v9725_v17 = vld [vmem:[%s12083_s9 + $0x5cc] ss:$16 sps:$4 sm:$0xff]   ;;  %v9720_v18 = vld [vmem:[%s12083_s9 + $0x5c0] ss:$16 sps:$4 sm:$0xff]  }
 0x6ea   : > { %5787 = vmatpush1.bf16.msra.mxu1 %v9636_v11  ;;  %5828 = vmatpush1.bf16.msra.mxu0 %v9639_v20  ;;  %v9723_v11 = vld [vmem:[%s12083_s9 + $0x5c8] ss:$16 sps:$4 sm:$0xff]   ;;  %v9728_v20 = vld [vmem:[%s12083_s9 + $0x5a4] ss:$16 sps:$4 sm:$0xff]  }
 0x6eb   : > { %5966 = vmatprep.subr.bf16.mxu1 %v9644_v21  ;;  %6007 = vmatprep.subr.bf16.mxu0 %v9647_v14  ;;  %v9731_v21 = vld [vmem:[%s12083_s9 + $0x5ac] ss:$16 sps:$4 sm:$0xff]   ;;  %v9726_v14 = vld [vmem:[%s12083_s9 + $0x5a0] ss:$16 sps:$4 sm:$0xff]  }
 0x6ed   : > { %8266 = vmatmul.mubr.msk.bf16.vlgmr.msra.gmra.mxu1 %vm3706_vm5, %v5688_v24  ;;  %8267 = vmatmul.mubr.msk.bf16.vlgmr.msra.gmra.mxu0 %vm3706_vm5, %v5688_v24  ;;  %v9737_v24 = vld [vmem:[%s12083_s9 + $0x58c] ss:$16 sps:$4 sm:$0xff]  }
 0x6ee   : > { %5967 = vmatpush1.bf16.msra.mxu1 %v9642_v22  ;;  %6008 = vmatpush1.bf16.msra.mxu0 %v9645_v23  ;;  %v9729_v22 = vld [vmem:[%s12083_s9 + $0x5a8] ss:$16 sps:$4 sm:$0xff]   ;;  %v9734_v23 = vld [vmem:[%s12083_s9 + $0x584] ss:$16 sps:$4 sm:$0xff]  }
 0x6ef   : > { %5968 = vmatprep.subr.bf16.mxu1 %v9650_v25  ;;  %6009 = vmatprep.subr.bf16.mxu0 %v9653_v5  ;;  %v9732_v25 = vld [vmem:[%s12083_s9 + $0x580] ss:$16 sps:$4 sm:$0xff]   ;;  %v9735_v5 = vld [vmem:[%s12083_s9 + $0x588] ss:$16 sps:$4 sm:$0xff]  }
 0x6f0   : > { %5990 = vmatprep.mubr.bf16.mxu1 %v9928_v43  ;;  %6031 = vmatprep.mubr.bf16.mxu0 %v9928_v43 }
 0x6f2   : > { %5969 = vmatpush1.bf16.msra.mxu1 %v9648_v27  ;;  %6010 = vmatpush1.bf16.msra.mxu0 %v9651_v15  ;;  %v9740_v27 = vld [vmem:[%s12083_s9 + $0x664] ss:$16 sps:$4 sm:$0xff]   ;;  %v9743_v15 = vld [vmem:[%s12083_s9 + $0x66c] ss:$16 sps:$4 sm:$0xff]  }
 0x6f3   : > { %5970 = vmatprep.subr.bf16.mxu1 %v9656_v29  ;;  %6011 = vmatprep.subr.bf16.mxu0 %v9659_v30  ;;  %v9738_v29 = vld [vmem:[%s12083_s9 + $0x660] ss:$16 sps:$4 sm:$0xff]   ;;  %v9741_v30 = vld [vmem:[%s12083_s9 + $0x668] ss:$16 sps:$4 sm:$0xff]  }
 0x6f6   : > { %5971 = vmatpush1.bf16.msra.mxu1 %v9654_v31  ;;  %6012 = vmatpush1.bf16.msra.mxu0 %v9657_v32  ;;  %v6432_v31 = vrot.slane %v11148_v28, 5  ;;  %v9746_v32 = vld [vmem:[%s12083_s9 + $0x644] ss:$16 sps:$4 sm:$0xff]  }
 0x6f7   : > { %5972 = vmatprep.subr.bf16.mxu1 %v9662_v33  ;;  %6013 = vmatprep.subr.bf16.mxu0 %v9665_v35  ;;  %v9749_v33 = vld [vmem:[%s12083_s9 + $0x64c] ss:$16 sps:$4 sm:$0xff]   ;;  %v9744_v35 = vld [vmem:[%s12083_s9 + $0x640] ss:$16 sps:$4 sm:$0xff]  }
 0x6fa   : > { %5973 = vmatpush1.bf16.msra.mxu1 %v9660_v36  ;;  %6014 = vmatpush1.bf16.msra.mxu0 %v9663_v37  ;;  %v9747_v36 = vld [vmem:[%s12083_s9 + $0x648] ss:$16 sps:$4 sm:$0xff]   ;;  %v9752_v37 = vld [vmem:[%s12083_s9 + $0x624] ss:$16 sps:$4 sm:$0xff]  }
 0x6fb   : > { %6152 = vmatprep.subr.bf16.mxu1 %v9668_v8  ;;  %6193 = vmatprep.subr.bf16.mxu0 %v9671_v7  ;;  %v9755_v8 = vld [vmem:[%s12083_s9 + $0x62c] ss:$16 sps:$4 sm:$0xff]   ;;  %v9750_v7 = vld [vmem:[%s12083_s9 + $0x620] ss:$16 sps:$4 sm:$0xff]  }
 0x6fd   : > { %8284 = vmatmul.mubr.msk.bf16.vlgmr.msra.gmra.mxu1 %vm3706_vm5, %v5874_v41  ;;  %8285 = vmatmul.mubr.msk.bf16.vlgmr.msra.gmra.mxu0 %vm3706_vm5, %v5874_v41  ;;  %v9761_v41 = vld [vmem:[%s12083_s9 + $0x60c] ss:$16 sps:$4 sm:$0xff]  }
 0x6fe   : > { %6153 = vmatpush1.bf16.msra.mxu1 %v9666_v39  ;;  %6194 = vmatpush1.bf16.msra.mxu0 %v9669_v40  ;;  %v9753_v39 = vld [vmem:[%s12083_s9 + $0x628] ss:$16 sps:$4 sm:$0xff]   ;;  %v9758_v40 = vld [vmem:[%s12083_s9 + $0x604] ss:$16 sps:$4 sm:$0xff]  }
 0x6ff   : > { %6154 = vmatprep.subr.bf16.mxu1 %v9674_v60  ;;  %6195 = vmatprep.subr.bf16.mxu0 %v9677_v45  ;;  %v9756_v60 = vld [vmem:[%s12083_s9 + $0x600] ss:$16 sps:$4 sm:$0xff]   ;;  %v9759_v45 = vld [vmem:[%s12083_s9 + $0x608] ss:$16 sps:$4 sm:$0xff]  }
 0x700   : > { %6176 = vmatprep.mubr.bf16.mxu1 %v9928_v43  ;;  %6217 = vmatprep.mubr.bf16.mxu0 %v9928_v43 }
 0x702   : > { %6155 = vmatpush1.bf16.msra.mxu1 %v9672_v49  ;;  %6196 = vmatpush1.bf16.msra.mxu0 %v9675_v42  ;;  %v9764_v49 = vld [vmem:[%s12083_s9 + $0x6e4] ss:$16 sps:$4 sm:$0xff]   ;;  %v9767_v42 = vld [vmem:[%s12083_s9 + $0x6ec] ss:$16 sps:$4 sm:$0xff]  }
 0x703   : > { %6156 = vmatprep.subr.bf16.mxu1 %v9680_v51  ;;  %6197 = vmatprep.subr.bf16.mxu0 %v9683_v19  ;;  %v9762_v51 = vld [vmem:[%s12083_s9 + $0x6e0] ss:$16 sps:$4 sm:$0xff]   ;;  %v9765_v19 = vld [vmem:[%s12083_s9 + $0x6e8] ss:$16 sps:$4 sm:$0xff]  }
 0x706   : > { %6157 = vmatpush1.bf16.msra.mxu1 %v9678_v46  ;;  %6198 = vmatpush1.bf16.msra.mxu0 %v9681_v47  ;;  %v6618_v46 = vrot.slane %v11139_v26, 6  ;;  %v9770_v47 = vld [vmem:[%s12083_s9 + $0x6c4] ss:$16 sps:$4 sm:$0xff]  }
 0x707   : > { %6158 = vmatprep.subr.bf16.mxu1 %v9686_v52  ;;  %6199 = vmatprep.subr.bf16.mxu0 %v9689_v53  ;;  %v9773_v52 = vld [vmem:[%s12083_s9 + $0x6cc] ss:$16 sps:$4 sm:$0xff]  }
 0x70a   : > { %6159 = vmatpush1.bf16.msra.mxu1 %v9684_v55  ;;  %6200 = vmatpush1.bf16.msra.mxu0 %v9687_v56  ;;  %v9768_v56 = vld [vmem:[%s12083_s9 + $0x6c0] ss:$16 sps:$4 sm:$0xff]  }
 0x70b   : > { %6338 = vmatprep.subr.bf16.mxu1 %v9692_v57  ;;  %6379 = vmatprep.subr.bf16.mxu0 %v9695_v58  ;;  %v9771_v57 = vld [vmem:[%s12083_s9 + $0x6c8] ss:$16 sps:$4 sm:$0xff]  }
 0x70d   : > { %8302 = vmatmul.mubr.msk.bf16.vlgmr.msra.gmra.mxu1 %vm3706_vm5, %v6060_v61  ;;  %8303 = vmatmul.mubr.msk.bf16.vlgmr.msra.gmra.mxu0 %vm3706_vm5, %v6060_v61  ;;  %v9779_v61 = vld [vmem:[%s12083_s9 + $0x6ac] ss:$16 sps:$4 sm:$0xff]  }
 0x70e   : > { %6339 = vmatpush1.bf16.msra.mxu1 %v9690_v54  ;;  %6380 = vmatpush1.bf16.msra.mxu0 %v9693_v59  ;;  %v9776_v59 = vld [vmem:[%s12083_s9 + $0x6a4] ss:$16 sps:$4 sm:$0xff]  }
 0x70f   : > { %6340 = vmatprep.subr.bf16.mxu1 %v9698_v62  ;;  %6381 = vmatprep.subr.bf16.mxu0 %v9701_v44 }
 0x710   : > { %6362 = vmatprep.mubr.bf16.mxu1 %v9928_v43  ;;  %6403 = vmatprep.mubr.bf16.mxu0 %v9928_v43 }
 0x712   : > { %6341 = vmatpush1.bf16.msra.mxu1 %v9696_v50  ;;  %6382 = vmatpush1.bf16.msra.mxu0 %v9699_v63  ;;  %v9774_v50 = vld [vmem:[%s12083_s9 + $0x6a0] ss:$16 sps:$4 sm:$0xff]   ;;  %v9777_v63 = vld [vmem:[%s12083_s9 + $0x6a8] ss:$16 sps:$4 sm:$0xff]  }
 0x713   : > { %6342 = vmatprep.subr.bf16.mxu1 %v9704_v0  ;;  %6383 = vmatprep.subr.bf16.mxu0 %v9707_v34 }
 0x716   : > { %6343 = vmatpush1.bf16.msra.mxu1 %v9702_v38  ;;  %6384 = vmatpush1.bf16.msra.mxu0 %v9705_v48  ;;  %v9782_v38 = vld [vmem:[%s12083_s9 + $0x684] ss:$16 sps:$4 sm:$0xff]   ;;  %v9785_v48 = vld [vmem:[%s12083_s9 + $0x68c] ss:$16 sps:$4 sm:$0xff]  }
 0x717   : > { %6344 = vmatprep.subr.bf16.mxu1 %v9710_v1  ;;  %6385 = vmatprep.subr.bf16.mxu0 %v9713_v2  ;;  %v9780_v1 = vld [vmem:[%s12083_s9 + $0x680] ss:$16 sps:$4 sm:$0xff]   ;;  %v9783_v2 = vld [vmem:[%s12083_s9 + $0x688] ss:$16 sps:$4 sm:$0xff]  }
 0x71a   : > { %6345 = vmatpush1.bf16.msra.mxu1 %v9708_v3  ;;  %6386 = vmatpush1.bf16.msra.mxu0 %v9711_v4  ;;  %v9788_v3 = vld [vmem:[%s12083_s9 + $0x764] ss:$16 sps:$4 sm:$0xff]   ;;  %v9791_v4 = vld [vmem:[%s12083_s9 + $0x76c] ss:$16 sps:$4 sm:$0xff]  }
 0x71b   : > { %6524 = vmatprep.subr.bf16.mxu1 %v9716_v13  ;;  %6565 = vmatprep.subr.bf16.mxu0 %v9719_v12  ;;  %v9786_v13 = vld [vmem:[%s12083_s9 + $0x760] ss:$16 sps:$4 sm:$0xff]   ;;  %v9789_v12 = vld [vmem:[%s12083_s9 + $0x768] ss:$16 sps:$4 sm:$0xff]  }
 0x71d   : > { %8320 = vmatmul.mubr.msk.bf16.vlgmr.msra.gmra.mxu1 %vm3706_vm5, %v6246_v16  ;;  %8321 = vmatmul.mubr.msk.bf16.vlgmr.msra.gmra.mxu0 %vm3706_vm5, %v6246_v16  ;;  %v9797_v16 = vld [vmem:[%s12083_s9 + $0x74c] ss:$16 sps:$4 sm:$0xff]  }
 0x71e   : > { %6525 = vmatpush1.bf16.msra.mxu1 %v9714_v9  ;;  %6566 = vmatpush1.bf16.msra.mxu0 %v9717_v10  ;;  %v6804_v9 = vrot.slane %v11148_v28, 6  ;;  %v9794_v10 = vld [vmem:[%s12083_s9 + $0x744] ss:$16 sps:$4 sm:$0xff]  }
 0x71f   : > { %6526 = vmatprep.subr.bf16.mxu1 %v9722_v6  ;;  %6567 = vmatprep.subr.bf16.mxu0 %v9725_v17 }
 0x720   : > { %6548 = vmatprep.mubr.bf16.mxu1 %v9928_v43  ;;  %6589 = vmatprep.mubr.bf16.mxu0 %v9928_v43 }
 0x722   : > { %6527 = vmatpush1.bf16.msra.mxu1 %v9720_v18  ;;  %6568 = vmatpush1.bf16.msra.mxu0 %v9723_v11 }
 0x723   : > { %6528 = vmatprep.subr.bf16.mxu1 %v9728_v20  ;;  %6569 = vmatprep.subr.bf16.mxu0 %v9731_v21  ;;  %v9792_v20 = vld [vmem:[%s12083_s9 + $0x740] ss:$16 sps:$4 sm:$0xff]   ;;  %v9795_v21 = vld [vmem:[%s12083_s9 + $0x748] ss:$16 sps:$4 sm:$0xff]  }
 0x726   : > { %6529 = vmatpush1.bf16.msra.mxu1 %v9726_v14  ;;  %6570 = vmatpush1.bf16.msra.mxu0 %v9729_v22 }
 0x727   : > { %6530 = vmatprep.subr.bf16.mxu1 %v9734_v23  ;;  %6571 = vmatprep.subr.bf16.mxu0 %v9737_v24  ;;  %v9800_v23 = vld [vmem:[%s12083_s9 + $0x724] ss:$16 sps:$4 sm:$0xff]   ;;  %v9803_v24 = vld [vmem:[%s12083_s9 + $0x72c] ss:$16 sps:$4 sm:$0xff]  }
 0x72a   : > { %6531 = vmatpush1.bf16.msra.mxu1 %v9732_v25  ;;  %6572 = vmatpush1.bf16.msra.mxu0 %v9735_v5 }
 0x72b   : > { %6710 = vmatprep.subr.bf16.mxu1 %v9740_v27  ;;  %6751 = vmatprep.subr.bf16.mxu0 %v9743_v15 }
 0x72d   : > { %8338 = vmatmul.mubr.msk.bf16.vlgmr.msra.gmra.mxu1 %vm3706_vm5, %v6432_v31  ;;  %8339 = vmatmul.mubr.msk.bf16.vlgmr.msra.gmra.mxu0 %vm3706_vm5, %v6432_v31 }
 0x72e   : > { %6711 = vmatpush1.bf16.msra.mxu1 %v9738_v29  ;;  %6752 = vmatpush1.bf16.msra.mxu0 %v9741_v30  ;;  %v9798_v29 = vld [vmem:[%s12083_s9 + $0x720] ss:$16 sps:$4 sm:$0xff]   ;;  %v9801_v30 = vld [vmem:[%s12083_s9 + $0x728] ss:$16 sps:$4 sm:$0xff]  }
 0x72f   : > { %6712 = vmatprep.subr.bf16.mxu1 %v9746_v32  ;;  %6753 = vmatprep.subr.bf16.mxu0 %v9749_v33  ;;  %v9806_v33 = vld [vmem:[%s12083_s9 + $0x704] ss:$16 sps:$4 sm:$0xff]  }
 0x730   : > { %6734 = vmatprep.mubr.bf16.mxu1 %v9928_v43  ;;  %6775 = vmatprep.mubr.bf16.mxu0 %v9928_v43 }
 0x732   : > { %6713 = vmatpush1.bf16.msra.mxu1 %v9744_v35  ;;  %6754 = vmatpush1.bf16.msra.mxu0 %v9747_v36  ;;  %v9809_v35 = vld [vmem:[%s12083_s9 + $0x70c] ss:$16 sps:$4 sm:$0xff]   ;;  %v9804_v36 = vld [vmem:[%s12083_s9 + $0x700] ss:$16 sps:$4 sm:$0xff]  }
 0x733   : > { %6714 = vmatprep.subr.bf16.mxu1 %v9752_v37  ;;  %6755 = vmatprep.subr.bf16.mxu0 %v9755_v8  ;;  %v9807_v37 = vld [vmem:[%s12083_s9 + $0x708] ss:$16 sps:$4 sm:$0xff]   ;;  %v9812_v8 = vld [vmem:[%s12083_s9 + $0x7e4] ss:$16 sps:$4 sm:$0xff]  }
 0x736   : > { %6715 = vmatpush1.bf16.msra.mxu1 %v9750_v7  ;;  %6756 = vmatpush1.bf16.msra.mxu0 %v9753_v39  ;;  %v9815_v7 = vld [vmem:[%s12083_s9 + $0x7ec] ss:$16 sps:$4 sm:$0xff]   ;;  %v9810_v39 = vld [vmem:[%s12083_s9 + $0x7e0] ss:$16 sps:$4 sm:$0xff]  }
 0x737   : > { %6716 = vmatprep.subr.bf16.mxu1 %v9758_v40  ;;  %6757 = vmatprep.subr.bf16.mxu0 %v9761_v41  ;;  %v9813_v40 = vld [vmem:[%s12083_s9 + $0x7e8] ss:$16 sps:$4 sm:$0xff]   ;;  %v6990_v41 = vrot.slane %v11139_v26, 7  ;;  %v9816_v26 = vld [vmem:[%s12083_s9 + $0x7c0] ss:$16 sps:$4 sm:$0xff]  }
 0x73a   : > { %6717 = vmatpush1.bf16.msra.mxu1 %v9756_v60  ;;  %6758 = vmatpush1.bf16.msra.mxu0 %v9759_v45  ;;  %v9818_v60 = vld [vmem:[%s12083_s9 + $0x7c4] ss:$16 sps:$4 sm:$0xff]   ;;  %v9821_v45 = vld [vmem:[%s12083_s9 + $0x7cc] ss:$16 sps:$4 sm:$0xff]  }
 0x73b   : > { %6896 = vmatprep.subr.bf16.mxu1 %v9764_v49  ;;  %6937 = vmatprep.subr.bf16.mxu0 %v9767_v42 }
 0x73d   : > { %8356 = vmatmul.mubr.msk.bf16.vlgmr.msra.gmra.mxu1 %vm3706_vm5, %v6618_v46  ;;  %8357 = vmatmul.mubr.msk.bf16.vlgmr.msra.gmra.mxu0 %vm3706_vm5, %v6618_v46  ;;  %v4529_v53 = vpop.f32.mrf.mxu1  ;;  %v4570_v55 = vpop.f32.mrf.mxu0  ;;  %v9819_v46 = vld [vmem:[%s12083_s9 + $0x7c8] ss:$16 sps:$4 sm:$0xff]  }
 0x73e   : > { %6897 = vmatpush1.bf16.msra.mxu1 %v9762_v51  ;;  %6938 = vmatpush1.bf16.msra.mxu0 %v9765_v19 }
 0x73f   : > { %v4531_v58 = vpop.f32.mrf.mxu1  ;;  %v4572_v54 = vpop.f32.mrf.mxu0  ;;  %6898 = vmatprep.subr.bf16.mxu1 %v9770_v47  ;;  %6939 = vmatprep.subr.bf16.mxu0 %v9773_v52 }
 0x740   : > { %6920 = vmatprep.mubr.bf16.mxu1 %v9928_v43  ;;  %6961 = vmatprep.mubr.bf16.mxu0 %v9928_v43 }
 0x741   : > { %v4533_v62 = vpop.f32.mrf.mxu1  ;;  %v4574_v44 = vpop.f32.mrf.mxu0 }
 0x742   : > { %6899 = vmatpush1.bf16.msra.mxu1 %v9768_v56  ;;  %6940 = vmatpush1.bf16.msra.mxu0 %v9771_v57 }
 0x743   : > { %v4534_v0 = vpop.f32.mrf.mxu1  ;;  %v4575_v34 = vpop.f32.mrf.mxu0  ;;  %6900 = vmatprep.subr.bf16.mxu1 %v9776_v59  ;;  %6941 = vmatprep.subr.bf16.mxu0 %v9779_v61  ;;  %v9822_v59 = vld [vmem:[%s12083_s9 + $0x7a0] ss:$16 sps:$4 sm:$0xff]   ;;  %v9825_v61 = vld [vmem:[%s12083_s9 + $0x7a8] ss:$16 sps:$4 sm:$0xff]  }
 0x744   : > { %v9831_v0 = vld [vmem:[%s12083_s9 + $0x788] ss:$16 sps:$4 sm:$0xff]   ;;  %v7176_v34 = vrot.slane %v11148_v28, 7 }
 0x746   : > { %6901 = vmatpush1.bf16.msra.mxu1 %v9774_v50  ;;  %6942 = vmatpush1.bf16.msra.mxu0 %v9777_v63  ;;  %v9833_v50 = vld [vmem:[%s12083_s9 + $0x78c] ss:$16 sps:$4 sm:$0xff]   ;;  %v9828_v63 = vld [vmem:[%s12083_s9 + $0x780] ss:$16 sps:$4 sm:$0xff]  }
 0x747   : > { %6902 = vmatprep.subr.bf16.mxu1 %v9782_v38  ;;  %6943 = vmatprep.subr.bf16.mxu0 %v9785_v48 }
 0x74a   : > { %6903 = vmatpush1.bf16.msra.mxu1 %v9780_v1  ;;  %6944 = vmatpush1.bf16.msra.mxu0 %v9783_v2 }
 0x74b   : > { %7082 = vmatprep.subr.bf16.mxu1 %v9788_v3  ;;  %7123 = vmatprep.subr.bf16.mxu0 %v9791_v4 }
 0x74d   : > { %v4693_v6 = vpop.f32.mrf.mxu1  ;;  %v4734_v17 = vpop.f32.mrf.mxu0  ;;  %8374 = vmatmul.mubr.msk.bf16.vlgmr.msra.gmra.mxu1 %vm3706_vm5, %v6804_v9  ;;  %8375 = vmatmul.mubr.msk.bf16.vlgmr.msra.gmra.mxu0 %vm3706_vm5, %v6804_v9 }
 0x74e   : > { %v4694_v18 = vadd.f32 %v4693_v6, %v4529_v53  ;;  %v4735_v11 = vadd.f32 %v4734_v17, %v4570_v55  ;;  %7083 = vmatpush1.bf16.msra.mxu1 %v9786_v13  ;;  %7124 = vmatpush1.bf16.msra.mxu0 %v9789_v12  ;;  %v9824_v53 = vld [vmem:[%s12083_s9 + $0x7a4] ss:$16 sps:$4 sm:$0xff]   ;;  %v9827_v55 = vld [vmem:[%s12083_s9 + $0x7ac] ss:$16 sps:$4 sm:$0xff]  }
 0x74f   : > { %v4695_v14 = vpop.f32.mrf.mxu1  ;;  %v4736_v22 = vpop.f32.mrf.mxu0  ;;  %7084 = vmatprep.subr.bf16.mxu1 %v9794_v10  ;;  %7125 = vmatprep.subr.bf16.mxu0 %v9797_v16 }
 0x750   : > { %v4696_v25 = vadd.f32 %v4695_v14, %v4531_v58  ;;  %v4737_v5 = vadd.f32 %v4736_v22, %v4572_v54  ;;  %7106 = vmatprep.mubr.bf16.mxu1 %v9928_v43  ;;  %7147 = vmatprep.mubr.bf16.mxu0 %v9928_v43 }
 0x751   : > { %v4697_v27 = vpop.f32.mrf.mxu1  ;;  %v4738_v15 = vpop.f32.mrf.mxu0 }
 0x752   : > { %7085 = vmatpush1.bf16.msra.mxu1 %v9792_v20  ;;  %7126 = vmatpush1.bf16.msra.mxu0 %v9795_v21 }
 0x753   : > { %v4698_v31 = vpop.f32.mrf.mxu1  ;;  %v4739_v32 = vpop.f32.mrf.mxu0  ;;  %7086 = vmatprep.subr.bf16.mxu1 %v9800_v23  ;;  %7127 = vmatprep.subr.bf16.mxu0 %v9803_v24 }
 0x756   : > { %7087 = vmatpush1.bf16.msra.mxu1 %v9798_v29  ;;  %7128 = vmatpush1.bf16.msra.mxu0 %v9801_v30 }
 0x757   : > { %7088 = vmatprep.subr.bf16.mxu1 %v9806_v33  ;;  %7129 = vmatprep.subr.bf16.mxu0 %v9809_v35 }
 0x75a   : > { %7089 = vmatpush1.bf16.msra.mxu1 %v9804_v36  ;;  %7130 = vmatpush1.bf16.msra.mxu0 %v9807_v37 }
 0x75b   : > { %7268 = vmatprep.subr.bf16.mxu1 %v9812_v8  ;;  %7309 = vmatprep.subr.bf16.mxu0 %v9815_v7 }
 0x75d   : > { %v4876_v49 = vpop.f32.mrf.mxu1  ;;  %v4917_v42 = vpop.f32.mrf.mxu0  ;;  %8392 = vmatmul.mubr.msk.bf16.vlgmr.msra.gmra.mxu1 %vm3706_vm5, %v6990_v41  ;;  %8393 = vmatmul.mubr.msk.bf16.vlgmr.msra.gmra.mxu0 %vm3706_vm5, %v6990_v41  ;;  %v9836_v41 = vld [vmem:[%s12085_s11 + $0x38] sm:$0xff]  }
 0x75e   : > { %v4924_v51 = vadd.f32 %v4876_v49, %v4694_v18  ;;  %v4926_v19 = vadd.f32 %v4917_v42, %v4735_v11  ;;  %7269 = vmatpush1.bf16.msra.mxu1 %v9810_v39  ;;  %7310 = vmatpush1.bf16.msra.mxu0 %v9813_v40  ;;  %v9834_v39 = vld [vmem:[%s12085_s11 + $0x78] sm:$0xff]  }
 0x75f   : > { %v4878_v47 = vpop.f32.mrf.mxu1  ;;  %v4919_v52 = vpop.f32.mrf.mxu0  ;;  %7270 = vmatprep.subr.bf16.mxu1 %v9818_v60  ;;  %7311 = vmatprep.subr.bf16.mxu0 %v9821_v45  ;;  %v9835_v40 = vld [vmem:[%s12085_s11 + $0xf8] sm:$0xff]  }
 0x760   : > { %v4925_v56 = vadd.f32 %v4878_v47, %v4696_v25  ;;  %v4927_v57 = vadd.f32 %v4919_v52, %v4737_v5  ;;  %7292 = vmatprep.mubr.bf16.mxu1 %v9928_v43  ;;  %7333 = vmatprep.mubr.bf16.mxu0 %v9928_v43  ;;  %v9830_v43 = vld [vmem:[%s12083_s9 + $0x784] ss:$16 sps:$4 sm:$0xff]   ;;  %v9837_v60 = vld [vmem:[%s12085_s11 + $0xb8] sm:$0xff]  }
 0x761   : > { %v4880_v58 = vpop.f32.mrf.mxu1  ;;  %v4921_v54 = vpop.f32.mrf.mxu0 }
 0x762   : > { %7271 = vmatpush1.bf16.msra.mxu1 %v9816_v26  ;;  %7312 = vmatpush1.bf16.msra.mxu0 %v9819_v46  ;;  %v9839_v26 = vld [vmem:[%s12085_s11 + $0xf0] sm:$0xff]   ;;  %v9842_v54 = vld [vmem:[%s12085_s11 + $0x68] sm:$0xff]  }
 0x763   : > { %v4881_v62 = vpop.f32.mrf.mxu1  ;;  %v4922_v44 = vpop.f32.mrf.mxu0  ;;  %7272 = vmatprep.subr.bf16.mxu1 %v9824_v53  ;;  %7313 = vmatprep.subr.bf16.mxu0 %v9827_v55  ;;  %v9840_v46 = vld [vmem:[%s12085_s11 + $0x30] sm:$0xff]  }
 0x764   : > { %v9841_v53 = vld [vmem:[%s12085_s11 + $0xb0] sm:$0xff]   ;;  %v9845_v62 = vld [vmem:[%s12085_s11 + $0xa8] sm:$0xff]  }
 0x766   : > { %7273 = vmatpush1.bf16.msra.mxu1 %v9822_v59  ;;  %7314 = vmatpush1.bf16.msra.mxu0 %v9825_v61  ;;  %v9843_v59 = vld [vmem:[%s12085_s11 + $0xe8] sm:$0xff]  }
 0x767   : > { %7274 = vmatprep.subr.bf16.mxu1 %v9830_v43  ;;  %7315 = vmatprep.subr.bf16.mxu0 %v9833_v50  ;;  %v9844_v61 = vld [vmem:[%s12085_s11 + $0x28] sm:$0xff]   ;;  %v9846_v50 = vld [vmem:[%s12085_s11 + $0x60] sm:$0xff]  }
 0x76a   : > { %7275 = vmatpush1.bf16.msra.mxu1 %v9828_v63  ;;  %7316 = vmatpush1.bf16.msra.mxu0 %v9831_v0  ;;  %v9847_v63 = vld [vmem:[%s12085_s11 + $0xe0] sm:$0xff]  }
 0x76b   : > { %8678 = vmatprep.subr.bf16.mxu1 %v9834_v39  ;;  %8700 = vmatprep.subr.bf16.mxu0 %v9835_v40  ;;  %v9848_v0 = vld [vmem:[%s12085_s11 + $0x20] sm:$0xff]  }
 0x76d   : > { %v5062_v38 = vpop.f32.mrf.mxu1  ;;  %v5103_v48 = vpop.f32.mrf.mxu0  ;;  %8410 = vmatmul.mubr.msk.bf16.vlgmr.msra.gmra.mxu1 %vm3706_vm5, %v7176_v34  ;;  %8411 = vmatmul.mubr.msk.bf16.vlgmr.msra.gmra.mxu0 %vm3706_vm5, %v7176_v34  ;;  %v9849_v34 = vld [vmem:[%s12085_s11 + $0xa0] sm:$0xff]  }
 0x76e   : > { %v5110_v1 = vadd.f32 %v5062_v38, %v4924_v51  ;;  %v5112_v2 = vadd.f32 %v5103_v48, %v4926_v19  ;;  %8679 = vmatpush3.bf16.msra.mxu1 %v9836_v41  ;;  %8701 = vmatpush3.bf16.msra.mxu0 %v9837_v60  ;;  %v9838_v19 = vld [vmem:[%s12085_s11 + $0x70] sm:$0xff]   ;;  %v9850_v38 = vld [vmem:[%s12085_s11 + $0x58] sm:$0xff]  }
 0x76f   : > { %v5064_v3 = vpop.f32.mrf.mxu1  ;;  %v5105_v4 = vpop.f32.mrf.mxu0  ;;  %8680 = vmatprep.subr.bf16.mxu1 %v9838_v19  ;;  %8702 = vmatprep.subr.bf16.mxu0 %v9839_v26  ;;  %v9851_v48 = vld [vmem:[%s12085_s11 + $0xd8] sm:$0xff]  }
 0x770   : > { %v5111_v13 = vadd.f32 %v5064_v3, %v4925_v56  ;;  %v5113_v12 = vadd.f32 %v5105_v4, %v4927_v57 }
 0x771   : > { %v5066_v9 = vpop.f32.mrf.mxu1  ;;  %v5107_v10 = vpop.f32.mrf.mxu0 }
 0x772   : > { %8681 = vmatpush3.bf16.msra.mxu1 %v9840_v46  ;;  %8703 = vmatpush3.bf16.msra.mxu0 %v9841_v53  ;;  %v9854_v9 = vld [vmem:[%s12085_s11 + $0x50] sm:$0xff]  }
 0x773   : > { %v5067_v16 = vpop.f32.mrf.mxu1  ;;  %v5108_v6 = vpop.f32.mrf.mxu0  ;;  %8682 = vmatprep.subr.bf16.mxu1 %v9842_v54  ;;  %8704 = vmatprep.subr.bf16.mxu0 %v9843_v59  ;;  %v9855_v10 = vld [vmem:[%s12085_s11 + $0xd0] sm:$0xff]  }
 0x776   : > { %8683 = vmatpush3.bf16.msra.mxu1 %v9844_v61  ;;  %8705 = vmatpush3.bf16.msra.mxu0 %v9845_v62 }
 0x777   : > { %8684 = vmatprep.subr.bf16.mxu1 %v9846_v50  ;;  %8706 = vmatprep.subr.bf16.mxu0 %v9847_v63 }
 0x77a   : > { %8685 = vmatpush3.bf16.msra.mxu1 %v9848_v0  ;;  %8707 = vmatpush3.bf16.msra.mxu0 %v9849_v34 }
 0x77b   : > { %8686 = vmatprep.subr.bf16.mxu1 %v9850_v38  ;;  %8708 = vmatprep.subr.bf16.mxu0 %v9851_v48 }
 0x77d   : > { %v5248_v17 = vpop.f32.mrf.mxu1  ;;  %v5289_v18 = vpop.f32.mrf.mxu0 }
 0x77e   : > { %v5296_v11 = vadd.f32 %v5248_v17, %v5110_v1  ;;  %v5298_v28 = vadd.f32 %v5289_v18, %v5112_v2  ;;  %v9852_v1 = vld [vmem:[%s12085_s11 + $0x18] sm:$0xff]   ;;  %v9856_v17 = vld [vmem:[%s12085_s11 + $0x10] sm:$0xff]  }
 0x77f   : > { %v5250_v20 = vpop.f32.mrf.mxu1  ;;  %v5291_v21 = vpop.f32.mrf.mxu0  ;;  %v9853_v2 = vld [vmem:[%s12085_s11 + $0x98] sm:$0xff]   ;;  %8687 = vmatpush3.bf16.msra.mxu1 %v9852_v1  ;;  %v9857_v18 = vld [vmem:[%s12085_s11 + $0x90] sm:$0xff]  }
 0x780   : > { %v5297_v14 = vadd.f32 %v5250_v20, %v5111_v13  ;;  %v5299_v22 = vadd.f32 %v5291_v21, %v5113_v12  ;;  %8709 = vmatpush3.bf16.msra.mxu0 %v9853_v2  ;;  %8688 = vmatprep.subr.bf16.mxu1 %v9854_v9 }
 0x781   : > { %v5252_v23 = vpop.f32.mrf.mxu1  ;;  %v5293_v24 = vpop.f32.mrf.mxu0  ;;  %8710 = vmatprep.subr.bf16.mxu0 %v9855_v10 }
 0x783   : > { %v5253_v25 = vpop.f32.mrf.mxu1  ;;  %v5294_v5 = vpop.f32.mrf.mxu0  ;;  %8689 = vmatpush3.bf16.msra.mxu1 %v9856_v17 }
 0x784   : > { %8711 = vmatpush3.bf16.msra.mxu0 %v9857_v18  ;;  %v9860_v25 = vld [vmem:[%s12085_s11 + $0x8] sm:$0xff]  }
 0x785   : > { %v9861_v5 = vld [vmem:[%s12085_s11 + $0x88] sm:$0xff]  }
 0x78d   : > { %v5434_v27 = vpop.f32.mrf.mxu1  ;;  %v5475_v15 = vpop.f32.mrf.mxu0 }
 0x78e   : > { %v5482_v29 = vadd.f32 %v5434_v27, %v5296_v11  ;;  %v5484_v30 = vadd.f32 %v5475_v15, %v5298_v28  ;;  %v9862_v27 = vld [vmem:[%s12085_s11 + $0x40] sm:$0xff]  }
 0x78f   : > { %v5436_v31 = vpop.f32.mrf.mxu1  ;;  %v5477_v32 = vpop.f32.mrf.mxu0  ;;  %v9863_v15 = vld [vmem:[%s12085_s11 + $0xc0] sm:$0xff]  }
 0x790   : > { %v5483_v33 = vadd.f32 %v5436_v31, %v5297_v14  ;;  %v5485_v35 = vadd.f32 %v5477_v32, %v5299_v22  ;;  %v9858_v14 = vld [vmem:[%s12085_s11 + $0x48] sm:$0xff]  }
 0x791   : > { %v5438_v36 = vpop.f32.mrf.mxu1  ;;  %v5479_v37 = vpop.f32.mrf.mxu0  ;;  %v9859_v22 = vld [vmem:[%s12085_s11 + $0xc8] sm:$0xff]   ;;  %8690 = vmatprep.subr.bf16.mxu1 %v9858_v14 }
 0x792   : > { %8712 = vmatprep.subr.bf16.mxu0 %v9859_v22  ;;  %8691 = vmatpush3.bf16.msra.mxu1 %v9860_v25 }
 0x793   : > { %v5439_v8 = vpop.f32.mrf.mxu1  ;;  %v5480_v7 = vpop.f32.mrf.mxu0  ;;  %8713 = vmatpush3.bf16.msra.mxu0 %v9861_v5  ;;  %8692 = vmatprep.subr.bf16.mxu1 %v9862_v27 }
 0x794   : > { %8714 = vmatprep.subr.bf16.mxu0 %v9863_v15 }
 0x79d   : > { %v5620_v45 = vpop.f32.mrf.mxu1  ;;  %v5661_v49 = vpop.f32.mrf.mxu0 }
 0x79e   : > { %v5668_v42 = vadd.f32 %v5620_v45, %v5482_v29  ;;  %v5670_v51 = vadd.f32 %v5661_v49, %v5484_v30  ;;  %v9864_v29 = vld [vmem:[%s12085_s11] sm:$0xff]  }
 0x79f   : > { %v5622_v47 = vpop.f32.mrf.mxu1  ;;  %v5663_v52 = vpop.f32.mrf.mxu0  ;;  %v9865_v30 = vld [vmem:[%s12085_s11 + $0x80] sm:$0xff]   ;;  %8693 = vmatpush3.bf16.msra.mxu1 %v9864_v29 }
 0x7a0   : > { %v5669_v55 = vadd.f32 %v5622_v47, %v5483_v33  ;;  %v5671_v56 = vadd.f32 %v5663_v52, %v5485_v35  ;;  %8715 = vmatpush3.bf16.msra.mxu0 %v9865_v30 }
 0x7a1   : > { %v5624_v57 = vpop.f32.mrf.mxu1  ;;  %v5665_v58 = vpop.f32.mrf.mxu0 }
 0x7a3   : > { %v5625_v44 = vpop.f32.mrf.mxu1  ;;  %v5666_v43 = vpop.f32.mrf.mxu0 }
 0x7ad   : > { %v5806_v3 = vpop.f32.mrf.mxu1  ;;  %v5847_v4 = vpop.f32.mrf.mxu0 }
 0x7ae   : > { %v5854_v13 = vadd.f32 %v5806_v3, %v5668_v42  ;;  %v5856_v12 = vadd.f32 %v5847_v4, %v5670_v51 }
 0x7af   : > { %v5808_v16 = vpop.f32.mrf.mxu1  ;;  %v5849_v6 = vpop.f32.mrf.mxu0 }
 0x7b0   : > { %v5855_v11 = vadd.f32 %v5808_v16, %v5669_v55  ;;  %v5857_v28 = vadd.f32 %v5849_v6, %v5671_v56 }
 0x7b1   : > { %v5810_v20 = vpop.f32.mrf.mxu1  ;;  %v5851_v21 = vpop.f32.mrf.mxu0 }
 0x7b3   : > { %v5811_v23 = vpop.f32.mrf.mxu1  ;;  %v5852_v24 = vpop.f32.mrf.mxu0 }
 0x7bd   : > { %v5992_v31 = vpop.f32.mrf.mxu1  ;;  %v6033_v32 = vpop.f32.mrf.mxu0 }
 0x7be   : > { %v6040_v33 = vadd.f32 %v5992_v31, %v5854_v13  ;;  %v6042_v35 = vadd.f32 %v6033_v32, %v5856_v12  ;;  %v7348_v31 = vlaneseq }
 0x7bf   : > { %v5994_v36 = vpop.f32.mrf.mxu1  ;;  %v6035_v37 = vpop.f32.mrf.mxu0 }
 0x7c0   : > { %v6041_v8 = vadd.f32 %v5994_v36, %v5855_v11  ;;  %v6043_v7 = vadd.f32 %v6035_v37, %v5857_v28  ;;  %v7349_v37 = vshrl.u32 %v7348_v31, 7 }
 0x7c1   : > { %v5996_v39 = vpop.f32.mrf.mxu1  ;;  %v6037_v40 = vpop.f32.mrf.mxu0 }
 0x7c2   : > { %v7350_v39 = vsub.s32 0, %v7349_v37  ;;  %v7358_v40 = vsub.s32 2, %v7349_v37 }
 0x7c3   : > { %v5997_v41 = vpop.f32.mrf.mxu1  ;;  %v6038_v60 = vpop.f32.mrf.mxu0 }
 0x7cd   : > { %v6178_v45 = vpop.f32.mrf.mxu1  ;;  %v6219_v49 = vpop.f32.mrf.mxu0 }
 0x7ce   : > { %v6226_v42 = vadd.f32 %v6178_v45, %v6040_v33  ;;  %v6228_v51 = vadd.f32 %v6219_v49, %v6042_v35 }
 0x7cf   : > { %v6180_v19 = vpop.f32.mrf.mxu1  ;;  %v6221_v26 = vpop.f32.mrf.mxu0 }
 0x7d0   : > { %v6227_v46 = vadd.f32 %v6180_v19, %v6041_v8  ;;  %v6229_v47 = vadd.f32 %v6221_v26, %v6043_v7  ;;  %v7362_v19 = vsub.s32 3, %v7349_v37 }
 0x7d1   : > { %v6182_v52 = vpop.f32.mrf.mxu1  ;;  %v6223_v53 = vpop.f32.mrf.mxu0 }
 0x7d3   : > { %v6183_v55 = vpop.f32.mrf.mxu1  ;;  %v6224_v56 = vpop.f32.mrf.mxu0 }
 0x7dd   : > { %v6364_v57 = vpop.f32.mrf.mxu1  ;;  %v6405_v58 = vpop.f32.mrf.mxu0 }
 0x7de   : > { %v6412_v54 = vadd.f32 %v6364_v57, %v6226_v42  ;;  %v6414_v59 = vadd.f32 %v6405_v58, %v6228_v51  ;;  %v7346_v42 = vld [vmem:[%s12084_s10] sm:$0xf]  ;;  %v7354_v51 = vsub.s32 1, %v7349_v37 }
 0x7df   : > { %v6366_v61 = vpop.f32.mrf.mxu1  ;;  %v6407_v62 = vpop.f32.mrf.mxu0  ;;  %v7351_v53 = vrot.slane %v7346_v42, %v7350_v39  ;;  %v7359_v55 = vrot.slane %v7346_v42, %v7358_v40 }
 0x7e0   : > { %v6413_v44 = vadd.f32 %v6366_v61, %v6227_v46  ;;  %v6415_v43 = vadd.f32 %v6407_v62, %v6229_v47  ;;  %v7355_v62 = vrot.slane %v7346_v42, %v7354_v51 }
 0x7e1   : > { %v6368_v50 = vpop.f32.mrf.mxu1  ;;  %v6409_v63 = vpop.f32.mrf.mxu0 }
 0x7e3   : > { %v6369_v0 = vpop.f32.mrf.mxu1  ;;  %v6410_v34 = vpop.f32.mrf.mxu0 }
 0x7ed   : > { %v6550_v38 = vpop.f32.mrf.mxu1  ;;  %v6591_v48 = vpop.f32.mrf.mxu0 }
 0x7ee   : > { %v6598_v8 = vadd.f32 %v6550_v38, %v6412_v54  ;;  %v6600_v7 = vadd.f32 %v6591_v48, %v6414_v59 }
 0x7ef   : > { %v6552_v1 = vpop.f32.mrf.mxu1  ;;  %v6593_v2 = vpop.f32.mrf.mxu0 }
 0x7f0   : > { %v6599_v41 = vadd.f32 %v6552_v1, %v6413_v44  ;;  %v6601_v60 = vadd.f32 %v6593_v2, %v6415_v43  ;;  %v7363_v44 = vrot.slane %v7346_v42, %v7362_v19 }
 0x7f1   : > { %v6554_v3 = vpop.f32.mrf.mxu1  ;;  %v6595_v4 = vpop.f32.mrf.mxu0 }
 0x7f3   : > { %v6555_v13 = vpop.f32.mrf.mxu1  ;;  %v6596_v12 = vpop.f32.mrf.mxu0 }
 0x7fd   : > { %v6736_v9 = vpop.f32.mrf.mxu1  ;;  %v6777_v10 = vpop.f32.mrf.mxu0 }
 0x7fe   : > { %v6784_v45 = vadd.f32 %v6736_v9, %v6598_v8  ;;  %v6786_v49 = vadd.f32 %v6777_v10, %v6600_v7 }
 0x7ff   : > { %v6738_v16 = vpop.f32.mrf.mxu1  ;;  %v6779_v6 = vpop.f32.mrf.mxu0 }
 0x800   : > { %v6785_v26 = vadd.f32 %v6738_v16, %v6599_v41  ;;  %v6787_v46 = vadd.f32 %v6779_v6, %v6601_v60 }
 0x801   : > { %v6740_v17 = vpop.f32.mrf.mxu1  ;;  %v6781_v18 = vpop.f32.mrf.mxu0 }
 0x803   : > { %v6741_v11 = vpop.f32.mrf.mxu1  ;;  %v6782_v28 = vpop.f32.mrf.mxu0 }
 0x80d   : > { %v6922_v20 = vpop.f32.mrf.mxu1  ;;  %v6963_v21 = vpop.f32.mrf.mxu0 }
 0x80e   : > { %v6970_v47 = vadd.f32 %v6922_v20, %v6784_v45  ;;  %v6972_v52 = vadd.f32 %v6963_v21, %v6786_v49 }
 0x80f   : > { %v6924_v14 = vpop.f32.mrf.mxu1  ;;  %v6965_v22 = vpop.f32.mrf.mxu0 }
 0x810   : > { %v6971_v56 = vadd.f32 %v6924_v14, %v6785_v26  ;;  %v6973_v57 = vadd.f32 %v6965_v22, %v6787_v46 }
 0x811   : > { %v6926_v23 = vpop.f32.mrf.mxu1  ;;  %v6967_v24 = vpop.f32.mrf.mxu0 }
 0x812   : > { %v7444_v24 = vld [vmem:[%s12086_s12] sm:$0x1] }
 0x813   : > { %v6927_v25 = vpop.f32.mrf.mxu1  ;;  %v6968_v5 = vpop.f32.mrf.mxu0 }
 0x81d   : > { %v7108_v27 = vpop.f32.mrf.mxu1  ;;  %v7149_v15 = vpop.f32.mrf.mxu0 }
 0x81e   : > { %v7156_v58 = vadd.f32 %v7108_v27, %v6970_v47  ;;  %v7158_v54 = vadd.f32 %v7149_v15, %v6972_v52 }
 0x81f   : > { %v7110_v29 = vpop.f32.mrf.mxu1  ;;  %v7151_v30 = vpop.f32.mrf.mxu0 }
 0x820   : > { %v7157_v43 = vadd.f32 %v7110_v29, %v6971_v56  ;;  %v7159_v50 = vadd.f32 %v7151_v30, %v6973_v57 }
 0x821   : > { %v7112_v32 = vpop.f32.mrf.mxu1  ;;  %v7153_v33 = vpop.f32.mrf.mxu0 }
 0x823   : > { %v7113_v35 = vpop.f32.mrf.mxu1  ;;  %v7154_v36 = vpop.f32.mrf.mxu0 }
 0x82d   : > { %v7294_v59 = vpop.f32.mrf.mxu1  ;;  %v7335_v61 = vpop.f32.mrf.mxu0 }
 0x82e   : > { %v7342_v63 = vadd.f32 %v7294_v59, %v7156_v58  ;;  %v7344_v0 = vadd.f32 %v7335_v61, %v7158_v54 }
 0x82f   : > { %v7296_v34 = vpop.f32.mrf.mxu1  ;;  %v7337_v38 = vpop.f32.mrf.mxu0 }
 0x830   : > { %v7368_v48 = vadd.f32 %v7351_v53, %v7342_v63  ;;  %v7370_v1 = vadd.f32 %v7359_v55, %v7344_v0  ;;  %v7343_v2 = vadd.f32 %v7296_v34, %v7157_v43  ;;  %v7345_v3 = vadd.f32 %v7337_v38, %v7159_v50 }
 0x831   : > { %v7298_v4 = vpop.f32.mrf.mxu1  ;;  %v7339_v13 = vpop.f32.mrf.mxu0 }
 0x832   : > { %v7369_v12 = vadd.f32 %v7355_v62, %v7343_v2  ;;  %v7371_v9 = vadd.f32 %v7363_v44, %v7345_v3  ;;  %v7372_v10 = vmax.f32 %v7368_v48, 0.0  ;;  %v7374_v16 = vmax.f32 %v7370_v1, 0.0 }
 0x833   : > { %v7299_v6 = vpop.f32.mrf.mxu1  ;;  %v7340_v17 = vpop.f32.mrf.mxu0 }
 0x834   : > { %v7373_v18 = vmax.f32 %v7369_v12, 0.0  ;;  %v7375_v11 = vmax.f32 %v7371_v9, 0.0  ;;  %v7376_v21 = vpack.c.bf16 %v7372_v10, %v7372_v10  ;;  %v7378_v14 = vpack.c.bf16 %v7374_v16, %v7374_v16 }
 0x836   : > { %v7377_v28 = vpack.c.bf16 %v7373_v18, %v7373_v18  ;;  %v7379_v20 = vpack.c.bf16 %v7375_v11, %v7375_v11 }
 0x838   : > { %7669 = vmatprep.mubr.bf16.mxu1 %v7377_v28  ;;  %7709 = vmatprep.mubr.bf16.mxu0 %v7379_v20 }
 0x839   : > { %7670 = vmatmul.mubr.bf16.vlgmr.msra.gmra.mxu1 %v7376_v21  ;;  %7710 = vmatmul.mubr.bf16.vlgmr.msra.gmra.mxu0 %v7378_v14 }
 0x8f9   : > { %v8694_v22 = vpop.f32.mrf.mxu1  ;;  %v8716_v23 = vpop.f32.mrf.mxu0 }
 0x8fb   : > { %v8695_v25 = vpop.f32.mrf.mxu1  ;;  %v8717_v5 = vpop.f32.mrf.mxu0 }
 0x8fc   : > { %v8696_v27 = vadd.f32 %v8695_v25, %v8694_v22  ;;  %v8718_v31 = vadd.f32 %v8717_v5, %v8716_v23 }
 0x8fd   : > { %v8697_v15 = vpop.f32.mrf.mxu1  ;;  %v8719_v29 = vpop.f32.mrf.mxu0 }
 0x8fe   : > { %v7672_v30 = vadd.f32 %v8696_v27, %v7444_v24 }
 0x8ff   : > { %v8698_v32 = vpop.f32.mrf.mxu1  ;;  %v8720_v33 = vpop.f32.mrf.mxu0 }
 0x900   : > { %v7712_v35 = vadd.f32 %v8718_v31, %v7672_v30 }
 0x902   : > { %7718 = vst.msk [vmem:[%s432_s24] sm:$0x1] %vm7717_vm6, %v7712_v35 }
 0x903   : > { %9879 = shalt.err (!%p9876_p3)
}
 0x904   : > { %s9880_s21 = scalar_lea.hbm %s7730_s16, 16  ;;  %s9884_s24 = scalar_lea.hbm %s12087_s13, 32 }
 0x905   : > { %p9881_p4 = scmp.ne.s32.totalorder %s7730_s16, %s9880_s21  ;;  %p9885_p9 = scmp.lt.s32.totalorder %s7730_s16, %s12087_s13 }
 0x906   : > { %p9886_p10 = scmp.lt.s32.totalorder %s9884_s24, %s9880_s21 }
 0x907   : > { %p9882_p7 = pnand %p9881_p4, %p10040_p5 }
 0x908   : > { %p9887_p11 = por %p9886_p10, %p9885_p9 }
 0x909   : > { %p9883_p8 = pneg %p9882_p7 }
 0x90b   : > { %p9888_p12 = pnand %p9887_p11, %p9883_p8 }
 0x90d   : > { %9891 = shalt.err (!%p9888_p12)
}
 0x90e   : > { %9133 = dma.vmem_to_hbm [thread:$0]  (%p10040_p5), %s7733_s17, 16, %s7730_s16, %s7720_s22  }
 0x90f PF: > { %p9139_p13 = scmp.ge.s32.totalorder %s9926_s28, 2  ;;  %s7744_s29 = sand.u32 1, %s9914_s25  }
 0x910   : > { %s7745_s14 = scalar_lea.sflag [#allocation3], %s7744_s29 }
 0x911   : > { %p9136_p0 = pnand %p9139_p13, %p10044_p6 }
 0x913   : > { %p9137_p1 = pneg %p9136_p0 }
 0x915   : > { %9909 = dma.done.wait (%p9137_p1), %s7745_s14, 16  }
 0x916   : > { %9911 = vsyncadd (%p9137_p1), %s7745_s14, 4294967280  ;;  %s12099_s28 = sld [smem:[#allocation6_spill]]  ;;  %s12102_s25 = smov %s9918_s26 }
 0x917   : > { %s12100_s20 = sld [smem:[#allocation5_spill]] }
 0x918   : > { %s12101_s27 = sld [smem:[#allocation7_spill]] }
 0x91c   : > { %p23_p2 = scmp.ge.s32.totalorder %s12099_s28, 4  }
 0x91d   : > { %s12103_s26 = smov %s12100_s20 }
 0x91e   :  { %25 = sbr.rel (!%p23_p2) target bundleno = 3 (0x3), region = 107 }
 0x923   :  { %7749 = vsyncpa [#allocation3], 1 }
 0x924   :  { %7751 = vsyncpa [#allocation3 + $0x1], 1 }

</bundles_post_ra>
